<compile_context>
chip_gen: v5e
topology: v5e:2x2
jax: 0.10.0
libtpu: 0.0.40
codegen_flags: <defaults>
</compile_context>

<pallas_src>
import functools

import jax
import jax.numpy as jnp
from jax.experimental import pallas as pl
from jax.experimental.pallas import tpu as pltpu


# ----------------------------------------------------------------------------
# Fused FRRU kernel (one grid step = one batch image)
# ----------------------------------------------------------------------------
def _frru_kernel(y_ref, zp_ref, w1y_ref, w1z_ref, b1_ref, w2_ref, b2_ref,
                 wr_ref, br_ref, yp_ref, r_ref, ypad_ref, zpad_ref, hpad_ref,
                 *, H, W):
    f32, bf16 = jnp.float32, jnp.bfloat16
    Wp = W + 2                 # padded row length (left + right zero column)
    M = H * Wp                 # flat rows: W valid output pixels + 2 junk / row
    cout = b1_ref.shape[-1]
    cres = br_ref.shape[-1]

    # ---- build the zero-padded conv1 inputs in VMEM (concat fused by
    #      linearity: y-part and pooled-z-part kept in separate scratches) ----
    ypad_ref[...] = jnp.zeros_like(ypad_ref)
    zpad_ref[...] = jnp.zeros_like(zpad_ref)
    for i in range(H):
        r0 = (i + 1) * Wp + 1                      # interior row i, col offset 1
        ypad_ref[pl.ds(r0, W), :] = y_ref[i]
        zpad_ref[pl.ds(r0, W), :] = zp_ref[i]

    def conv3x3(pads_and_weights, b_ref):
        # 3x3 conv over the flat padded scratch: one contiguous (M, Cin) slice
        # per tap, accumulated on the MXU; bias/BN-shift folded into the init.
        acc = jnp.broadcast_to(b_ref[...], (M, b_ref.shape[-1])).astype(f32)
        for di in range(3):
            for dj in range(3):
                off = di * Wp + dj
                t = di * 3 + dj
                for src_ref, w_ref in pads_and_weights:
                    win = src_ref[pl.ds(off, M), :].astype(bf16)
                    acc = acc + jnp.dot(win, w_ref[t],
                                        preferred_element_type=f32)
        return acc

    # ---- conv1 (+ folded BN) + ReLU ----
    h1 = jnp.maximum(conv3x3([(ypad_ref, w1y_ref), (zpad_ref, w1z_ref)],
                             b1_ref), 0.0)

    # ---- re-pad conv1 output in VMEM for conv2 ----
    hpad_ref[...] = jnp.zeros_like(hpad_ref)
    hpad_ref[pl.ds(Wp + 1, M), :] = h1
    # The two junk columns per image row land exactly on the right/left
    # padding positions of the padded grid; they must stay zero for conv2.
    for i in range(H):
        hpad_ref[pl.ds((i + 1) * Wp + 1 + W, 2), :] = jnp.zeros((2, cout), f32)

    # ---- conv2 (+ folded BN) + ReLU ----
    h2 = jnp.maximum(conv3x3([(hpad_ref, w2_ref)], b2_ref), 0.0)

    # ---- conv_res: 1x1 conv with bias (junk columns are sliced away outside)
    r = jnp.dot(h2.astype(bf16), wr_ref[...], preferred_element_type=f32)
    r = r + jnp.broadcast_to(br_ref[...], (M, cres))

    yp_ref[...] = h2
    r_ref[...] = r


def frru_pallas(y, z_pool, w1y, w1z, b1, w2, b2, wr, br):
    """y, z_pool: (N, H, W, C) f32; weights bf16 tap-major; biases (1, C) f32."""
    N, H, W, cy = y.shape
    cz = z_pool.shape[-1]
    cout = w2.shape[-1]
    cres = wr.shape[-1]
    Wp = W + 2
    M = H * Wp
    pad_rows = (H + 3) * Wp        # >= max tap offset (2*Wp + 2) + M

    kernel = functools.partial(_frru_kernel, H=H, W=W)
    return pl.pallas_call(
        kernel,
        out_shape=(jax.ShapeDtypeStruct((N, M, cout), jnp.float32),
                   jax.ShapeDtypeStruct((N, M, cres), jnp.float32)),
        grid_spec=pltpu.PrefetchScalarGridSpec(
            num_scalar_prefetch=0,
            grid=(N,),
            in_specs=[
                pl.BlockSpec((None, H, W, cy), lambda b: (b, 0, 0, 0)),
                pl.BlockSpec((None, H, W, cz), lambda b: (b, 0, 0, 0)),
                pl.BlockSpec(w1y.shape, lambda b: (0, 0, 0)),
                pl.BlockSpec(w1z.shape, lambda b: (0, 0, 0)),
                pl.BlockSpec(b1.shape, lambda b: (0, 0)),
                pl.BlockSpec(w2.shape, lambda b: (0, 0, 0)),
                pl.BlockSpec(b2.shape, lambda b: (0, 0)),
                pl.BlockSpec(wr.shape, lambda b: (0, 0)),
                pl.BlockSpec(br.shape, lambda b: (0, 0)),
            ],
            out_specs=(
                pl.BlockSpec((None, M, cout), lambda b: (b, 0, 0)),
                pl.BlockSpec((None, M, cres), lambda b: (b, 0, 0)),
            ),
            scratch_shapes=[
                pltpu.VMEM((pad_rows, cy), jnp.float32),
                pltpu.VMEM((pad_rows, cz), jnp.float32),
                pltpu.VMEM((pad_rows, cout), jnp.float32),
            ],
        ),
        compiler_params=pltpu.CompilerParams(
            dimension_semantics=("parallel",)),
    )(y, z_pool, w1y, w1z, b1, w2, b2, wr, br)


# ----------------------------------------------------------------------------
# Module glue: BN folding, pooling, upsample, layout
# ----------------------------------------------------------------------------
def _fold_bn(w_oihw, gamma, beta, mean, var, eps=1e-5):
    s = gamma / jnp.sqrt(var + eps)
    return w_oihw * s[:, None, None, None], beta - mean * s


def _maxpool_nhwc(x, k):
    n, h, w, c = x.shape
    ho, wo = h // k, w // k
    x = x[:, :ho * k, :wo * k, :]
    return x.reshape(n, ho, k, wo, k, c).max(axis=(2, 4))


def frru_forward(params, y_nchw, z_nchw, *, scale):
    n, cy, h, w = y_nchw.shape
    _, cz, hz, wz = z_nchw.shape
    assert hz == h * scale and wz == w * scale, "z must be scale x y spatially"
    # TODO(synk): training-mode BatchNorm statistics and the group_norm=True
    # (GroupNorm) branch are not implemented (eval-mode BN is folded below).

    y = jnp.transpose(y_nchw, (0, 2, 3, 1))           # NHWC
    z = jnp.transpose(z_nchw, (0, 2, 3, 1))
    z_pool = _maxpool_nhwc(z, scale)                  # (n, h, w, 32)

    w1, b1 = _fold_bn(params["conv1_w"], params["bn1_gamma"], params["bn1_beta"],
                      params["bn1_mean"], params["bn1_var"])
    w2, b2 = _fold_bn(params["conv2_w"], params["bn2_gamma"], params["bn2_beta"],
                      params["bn2_mean"], params["bn2_var"])
    cout, cin1 = w1.shape[0], w1.shape[1]
    assert cin1 == cy + cz
    bf16 = jnp.bfloat16

    # (Cout, Cin, 3, 3) -> tap-major (9, Cin, Cout); split along input channels
    # so the y / pooled-z concat is fused into the kernel by linearity.
    w1_t = jnp.transpose(w1, (2, 3, 1, 0)).reshape(9, cin1, cout)
    w1y = w1_t[:, :cy, :].astype(bf16)
    w1z = w1_t[:, cy:, :].astype(bf16)
    w2_t = jnp.transpose(w2, (2, 3, 1, 0)).reshape(9, cout, cout).astype(bf16)
    wr = jnp.transpose(params["conv_res_w"][:, :, 0, 0], (1, 0)).astype(bf16)

    b1k = b1.reshape(1, cout).astype(jnp.float32)
    b2k = b2.reshape(1, cout).astype(jnp.float32)
    brk = params["conv_res_b"].reshape(1, -1).astype(jnp.float32)

    yp_flat, r_flat = frru_pallas(y, z_pool, w1y, w1z, b1k, w2_t, b2k, wr, brk)

    wp = w + 2
    y_prime = yp_flat.reshape(n, h, wp, cout)[:, :, :w, :]
    r = r_flat.reshape(n, h, wp, -1)[:, :, :w, :]

    # nearest upsample by `scale` + residual add on the full-resolution stream.
    r_up = jnp.repeat(jnp.repeat(r, scale, axis=1), scale, axis=2)
    z_prime = z + r_up

    return (jnp.transpose(y_prime, (0, 3, 1, 2)),
            jnp.transpose(z_prime, (0, 3, 1, 2)))


# ----------------------------------------------------------------------------
# Pure-XLA f32 reference (for numerics validation only)
# ----------------------------------------------------------------------------
def _ref_conv(x, w, b, pad):
    out = jax.lax.conv_general_dilated(
        x, w, window_strides=(1, 1), padding=[(pad, pad), (pad, pad)],
        dimension_numbers=("NCHW", "OIHW", "NCHW"))
    return out + b[None, :, None, None]


def frru_reference(params, y, z, *, scale):
    zp = jax.lax.reduce_window(z, -jnp.inf, jax.lax.max,
                               (1, 1, scale, scale), (1, 1, scale, scale),
                               "VALID")
    x = jnp.concatenate([y, zp], axis=1)
    w1, b1 = _fold_bn(params["conv1_w"], params["bn1_gamma"], params["bn1_beta"],
                      params["bn1_mean"], params["bn1_var"])
    w2, b2 = _fold_bn(params["conv2_w"], params["bn2_gamma"], params["bn2_beta"],
                      params["bn2_mean"], params["bn2_var"])
    h = jnp.maximum(_ref_conv(x, w1, b1, 1), 0.0)
    h = jnp.maximum(_ref_conv(h, w2, b2, 1), 0.0)
    r = _ref_conv(h, params["conv_res_w"], params["conv_res_b"], 0)
    r_up = jnp.repeat(jnp.repeat(r, scale, axis=2), scale, axis=3)
    return h, z + r_up


# ----------------------------------------------------------------------------
# Deterministic synthetic parameters
# ----------------------------------------------------------------------------
def init_params(key, prev_channels, out_channels, w_scale=0.05):
    ks = jax.random.split(key, 12)
    cin1 = prev_channels + 32
    f32 = jnp.float32
    return {
        "conv1_w": jax.random.normal(ks[0], (out_channels, cin1, 3, 3), f32) * w_scale,
        "bn1_gamma": 1.0 + 0.1 * jax.random.normal(ks[1], (out_channels,), f32),
        "bn1_beta": 0.1 * jax.random.normal(ks[2], (out_channels,), f32),
        "bn1_mean": 0.1 * jax.random.normal(ks[3], (out_channels,), f32),
        "bn1_var": jnp.abs(1.0 + 0.1 * jax.random.normal(ks[4], (out_channels,), f32)),
        "conv2_w": jax.random.normal(ks[5], (out_channels, out_channels, 3, 3), f32) * w_scale,
        "bn2_gamma": 1.0 + 0.1 * jax.random.normal(ks[6], (out_channels,), f32),
        "bn2_beta": 0.1 * jax.random.normal(ks[7], (out_channels,), f32),
        "bn2_mean": 0.1 * jax.random.normal(ks[8], (out_channels,), f32),
        "bn2_var": jnp.abs(1.0 + 0.1 * jax.random.normal(ks[9], (out_channels,), f32)),
        "conv_res_w": jax.random.normal(ks[10], (32, out_channels, 1, 1), f32) * w_scale,
        "conv_res_b": 0.1 * jax.random.normal(ks[11], (32,), f32),
    }


# ----------------------------------------------------------------------------
# main
# ----------------------------------------------------------------------------
if __name__ == "__main__":
    key = jax.random.PRNGKey(0)
    k_p, k_y, k_z = jax.random.split(key, 3)

    prev_channels, out_channels, scale = 16, 32, 2
    H, W = 8, 8                       # pooled-stream resolution
    Hz, Wz = H * scale, W * scale     # full-resolution residual stream

    params = init_params(k_p, prev_channels, out_channels)
    y = jax.random.normal(k_y, (2, prev_channels, H, W), jnp.float32)   # NCHW
    z = jax.random.normal(k_z, (2, 32, Hz, Wz), jnp.float32)            # NCHW

    fwd = jax.jit(functools.partial(frru_forward, scale=scale))
    y_prime, z_prime = fwd(params, y, z)
    jax.block_until_ready((y_prime, z_prime))

    assert y_prime.shape == (2, out_channels, H, W), y_prime.shape
    assert z_prime.shape == (2, 32, Hz, Wz), z_prime.shape

    # numerics vs. a pure-XLA f32 reference (kernel matmuls run in bf16 on the
    # MXU, so use a loose tolerance; indexing bugs would show up as O(1) error).
    yr, zr = jax.jit(functools.partial(frru_reference, scale=scale))(params, y, z)
    err_y = float(jnp.max(jnp.abs(y_prime - yr)))
    err_z = float(jnp.max(jnp.abs(z_prime - zr)))
    assert err_y < 0.15 and err_z < 0.15, (err_y, err_z)

    print("KERNEL_OK")
</pallas_src>

<mosaic_0001>
module attributes {stable_mosaic.version = 11 : i64} {
  func.func @_frru_kernel(%arg0: i32, %arg1: memref<1x8x8x16xf32, #tpu.memory_space<vmem>>, %arg2: memref<1x8x8x32xf32, #tpu.memory_space<vmem>>, %arg3: memref<9x16x32xbf16, #tpu.memory_space<vmem>>, %arg4: memref<9x32x32xbf16, #tpu.memory_space<vmem>>, %arg5: memref<1x32xf32, #tpu.memory_space<vmem>>, %arg6: memref<9x32x32xbf16, #tpu.memory_space<vmem>>, %arg7: memref<1x32xf32, #tpu.memory_space<vmem>>, %arg8: memref<32x32xbf16, #tpu.memory_space<vmem>>, %arg9: memref<1x32xf32, #tpu.memory_space<vmem>>, %arg10: memref<1x80x32xf32, #tpu.memory_space<vmem>>, %arg11: memref<1x80x32xf32, #tpu.memory_space<vmem>>, %arg12: memref<110x16xf32, #tpu.memory_space<vmem>>, %arg13: memref<110x32xf32, #tpu.memory_space<vmem>>, %arg14: memref<110x32xf32, #tpu.memory_space<vmem>>) attributes {dimension_semantics = [#tpu.dimension_semantics<parallel>], iteration_bounds = array<i64: 2>, scalar_prefetch = 0 : i64, scratch_operands = 3 : i64, tpu.core_type = #tpu.core_type<tc>, window_params = [{transform_indices = @transform_0, window_bounds = array<i64: 1, 8, 8, 16>}, {transform_indices = @transform_1, window_bounds = array<i64: 1, 8, 8, 32>}, {pipeline_mode = #tpu.pipeline_mode<synchronous>, transform_indices = @transform_2, window_bounds = array<i64: 9, 16, 32>}, {pipeline_mode = #tpu.pipeline_mode<synchronous>, transform_indices = @transform_3, window_bounds = array<i64: 9, 32, 32>}, {pipeline_mode = #tpu.pipeline_mode<synchronous>, transform_indices = @transform_4, window_bounds = array<i64: 1, 32>}, {pipeline_mode = #tpu.pipeline_mode<synchronous>, transform_indices = @transform_5, window_bounds = array<i64: 9, 32, 32>}, {pipeline_mode = #tpu.pipeline_mode<synchronous>, transform_indices = @transform_6, window_bounds = array<i64: 1, 32>}, {pipeline_mode = #tpu.pipeline_mode<synchronous>, transform_indices = @transform_7, window_bounds = array<i64: 32, 32>}, {pipeline_mode = #tpu.pipeline_mode<synchronous>, transform_indices = @transform_8, window_bounds = array<i64: 1, 32>}, {transform_indices = @transform_9, window_bounds = array<i64: 1, 80, 32>}, {transform_indices = @transform_10, window_bounds = array<i64: 1, 80, 32>}]} {
    %cst = arith.constant 0.000000e+00 : f32
    %0 = vector.broadcast %cst : f32 to vector<110x16xf32>
    %c0 = arith.constant 0 : index
    %c0_0 = arith.constant 0 : index
    %1 = vector.load %arg12[%c0, %c0_0] : memref<110x16xf32, #tpu.memory_space<vmem>>, vector<110x16xf32>
    tpu.vector_store %arg12[%c0, %c0_0], %0 {strides = array<i32>} : memref<110x16xf32, #tpu.memory_space<vmem>>, vector<110x16xf32>,
    %cst_1 = arith.constant 0.000000e+00 : f32
    %2 = vector.broadcast %cst_1 : f32 to vector<110x32xf32>
    %c0_2 = arith.constant 0 : index
    %c0_3 = arith.constant 0 : index
    %3 = vector.load %arg13[%c0_2, %c0_3] : memref<110x32xf32, #tpu.memory_space<vmem>>, vector<110x32xf32>
    tpu.vector_store %arg13[%c0_2, %c0_3], %2 {strides = array<i32>} : memref<110x32xf32, #tpu.memory_space<vmem>>, vector<110x32xf32>,
    %c0_4 = arith.constant 0 : index
    %c0_5 = arith.constant 0 : index
    %c0_6 = arith.constant 0 : index
    %c0_7 = arith.constant 0 : index
    %4 = vector.load %arg1[%c0_4, %c0_5, %c0_6, %c0_7] : memref<1x8x8x16xf32, #tpu.memory_space<vmem>>, vector<1x1x8x16xf32>
    %5 = vector.shape_cast %4 : vector<1x1x8x16xf32> to vector<8x16xf32>
    %c11 = arith.constant 11 : index
    %c0_8 = arith.constant 0 : index
    %6 = vector.load %arg12[%c11, %c0_8] : memref<110x16xf32, #tpu.memory_space<vmem>>, vector<8x16xf32>
    tpu.vector_store %arg12[%c11, %c0_8], %5 {strides = array<i32>} : memref<110x16xf32, #tpu.memory_space<vmem>>, vector<8x16xf32>,
    %c0_9 = arith.constant 0 : index
    %c0_10 = arith.constant 0 : index
    %c0_11 = arith.constant 0 : index
    %c0_12 = arith.constant 0 : index
    %7 = vector.load %arg2[%c0_9, %c0_10, %c0_11, %c0_12] : memref<1x8x8x32xf32, #tpu.memory_space<vmem>>, vector<1x1x8x32xf32>
    %8 = vector.shape_cast %7 : vector<1x1x8x32xf32> to vector<8x32xf32>
    %c11_13 = arith.constant 11 : index
    %c0_14 = arith.constant 0 : index
    %9 = vector.load %arg13[%c11_13, %c0_14] : memref<110x32xf32, #tpu.memory_space<vmem>>, vector<8x32xf32>
    tpu.vector_store %arg13[%c11_13, %c0_14], %8 {strides = array<i32>} : memref<110x32xf32, #tpu.memory_space<vmem>>, vector<8x32xf32>,
    %c0_15 = arith.constant 0 : index
    %c1 = arith.constant 1 : index
    %c0_16 = arith.constant 0 : index
    %c0_17 = arith.constant 0 : index
    %10 = vector.load %arg1[%c0_15, %c1, %c0_16, %c0_17] : memref<1x8x8x16xf32, #tpu.memory_space<vmem>>, vector<1x1x8x16xf32>
    %11 = vector.shape_cast %10 : vector<1x1x8x16xf32> to vector<8x16xf32>
    %c21 = arith.constant 21 : index
    %c0_18 = arith.constant 0 : index
    %12 = vector.load %arg12[%c21, %c0_18] : memref<110x16xf32, #tpu.memory_space<vmem>>, vector<8x16xf32>
    tpu.vector_store %arg12[%c21, %c0_18], %11 {strides = array<i32>} : memref<110x16xf32, #tpu.memory_space<vmem>>, vector<8x16xf32>,
    %c0_19 = arith.constant 0 : index
    %c1_20 = arith.constant 1 : index
    %c0_21 = arith.constant 0 : index
    %c0_22 = arith.constant 0 : index
    %13 = vector.load %arg2[%c0_19, %c1_20, %c0_21, %c0_22] : memref<1x8x8x32xf32, #tpu.memory_space<vmem>>, vector<1x1x8x32xf32>
    %14 = vector.shape_cast %13 : vector<1x1x8x32xf32> to vector<8x32xf32>
    %c21_23 = arith.constant 21 : index
    %c0_24 = arith.constant 0 : index
    %15 = vector.load %arg13[%c21_23, %c0_24] : memref<110x32xf32, #tpu.memory_space<vmem>>, vector<8x32xf32>
    tpu.vector_store %arg13[%c21_23, %c0_24], %14 {strides = array<i32>} : memref<110x32xf32, #tpu.memory_space<vmem>>, vector<8x32xf32>,
    %c0_25 = arith.constant 0 : index
    %c2 = arith.constant 2 : index
    %c0_26 = arith.constant 0 : index
    %c0_27 = arith.constant 0 : index
    %16 = vector.load %arg1[%c0_25, %c2, %c0_26, %c0_27] : memref<1x8x8x16xf32, #tpu.memory_space<vmem>>, vector<1x1x8x16xf32>
    %17 = vector.shape_cast %16 : vector<1x1x8x16xf32> to vector<8x16xf32>
    %c31 = arith.constant 31 : index
    %c0_28 = arith.constant 0 : index
    %18 = vector.load %arg12[%c31, %c0_28] : memref<110x16xf32, #tpu.memory_space<vmem>>, vector<8x16xf32>
    tpu.vector_store %arg12[%c31, %c0_28], %17 {strides = array<i32>} : memref<110x16xf32, #tpu.memory_space<vmem>>, vector<8x16xf32>,
    %c0_29 = arith.constant 0 : index
    %c2_30 = arith.constant 2 : index
    %c0_31 = arith.constant 0 : index
    %c0_32 = arith.constant 0 : index
    %19 = vector.load %arg2[%c0_29, %c2_30, %c0_31, %c0_32] : memref<1x8x8x32xf32, #tpu.memory_space<vmem>>, vector<1x1x8x32xf32>
    %20 = vector.shape_cast %19 : vector<1x1x8x32xf32> to vector<8x32xf32>
    %c31_33 = arith.constant 31 : index
    %c0_34 = arith.constant 0 : index
    %21 = vector.load %arg13[%c31_33, %c0_34] : memref<110x32xf32, #tpu.memory_space<vmem>>, vector<8x32xf32>
    tpu.vector_store %arg13[%c31_33, %c0_34], %20 {strides = array<i32>} : memref<110x32xf32, #tpu.memory_space<vmem>>, vector<8x32xf32>,
    %c0_35 = arith.constant 0 : index
    %c3 = arith.constant 3 : index
    %c0_36 = arith.constant 0 : index
    %c0_37 = arith.constant 0 : index
    %22 = vector.load %arg1[%c0_35, %c3, %c0_36, %c0_37] : memref<1x8x8x16xf32, #tpu.memory_space<vmem>>, vector<1x1x8x16xf32>
    %23 = vector.shape_cast %22 : vector<1x1x8x16xf32> to vector<8x16xf32>
    %c41 = arith.constant 41 : index
    %c0_38 = arith.constant 0 : index
    %24 = vector.load %arg12[%c41, %c0_38] : memref<110x16xf32, #tpu.memory_space<vmem>>, vector<8x16xf32>
    tpu.vector_store %arg12[%c41, %c0_38], %23 {strides = array<i32>} : memref<110x16xf32, #tpu.memory_space<vmem>>, vector<8x16xf32>,
    %c0_39 = arith.constant 0 : index
    %c3_40 = arith.constant 3 : index
    %c0_41 = arith.constant 0 : index
    %c0_42 = arith.constant 0 : index
    %25 = vector.load %arg2[%c0_39, %c3_40, %c0_41, %c0_42] : memref<1x8x8x32xf32, #tpu.memory_space<vmem>>, vector<1x1x8x32xf32>
    %26 = vector.shape_cast %25 : vector<1x1x8x32xf32> to vector<8x32xf32>
    %c41_43 = arith.constant 41 : index
    %c0_44 = arith.constant 0 : index
    %27 = vector.load %arg13[%c41_43, %c0_44] : memref<110x32xf32, #tpu.memory_space<vmem>>, vector<8x32xf32>
    tpu.vector_store %arg13[%c41_43, %c0_44], %26 {strides = array<i32>} : memref<110x32xf32, #tpu.memory_space<vmem>>, vector<8x32xf32>,
    %c0_45 = arith.constant 0 : index
    %c4 = arith.constant 4 : index
    %c0_46 = arith.constant 0 : index
    %c0_47 = arith.constant 0 : index
    %28 = vector.load %arg1[%c0_45, %c4, %c0_46, %c0_47] : memref<1x8x8x16xf32, #tpu.memory_space<vmem>>, vector<1x1x8x16xf32>
    %29 = vector.shape_cast %28 : vector<1x1x8x16xf32> to vector<8x16xf32>
    %c51 = arith.constant 51 : index
    %c0_48 = arith.constant 0 : index
    %30 = vector.load %arg12[%c51, %c0_48] : memref<110x16xf32, #tpu.memory_space<vmem>>, vector<8x16xf32>
    tpu.vector_store %arg12[%c51, %c0_48], %29 {strides = array<i32>} : memref<110x16xf32, #tpu.memory_space<vmem>>, vector<8x16xf32>,
    %c0_49 = arith.constant 0 : index
    %c4_50 = arith.constant 4 : index
    %c0_51 = arith.constant 0 : index
    %c0_52 = arith.constant 0 : index
    %31 = vector.load %arg2[%c0_49, %c4_50, %c0_51, %c0_52] : memref<1x8x8x32xf32, #tpu.memory_space<vmem>>, vector<1x1x8x32xf32>
    %32 = vector.shape_cast %31 : vector<1x1x8x32xf32> to vector<8x32xf32>
    %c51_53 = arith.constant 51 : index
    %c0_54 = arith.constant 0 : index
    %33 = vector.load %arg13[%c51_53, %c0_54] : memref<110x32xf32, #tpu.memory_space<vmem>>, vector<8x32xf32>
    tpu.vector_store %arg13[%c51_53, %c0_54], %32 {strides = array<i32>} : memref<110x32xf32, #tpu.memory_space<vmem>>, vector<8x32xf32>,
    %c0_55 = arith.constant 0 : index
    %c5 = arith.constant 5 : index
    %c0_56 = arith.constant 0 : index
    %c0_57 = arith.constant 0 : index
    %34 = vector.load %arg1[%c0_55, %c5, %c0_56, %c0_57] : memref<1x8x8x16xf32, #tpu.memory_space<vmem>>, vector<1x1x8x16xf32>
    %35 = vector.shape_cast %34 : vector<1x1x8x16xf32> to vector<8x16xf32>
    %c61 = arith.constant 61 : index
    %c0_58 = arith.constant 0 : index
    %36 = vector.load %arg12[%c61, %c0_58] : memref<110x16xf32, #tpu.memory_space<vmem>>, vector<8x16xf32>
    tpu.vector_store %arg12[%c61, %c0_58], %35 {strides = array<i32>} : memref<110x16xf32, #tpu.memory_space<vmem>>, vector<8x16xf32>,
    %c0_59 = arith.constant 0 : index
    %c5_60 = arith.constant 5 : index
    %c0_61 = arith.constant 0 : index
    %c0_62 = arith.constant 0 : index
    %37 = vector.load %arg2[%c0_59, %c5_60, %c0_61, %c0_62] : memref<1x8x8x32xf32, #tpu.memory_space<vmem>>, vector<1x1x8x32xf32>
    %38 = vector.shape_cast %37 : vector<1x1x8x32xf32> to vector<8x32xf32>
    %c61_63 = arith.constant 61 : index
    %c0_64 = arith.constant 0 : index
    %39 = vector.load %arg13[%c61_63, %c0_64] : memref<110x32xf32, #tpu.memory_space<vmem>>, vector<8x32xf32>
    tpu.vector_store %arg13[%c61_63, %c0_64], %38 {strides = array<i32>} : memref<110x32xf32, #tpu.memory_space<vmem>>, vector<8x32xf32>,
    %c0_65 = arith.constant 0 : index
    %c6 = arith.constant 6 : index
    %c0_66 = arith.constant 0 : index
    %c0_67 = arith.constant 0 : index
    %40 = vector.load %arg1[%c0_65, %c6, %c0_66, %c0_67] : memref<1x8x8x16xf32, #tpu.memory_space<vmem>>, vector<1x1x8x16xf32>
    %41 = vector.shape_cast %40 : vector<1x1x8x16xf32> to vector<8x16xf32>
    %c71 = arith.constant 71 : index
    %c0_68 = arith.constant 0 : index
    %42 = vector.load %arg12[%c71, %c0_68] : memref<110x16xf32, #tpu.memory_space<vmem>>, vector<8x16xf32>
    tpu.vector_store %arg12[%c71, %c0_68], %41 {strides = array<i32>} : memref<110x16xf32, #tpu.memory_space<vmem>>, vector<8x16xf32>,
    %c0_69 = arith.constant 0 : index
    %c6_70 = arith.constant 6 : index
    %c0_71 = arith.constant 0 : index
    %c0_72 = arith.constant 0 : index
    %43 = vector.load %arg2[%c0_69, %c6_70, %c0_71, %c0_72] : memref<1x8x8x32xf32, #tpu.memory_space<vmem>>, vector<1x1x8x32xf32>
    %44 = vector.shape_cast %43 : vector<1x1x8x32xf32> to vector<8x32xf32>
    %c71_73 = arith.constant 71 : index
    %c0_74 = arith.constant 0 : index
    %45 = vector.load %arg13[%c71_73, %c0_74] : memref<110x32xf32, #tpu.memory_space<vmem>>, vector<8x32xf32>
    tpu.vector_store %arg13[%c71_73, %c0_74], %44 {strides = array<i32>} : memref<110x32xf32, #tpu.memory_space<vmem>>, vector<8x32xf32>,
    %c0_75 = arith.constant 0 : index
    %c7 = arith.constant 7 : index
    %c0_76 = arith.constant 0 : index
    %c0_77 = arith.constant 0 : index
    %46 = vector.load %arg1[%c0_75, %c7, %c0_76, %c0_77] : memref<1x8x8x16xf32, #tpu.memory_space<vmem>>, vector<1x1x8x16xf32>
    %47 = vector.shape_cast %46 : vector<1x1x8x16xf32> to vector<8x16xf32>
    %c81 = arith.constant 81 : index
    %c0_78 = arith.constant 0 : index
    %48 = vector.load %arg12[%c81, %c0_78] : memref<110x16xf32, #tpu.memory_space<vmem>>, vector<8x16xf32>
    tpu.vector_store %arg12[%c81, %c0_78], %47 {strides = array<i32>} : memref<110x16xf32, #tpu.memory_space<vmem>>, vector<8x16xf32>,
    %c0_79 = arith.constant 0 : index
    %c7_80 = arith.constant 7 : index
    %c0_81 = arith.constant 0 : index
    %c0_82 = arith.constant 0 : index
    %49 = vector.load %arg2[%c0_79, %c7_80, %c0_81, %c0_82] : memref<1x8x8x32xf32, #tpu.memory_space<vmem>>, vector<1x1x8x32xf32>
    %50 = vector.shape_cast %49 : vector<1x1x8x32xf32> to vector<8x32xf32>
    %c81_83 = arith.constant 81 : index
    %c0_84 = arith.constant 0 : index
    %51 = vector.load %arg13[%c81_83, %c0_84] : memref<110x32xf32, #tpu.memory_space<vmem>>, vector<8x32xf32>
    tpu.vector_store %arg13[%c81_83, %c0_84], %50 {strides = array<i32>} : memref<110x32xf32, #tpu.memory_space<vmem>>, vector<8x32xf32>,
    %c0_85 = arith.constant 0 : index
    %c0_86 = arith.constant 0 : index
    %52 = vector.load %arg5[%c0_85, %c0_86] : memref<1x32xf32, #tpu.memory_space<vmem>>, vector<1x32xf32>
    %53 = vector.shape_cast %52 : vector<1x32xf32> to vector<1x32xf32>
    %54 = vector.broadcast %53 : vector<1x32xf32> to vector<80x32xf32>
    %c0_87 = arith.constant 0 : index
    %c0_88 = arith.constant 0 : index
    %55 = vector.load %arg12[%c0_87, %c0_88] : memref<110x16xf32, #tpu.memory_space<vmem>>, vector<80x16xf32>
    %56 = arith.truncf %55 : vector<80x16xf32> to vector<80x16xbf16>
    %c0_89 = arith.constant 0 : index
    %c0_90 = arith.constant 0 : index
    %c0_91 = arith.constant 0 : index
    %57 = vector.load %arg3[%c0_89, %c0_90, %c0_91] : memref<9x16x32xbf16, #tpu.memory_space<vmem>>, vector<1x16x32xbf16>
    %58 = vector.shape_cast %57 : vector<1x16x32xbf16> to vector<16x32xbf16>
    %cst_92 = arith.constant dense<0.000000e+00> : vector<80x32xf32>
    %59 = tpu.matmul %56, %58, %cst_92 {dimension_numbers = #tpu.dot_dimension_numbers<[1], [0], [0], [1], [0, 0, 1, 1], [], []>} : vector<80x16xbf16>, vector<16x32xbf16>, vector<80x32xf32> -> vector<80x32xf32>
    %60 = arith.addf %54, %59 : vector<80x32xf32>
    %c0_93 = arith.constant 0 : index
    %c0_94 = arith.constant 0 : index
    %61 = vector.load %arg13[%c0_93, %c0_94] : memref<110x32xf32, #tpu.memory_space<vmem>>, vector<80x32xf32>
    %62 = arith.truncf %61 : vector<80x32xf32> to vector<80x32xbf16>
    %c0_95 = arith.constant 0 : index
    %c0_96 = arith.constant 0 : index
    %c0_97 = arith.constant 0 : index
    %63 = vector.load %arg4[%c0_95, %c0_96, %c0_97] : memref<9x32x32xbf16, #tpu.memory_space<vmem>>, vector<1x32x32xbf16>
    %64 = vector.shape_cast %63 : vector<1x32x32xbf16> to vector<32x32xbf16>
    %cst_98 = arith.constant dense<0.000000e+00> : vector<80x32xf32>
    %65 = tpu.matmul %62, %64, %cst_98 {dimension_numbers = #tpu.dot_dimension_numbers<[1], [0], [0], [1], [0, 0, 1, 1], [], []>} : vector<80x32xbf16>, vector<32x32xbf16>, vector<80x32xf32> -> vector<80x32xf32>
    %66 = arith.addf %60, %65 : vector<80x32xf32>
    %c1_99 = arith.constant 1 : index
    %c0_100 = arith.constant 0 : index
    %67 = vector.load %arg12[%c1_99, %c0_100] : memref<110x16xf32, #tpu.memory_space<vmem>>, vector<80x16xf32>
    %68 = arith.truncf %67 : vector<80x16xf32> to vector<80x16xbf16>
    %c1_101 = arith.constant 1 : index
    %c0_102 = arith.constant 0 : index
    %c0_103 = arith.constant 0 : index
    %69 = vector.load %arg3[%c1_101, %c0_102, %c0_103] : memref<9x16x32xbf16, #tpu.memory_space<vmem>>, vector<1x16x32xbf16>
    %70 = vector.shape_cast %69 : vector<1x16x32xbf16> to vector<16x32xbf16>
    %cst_104 = arith.constant dense<0.000000e+00> : vector<80x32xf32>
    %71 = tpu.matmul %68, %70, %cst_104 {dimension_numbers = #tpu.dot_dimension_numbers<[1], [0], [0], [1], [0, 0, 1, 1], [], []>} : vector<80x16xbf16>, vector<16x32xbf16>, vector<80x32xf32> -> vector<80x32xf32>
    %72 = arith.addf %66, %71 : vector<80x32xf32>
    %c1_105 = arith.constant 1 : index
    %c0_106 = arith.constant 0 : index
    %73 = vector.load %arg13[%c1_105, %c0_106] : memref<110x32xf32, #tpu.memory_space<vmem>>, vector<80x32xf32>
    %74 = arith.truncf %73 : vector<80x32xf32> to vector<80x32xbf16>
    %c1_107 = arith.constant 1 : index
    %c0_108 = arith.constant 0 : index
    %c0_109 = arith.constant 0 : index
    %75 = vector.load %arg4[%c1_107, %c0_108, %c0_109] : memref<9x32x32xbf16, #tpu.memory_space<vmem>>, vector<1x32x32xbf16>
    %76 = vector.shape_cast %75 : vector<1x32x32xbf16> to vector<32x32xbf16>
    %cst_110 = arith.constant dense<0.000000e+00> : vector<80x32xf32>
    %77 = tpu.matmul %74, %76, %cst_110 {dimension_numbers = #tpu.dot_dimension_numbers<[1], [0], [0], [1], [0, 0, 1, 1], [], []>} : vector<80x32xbf16>, vector<32x32xbf16>, vector<80x32xf32> -> vector<80x32xf32>
    %78 = arith.addf %72, %77 : vector<80x32xf32>
    %c2_111 = arith.constant 2 : index
    %c0_112 = arith.constant 0 : index
    %79 = vector.load %arg12[%c2_111, %c0_112] : memref<110x16xf32, #tpu.memory_space<vmem>>, vector<80x16xf32>
    %80 = arith.truncf %79 : vector<80x16xf32> to vector<80x16xbf16>
    %c2_113 = arith.constant 2 : index
    %c0_114 = arith.constant 0 : index
    %c0_115 = arith.constant 0 : index
    %81 = vector.load %arg3[%c2_113, %c0_114, %c0_115] : memref<9x16x32xbf16, #tpu.memory_space<vmem>>, vector<1x16x32xbf16>
    %82 = vector.shape_cast %81 : vector<1x16x32xbf16> to vector<16x32xbf16>
    %cst_116 = arith.constant dense<0.000000e+00> : vector<80x32xf32>
    %83 = tpu.matmul %80, %82, %cst_116 {dimension_numbers = #tpu.dot_dimension_numbers<[1], [0], [0], [1], [0, 0, 1, 1], [], []>} : vector<80x16xbf16>, vector<16x32xbf16>, vector<80x32xf32> -> vector<80x32xf32>
    %84 = arith.addf %78, %83 : vector<80x32xf32>
    %c2_117 = arith.constant 2 : index
    %c0_118 = arith.constant 0 : index
    %85 = vector.load %arg13[%c2_117, %c0_118] : memref<110x32xf32, #tpu.memory_space<vmem>>, vector<80x32xf32>
    %86 = arith.truncf %85 : vector<80x32xf32> to vector<80x32xbf16>
    %c2_119 = arith.constant 2 : index
    %c0_120 = arith.constant 0 : index
    %c0_121 = arith.constant 0 : index
    %87 = vector.load %arg4[%c2_119, %c0_120, %c0_121] : memref<9x32x32xbf16, #tpu.memory_space<vmem>>, vector<1x32x32xbf16>
    %88 = vector.shape_cast %87 : vector<1x32x32xbf16> to vector<32x32xbf16>
    %cst_122 = arith.constant dense<0.000000e+00> : vector<80x32xf32>
    %89 = tpu.matmul %86, %88, %cst_122 {dimension_numbers = #tpu.dot_dimension_numbers<[1], [0], [0], [1], [0, 0, 1, 1], [], []>} : vector<80x32xbf16>, vector<32x32xbf16>, vector<80x32xf32> -> vector<80x32xf32>
    %90 = arith.addf %84, %89 : vector<80x32xf32>
    %c10 = arith.constant 10 : index
    %c0_123 = arith.constant 0 : index
    %91 = vector.load %arg12[%c10, %c0_123] : memref<110x16xf32, #tpu.memory_space<vmem>>, vector<80x16xf32>
    %92 = arith.truncf %91 : vector<80x16xf32> to vector<80x16xbf16>
    %c3_124 = arith.constant 3 : index
    %c0_125 = arith.constant 0 : index
    %c0_126 = arith.constant 0 : index
    %93 = vector.load %arg3[%c3_124, %c0_125, %c0_126] : memref<9x16x32xbf16, #tpu.memory_space<vmem>>, vector<1x16x32xbf16>
    %94 = vector.shape_cast %93 : vector<1x16x32xbf16> to vector<16x32xbf16>
    %cst_127 = arith.constant dense<0.000000e+00> : vector<80x32xf32>
    %95 = tpu.matmul %92, %94, %cst_127 {dimension_numbers = #tpu.dot_dimension_numbers<[1], [0], [0], [1], [0, 0, 1, 1], [], []>} : vector<80x16xbf16>, vector<16x32xbf16>, vector<80x32xf32> -> vector<80x32xf32>
    %96 = arith.addf %90, %95 : vector<80x32xf32>
    %c10_128 = arith.constant 10 : index
    %c0_129 = arith.constant 0 : index
    %97 = vector.load %arg13[%c10_128, %c0_129] : memref<110x32xf32, #tpu.memory_space<vmem>>, vector<80x32xf32>
    %98 = arith.truncf %97 : vector<80x32xf32> to vector<80x32xbf16>
    %c3_130 = arith.constant 3 : index
    %c0_131 = arith.constant 0 : index
    %c0_132 = arith.constant 0 : index
    %99 = vector.load %arg4[%c3_130, %c0_131, %c0_132] : memref<9x32x32xbf16, #tpu.memory_space<vmem>>, vector<1x32x32xbf16>
    %100 = vector.shape_cast %99 : vector<1x32x32xbf16> to vector<32x32xbf16>
    %cst_133 = arith.constant dense<0.000000e+00> : vector<80x32xf32>
    %101 = tpu.matmul %98, %100, %cst_133 {dimension_numbers = #tpu.dot_dimension_numbers<[1], [0], [0], [1], [0, 0, 1, 1], [], []>} : vector<80x32xbf16>, vector<32x32xbf16>, vector<80x32xf32> -> vector<80x32xf32>
    %102 = arith.addf %96, %101 : vector<80x32xf32>
    %c11_134 = arith.constant 11 : index
    %c0_135 = arith.constant 0 : index
    %103 = vector.load %arg12[%c11_134, %c0_135] : memref<110x16xf32, #tpu.memory_space<vmem>>, vector<80x16xf32>
    %104 = arith.truncf %103 : vector<80x16xf32> to vector<80x16xbf16>
    %c4_136 = arith.constant 4 : index
    %c0_137 = arith.constant 0 : index
    %c0_138 = arith.constant 0 : index
    %105 = vector.load %arg3[%c4_136, %c0_137, %c0_138] : memref<9x16x32xbf16, #tpu.memory_space<vmem>>, vector<1x16x32xbf16>
    %106 = vector.shape_cast %105 : vector<1x16x32xbf16> to vector<16x32xbf16>
    %cst_139 = arith.constant dense<0.000000e+00> : vector<80x32xf32>
    %107 = tpu.matmul %104, %106, %cst_139 {dimension_numbers = #tpu.dot_dimension_numbers<[1], [0], [0], [1], [0, 0, 1, 1], [], []>} : vector<80x16xbf16>, vector<16x32xbf16>, vector<80x32xf32> -> vector<80x32xf32>
    %108 = arith.addf %102, %107 : vector<80x32xf32>
    %c11_140 = arith.constant 11 : index
    %c0_141 = arith.constant 0 : index
    %109 = vector.load %arg13[%c11_140, %c0_141] : memref<110x32xf32, #tpu.memory_space<vmem>>, vector<80x32xf32>
    %110 = arith.truncf %109 : vector<80x32xf32> to vector<80x32xbf16>
    %c4_142 = arith.constant 4 : index
    %c0_143 = arith.constant 0 : index
    %c0_144 = arith.constant 0 : index
    %111 = vector.load %arg4[%c4_142, %c0_143, %c0_144] : memref<9x32x32xbf16, #tpu.memory_space<vmem>>, vector<1x32x32xbf16>
    %112 = vector.shape_cast %111 : vector<1x32x32xbf16> to vector<32x32xbf16>
    %cst_145 = arith.constant dense<0.000000e+00> : vector<80x32xf32>
    %113 = tpu.matmul %110, %112, %cst_145 {dimension_numbers = #tpu.dot_dimension_numbers<[1], [0], [0], [1], [0, 0, 1, 1], [], []>} : vector<80x32xbf16>, vector<32x32xbf16>, vector<80x32xf32> -> vector<80x32xf32>
    %114 = arith.addf %108, %113 : vector<80x32xf32>
    %c12 = arith.constant 12 : index
    %c0_146 = arith.constant 0 : index
    %115 = vector.load %arg12[%c12, %c0_146] : memref<110x16xf32, #tpu.memory_space<vmem>>, vector<80x16xf32>
    %116 = arith.truncf %115 : vector<80x16xf32> to vector<80x16xbf16>
    %c5_147 = arith.constant 5 : index
    %c0_148 = arith.constant 0 : index
    %c0_149 = arith.constant 0 : index
    %117 = vector.load %arg3[%c5_147, %c0_148, %c0_149] : memref<9x16x32xbf16, #tpu.memory_space<vmem>>, vector<1x16x32xbf16>
    %118 = vector.shape_cast %117 : vector<1x16x32xbf16> to vector<16x32xbf16>
    %cst_150 = arith.constant dense<0.000000e+00> : vector<80x32xf32>
    %119 = tpu.matmul %116, %118, %cst_150 {dimension_numbers = #tpu.dot_dimension_numbers<[1], [0], [0], [1], [0, 0, 1, 1], [], []>} : vector<80x16xbf16>, vector<16x32xbf16>, vector<80x32xf32> -> vector<80x32xf32>
    %120 = arith.addf %114, %119 : vector<80x32xf32>
    %c12_151 = arith.constant 12 : index
    %c0_152 = arith.constant 0 : index
    %121 = vector.load %arg13[%c12_151, %c0_152] : memref<110x32xf32, #tpu.memory_space<vmem>>, vector<80x32xf32>
    %122 = arith.truncf %121 : vector<80x32xf32> to vector<80x32xbf16>
    %c5_153 = arith.constant 5 : index
    %c0_154 = arith.constant 0 : index
    %c0_155 = arith.constant 0 : index
    %123 = vector.load %arg4[%c5_153, %c0_154, %c0_155] : memref<9x32x32xbf16, #tpu.memory_space<vmem>>, vector<1x32x32xbf16>
    %124 = vector.shape_cast %123 : vector<1x32x32xbf16> to vector<32x32xbf16>
    %cst_156 = arith.constant dense<0.000000e+00> : vector<80x32xf32>
    %125 = tpu.matmul %122, %124, %cst_156 {dimension_numbers = #tpu.dot_dimension_numbers<[1], [0], [0], [1], [0, 0, 1, 1], [], []>} : vector<80x32xbf16>, vector<32x32xbf16>, vector<80x32xf32> -> vector<80x32xf32>
    %126 = arith.addf %120, %125 : vector<80x32xf32>
    %c20 = arith.constant 20 : index
    %c0_157 = arith.constant 0 : index
    %127 = vector.load %arg12[%c20, %c0_157] : memref<110x16xf32, #tpu.memory_space<vmem>>, vector<80x16xf32>
    %128 = arith.truncf %127 : vector<80x16xf32> to vector<80x16xbf16>
    %c6_158 = arith.constant 6 : index
    %c0_159 = arith.constant 0 : index
    %c0_160 = arith.constant 0 : index
    %129 = vector.load %arg3[%c6_158, %c0_159, %c0_160] : memref<9x16x32xbf16, #tpu.memory_space<vmem>>, vector<1x16x32xbf16>
    %130 = vector.shape_cast %129 : vector<1x16x32xbf16> to vector<16x32xbf16>
    %cst_161 = arith.constant dense<0.000000e+00> : vector<80x32xf32>
    %131 = tpu.matmul %128, %130, %cst_161 {dimension_numbers = #tpu.dot_dimension_numbers<[1], [0], [0], [1], [0, 0, 1, 1], [], []>} : vector<80x16xbf16>, vector<16x32xbf16>, vector<80x32xf32> -> vector<80x32xf32>
    %132 = arith.addf %126, %131 : vector<80x32xf32>
    %c20_162 = arith.constant 20 : index
    %c0_163 = arith.constant 0 : index
    %133 = vector.load %arg13[%c20_162, %c0_163] : memref<110x32xf32, #tpu.memory_space<vmem>>, vector<80x32xf32>
    %134 = arith.truncf %133 : vector<80x32xf32> to vector<80x32xbf16>
    %c6_164 = arith.constant 6 : index
    %c0_165 = arith.constant 0 : index
    %c0_166 = arith.constant 0 : index
    %135 = vector.load %arg4[%c6_164, %c0_165, %c0_166] : memref<9x32x32xbf16, #tpu.memory_space<vmem>>, vector<1x32x32xbf16>
    %136 = vector.shape_cast %135 : vector<1x32x32xbf16> to vector<32x32xbf16>
    %cst_167 = arith.constant dense<0.000000e+00> : vector<80x32xf32>
    %137 = tpu.matmul %134, %136, %cst_167 {dimension_numbers = #tpu.dot_dimension_numbers<[1], [0], [0], [1], [0, 0, 1, 1], [], []>} : vector<80x32xbf16>, vector<32x32xbf16>, vector<80x32xf32> -> vector<80x32xf32>
    %138 = arith.addf %132, %137 : vector<80x32xf32>
    %c21_168 = arith.constant 21 : index
    %c0_169 = arith.constant 0 : index
    %139 = vector.load %arg12[%c21_168, %c0_169] : memref<110x16xf32, #tpu.memory_space<vmem>>, vector<80x16xf32>
    %140 = arith.truncf %139 : vector<80x16xf32> to vector<80x16xbf16>
    %c7_170 = arith.constant 7 : index
    %c0_171 = arith.constant 0 : index
    %c0_172 = arith.constant 0 : index
    %141 = vector.load %arg3[%c7_170, %c0_171, %c0_172] : memref<9x16x32xbf16, #tpu.memory_space<vmem>>, vector<1x16x32xbf16>
    %142 = vector.shape_cast %141 : vector<1x16x32xbf16> to vector<16x32xbf16>
    %cst_173 = arith.constant dense<0.000000e+00> : vector<80x32xf32>
    %143 = tpu.matmul %140, %142, %cst_173 {dimension_numbers = #tpu.dot_dimension_numbers<[1], [0], [0], [1], [0, 0, 1, 1], [], []>} : vector<80x16xbf16>, vector<16x32xbf16>, vector<80x32xf32> -> vector<80x32xf32>
    %144 = arith.addf %138, %143 : vector<80x32xf32>
    %c21_174 = arith.constant 21 : index
    %c0_175 = arith.constant 0 : index
    %145 = vector.load %arg13[%c21_174, %c0_175] : memref<110x32xf32, #tpu.memory_space<vmem>>, vector<80x32xf32>
    %146 = arith.truncf %145 : vector<80x32xf32> to vector<80x32xbf16>
    %c7_176 = arith.constant 7 : index
    %c0_177 = arith.constant 0 : index
    %c0_178 = arith.constant 0 : index
    %147 = vector.load %arg4[%c7_176, %c0_177, %c0_178] : memref<9x32x32xbf16, #tpu.memory_space<vmem>>, vector<1x32x32xbf16>
    %148 = vector.shape_cast %147 : vector<1x32x32xbf16> to vector<32x32xbf16>
    %cst_179 = arith.constant dense<0.000000e+00> : vector<80x32xf32>
    %149 = tpu.matmul %146, %148, %cst_179 {dimension_numbers = #tpu.dot_dimension_numbers<[1], [0], [0], [1], [0, 0, 1, 1], [], []>} : vector<80x32xbf16>, vector<32x32xbf16>, vector<80x32xf32> -> vector<80x32xf32>
    %150 = arith.addf %144, %149 : vector<80x32xf32>
    %c22 = arith.constant 22 : index
    %c0_180 = arith.constant 0 : index
    %151 = vector.load %arg12[%c22, %c0_180] : memref<110x16xf32, #tpu.memory_space<vmem>>, vector<80x16xf32>
    %152 = arith.truncf %151 : vector<80x16xf32> to vector<80x16xbf16>
    %c8 = arith.constant 8 : index
    %c0_181 = arith.constant 0 : index
    %c0_182 = arith.constant 0 : index
    %153 = vector.load %arg3[%c8, %c0_181, %c0_182] : memref<9x16x32xbf16, #tpu.memory_space<vmem>>, vector<1x16x32xbf16>
    %154 = vector.shape_cast %153 : vector<1x16x32xbf16> to vector<16x32xbf16>
    %cst_183 = arith.constant dense<0.000000e+00> : vector<80x32xf32>
    %155 = tpu.matmul %152, %154, %cst_183 {dimension_numbers = #tpu.dot_dimension_numbers<[1], [0], [0], [1], [0, 0, 1, 1], [], []>} : vector<80x16xbf16>, vector<16x32xbf16>, vector<80x32xf32> -> vector<80x32xf32>
    %156 = arith.addf %150, %155 : vector<80x32xf32>
    %c22_184 = arith.constant 22 : index
    %c0_185 = arith.constant 0 : index
    %157 = vector.load %arg13[%c22_184, %c0_185] : memref<110x32xf32, #tpu.memory_space<vmem>>, vector<80x32xf32>
    %158 = arith.truncf %157 : vector<80x32xf32> to vector<80x32xbf16>
    %c8_186 = arith.constant 8 : index
    %c0_187 = arith.constant 0 : index
    %c0_188 = arith.constant 0 : index
    %159 = vector.load %arg4[%c8_186, %c0_187, %c0_188] : memref<9x32x32xbf16, #tpu.memory_space<vmem>>, vector<1x32x32xbf16>
    %160 = vector.shape_cast %159 : vector<1x32x32xbf16> to vector<32x32xbf16>
    %cst_189 = arith.constant dense<0.000000e+00> : vector<80x32xf32>
    %161 = tpu.matmul %158, %160, %cst_189 {dimension_numbers = #tpu.dot_dimension_numbers<[1], [0], [0], [1], [0, 0, 1, 1], [], []>} : vector<80x32xbf16>, vector<32x32xbf16>, vector<80x32xf32> -> vector<80x32xf32>
    %162 = arith.addf %156, %161 : vector<80x32xf32>
    %cst_190 = arith.constant 0.000000e+00 : f32
    %163 = vector.broadcast %cst_190 : f32 to vector<80x32xf32>
    %164 = arith.maximumf %162, %163 : vector<80x32xf32>
    %cst_191 = arith.constant 0.000000e+00 : f32
    %165 = vector.broadcast %cst_191 : f32 to vector<110x32xf32>
    %c0_192 = arith.constant 0 : index
    %c0_193 = arith.constant 0 : index
    %166 = vector.load %arg14[%c0_192, %c0_193] : memref<110x32xf32, #tpu.memory_space<vmem>>, vector<110x32xf32>
    tpu.vector_store %arg14[%c0_192, %c0_193], %165 {strides = array<i32>} : memref<110x32xf32, #tpu.memory_space<vmem>>, vector<110x32xf32>,
    %c11_194 = arith.constant 11 : index
    %c0_195 = arith.constant 0 : index
    %167 = vector.load %arg14[%c11_194, %c0_195] : memref<110x32xf32, #tpu.memory_space<vmem>>, vector<80x32xf32>
    tpu.vector_store %arg14[%c11_194, %c0_195], %164 {strides = array<i32>} : memref<110x32xf32, #tpu.memory_space<vmem>>, vector<80x32xf32>,
    %cst_196 = arith.constant 0.000000e+00 : f32
    %168 = vector.broadcast %cst_196 : f32 to vector<2x32xf32>
    %c19 = arith.constant 19 : index
    %c0_197 = arith.constant 0 : index
    %169 = vector.load %arg14[%c19, %c0_197] : memref<110x32xf32, #tpu.memory_space<vmem>>, vector<2x32xf32>
    tpu.vector_store %arg14[%c19, %c0_197], %168 {strides = array<i32>} : memref<110x32xf32, #tpu.memory_space<vmem>>, vector<2x32xf32>,
    %cst_198 = arith.constant 0.000000e+00 : f32
    %170 = vector.broadcast %cst_198 : f32 to vector<2x32xf32>
    %c29 = arith.constant 29 : index
    %c0_199 = arith.constant 0 : index
    %171 = vector.load %arg14[%c29, %c0_199] : memref<110x32xf32, #tpu.memory_space<vmem>>, vector<2x32xf32>
    tpu.vector_store %arg14[%c29, %c0_199], %170 {strides = array<i32>} : memref<110x32xf32, #tpu.memory_space<vmem>>, vector<2x32xf32>,
    %cst_200 = arith.constant 0.000000e+00 : f32
    %172 = vector.broadcast %cst_200 : f32 to vector<2x32xf32>
    %c39 = arith.constant 39 : index
    %c0_201 = arith.constant 0 : index
    %173 = vector.load %arg14[%c39, %c0_201] : memref<110x32xf32, #tpu.memory_space<vmem>>, vector<2x32xf32>
    tpu.vector_store %arg14[%c39, %c0_201], %172 {strides = array<i32>} : memref<110x32xf32, #tpu.memory_space<vmem>>, vector<2x32xf32>,
    %cst_202 = arith.constant 0.000000e+00 : f32
    %174 = vector.broadcast %cst_202 : f32 to vector<2x32xf32>
    %c49 = arith.constant 49 : index
    %c0_203 = arith.constant 0 : index
    %175 = vector.load %arg14[%c49, %c0_203] : memref<110x32xf32, #tpu.memory_space<vmem>>, vector<2x32xf32>
    tpu.vector_store %arg14[%c49, %c0_203], %174 {strides = array<i32>} : memref<110x32xf32, #tpu.memory_space<vmem>>, vector<2x32xf32>,
    %cst_204 = arith.constant 0.000000e+00 : f32
    %176 = vector.broadcast %cst_204 : f32 to vector<2x32xf32>
    %c59 = arith.constant 59 : index
    %c0_205 = arith.constant 0 : index
    %177 = vector.load %arg14[%c59, %c0_205] : memref<110x32xf32, #tpu.memory_space<vmem>>, vector<2x32xf32>
    tpu.vector_store %arg14[%c59, %c0_205], %176 {strides = array<i32>} : memref<110x32xf32, #tpu.memory_space<vmem>>, vector<2x32xf32>,
    %cst_206 = arith.constant 0.000000e+00 : f32
    %178 = vector.broadcast %cst_206 : f32 to vector<2x32xf32>
    %c69 = arith.constant 69 : index
    %c0_207 = arith.constant 0 : index
    %179 = vector.load %arg14[%c69, %c0_207] : memref<110x32xf32, #tpu.memory_space<vmem>>, vector<2x32xf32>
    tpu.vector_store %arg14[%c69, %c0_207], %178 {strides = array<i32>} : memref<110x32xf32, #tpu.memory_space<vmem>>, vector<2x32xf32>,
    %cst_208 = arith.constant 0.000000e+00 : f32
    %180 = vector.broadcast %cst_208 : f32 to vector<2x32xf32>
    %c79 = arith.constant 79 : index
    %c0_209 = arith.constant 0 : index
    %181 = vector.load %arg14[%c79, %c0_209] : memref<110x32xf32, #tpu.memory_space<vmem>>, vector<2x32xf32>
    tpu.vector_store %arg14[%c79, %c0_209], %180 {strides = array<i32>} : memref<110x32xf32, #tpu.memory_space<vmem>>, vector<2x32xf32>,
    %cst_210 = arith.constant 0.000000e+00 : f32
    %182 = vector.broadcast %cst_210 : f32 to vector<2x32xf32>
    %c89 = arith.constant 89 : index
    %c0_211 = arith.constant 0 : index
    %183 = vector.load %arg14[%c89, %c0_211] : memref<110x32xf32, #tpu.memory_space<vmem>>, vector<2x32xf32>
    tpu.vector_store %arg14[%c89, %c0_211], %182 {strides = array<i32>} : memref<110x32xf32, #tpu.memory_space<vmem>>, vector<2x32xf32>,
    %c0_212 = arith.constant 0 : index
    %c0_213 = arith.constant 0 : index
    %184 = vector.load %arg7[%c0_212, %c0_213] : memref<1x32xf32, #tpu.memory_space<vmem>>, vector<1x32xf32>
    %185 = vector.shape_cast %184 : vector<1x32xf32> to vector<1x32xf32>
    %186 = vector.broadcast %185 : vector<1x32xf32> to vector<80x32xf32>
    %c0_214 = arith.constant 0 : index
    %c0_215 = arith.constant 0 : index
    %187 = vector.load %arg14[%c0_214, %c0_215] : memref<110x32xf32, #tpu.memory_space<vmem>>, vector<80x32xf32>
    %188 = arith.truncf %187 : vector<80x32xf32> to vector<80x32xbf16>
    %c0_216 = arith.constant 0 : index
    %c0_217 = arith.constant 0 : index
    %c0_218 = arith.constant 0 : index
    %189 = vector.load %arg6[%c0_216, %c0_217, %c0_218] : memref<9x32x32xbf16, #tpu.memory_space<vmem>>, vector<1x32x32xbf16>
    %190 = vector.shape_cast %189 : vector<1x32x32xbf16> to vector<32x32xbf16>
    %cst_219 = arith.constant dense<0.000000e+00> : vector<80x32xf32>
    %191 = tpu.matmul %188, %190, %cst_219 {dimension_numbers = #tpu.dot_dimension_numbers<[1], [0], [0], [1], [0, 0, 1, 1], [], []>} : vector<80x32xbf16>, vector<32x32xbf16>, vector<80x32xf32> -> vector<80x32xf32>
    %192 = arith.addf %186, %191 : vector<80x32xf32>
    %c1_220 = arith.constant 1 : index
    %c0_221 = arith.constant 0 : index
    %193 = vector.load %arg14[%c1_220, %c0_221] : memref<110x32xf32, #tpu.memory_space<vmem>>, vector<80x32xf32>
    %194 = arith.truncf %193 : vector<80x32xf32> to vector<80x32xbf16>
    %c1_222 = arith.constant 1 : index
    %c0_223 = arith.constant 0 : index
    %c0_224 = arith.constant 0 : index
    %195 = vector.load %arg6[%c1_222, %c0_223, %c0_224] : memref<9x32x32xbf16, #tpu.memory_space<vmem>>, vector<1x32x32xbf16>
    %196 = vector.shape_cast %195 : vector<1x32x32xbf16> to vector<32x32xbf16>
    %cst_225 = arith.constant dense<0.000000e+00> : vector<80x32xf32>
    %197 = tpu.matmul %194, %196, %cst_225 {dimension_numbers = #tpu.dot_dimension_numbers<[1], [0], [0], [1], [0, 0, 1, 1], [], []>} : vector<80x32xbf16>, vector<32x32xbf16>, vector<80x32xf32> -> vector<80x32xf32>
    %198 = arith.addf %192, %197 : vector<80x32xf32>
    %c2_226 = arith.constant 2 : index
    %c0_227 = arith.constant 0 : index
    %199 = vector.load %arg14[%c2_226, %c0_227] : memref<110x32xf32, #tpu.memory_space<vmem>>, vector<80x32xf32>
    %200 = arith.truncf %199 : vector<80x32xf32> to vector<80x32xbf16>
    %c2_228 = arith.constant 2 : index
    %c0_229 = arith.constant 0 : index
    %c0_230 = arith.constant 0 : index
    %201 = vector.load %arg6[%c2_228, %c0_229, %c0_230] : memref<9x32x32xbf16, #tpu.memory_space<vmem>>, vector<1x32x32xbf16>
    %202 = vector.shape_cast %201 : vector<1x32x32xbf16> to vector<32x32xbf16>
    %cst_231 = arith.constant dense<0.000000e+00> : vector<80x32xf32>
    %203 = tpu.matmul %200, %202, %cst_231 {dimension_numbers = #tpu.dot_dimension_numbers<[1], [0], [0], [1], [0, 0, 1, 1], [], []>} : vector<80x32xbf16>, vector<32x32xbf16>, vector<80x32xf32> -> vector<80x32xf32>
    %204 = arith.addf %198, %203 : vector<80x32xf32>
    %c10_232 = arith.constant 10 : index
    %c0_233 = arith.constant 0 : index
    %205 = vector.load %arg14[%c10_232, %c0_233] : memref<110x32xf32, #tpu.memory_space<vmem>>, vector<80x32xf32>
    %206 = arith.truncf %205 : vector<80x32xf32> to vector<80x32xbf16>
    %c3_234 = arith.constant 3 : index
    %c0_235 = arith.constant 0 : index
    %c0_236 = arith.constant 0 : index
    %207 = vector.load %arg6[%c3_234, %c0_235, %c0_236] : memref<9x32x32xbf16, #tpu.memory_space<vmem>>, vector<1x32x32xbf16>
    %208 = vector.shape_cast %207 : vector<1x32x32xbf16> to vector<32x32xbf16>
    %cst_237 = arith.constant dense<0.000000e+00> : vector<80x32xf32>
    %209 = tpu.matmul %206, %208, %cst_237 {dimension_numbers = #tpu.dot_dimension_numbers<[1], [0], [0], [1], [0, 0, 1, 1], [], []>} : vector<80x32xbf16>, vector<32x32xbf16>, vector<80x32xf32> -> vector<80x32xf32>
    %210 = arith.addf %204, %209 : vector<80x32xf32>
    %c11_238 = arith.constant 11 : index
    %c0_239 = arith.constant 0 : index
    %211 = vector.load %arg14[%c11_238, %c0_239] : memref<110x32xf32, #tpu.memory_space<vmem>>, vector<80x32xf32>
    %212 = arith.truncf %211 : vector<80x32xf32> to vector<80x32xbf16>
    %c4_240 = arith.constant 4 : index
    %c0_241 = arith.constant 0 : index
    %c0_242 = arith.constant 0 : index
    %213 = vector.load %arg6[%c4_240, %c0_241, %c0_242] : memref<9x32x32xbf16, #tpu.memory_space<vmem>>, vector<1x32x32xbf16>
    %214 = vector.shape_cast %213 : vector<1x32x32xbf16> to vector<32x32xbf16>
    %cst_243 = arith.constant dense<0.000000e+00> : vector<80x32xf32>
    %215 = tpu.matmul %212, %214, %cst_243 {dimension_numbers = #tpu.dot_dimension_numbers<[1], [0], [0], [1], [0, 0, 1, 1], [], []>} : vector<80x32xbf16>, vector<32x32xbf16>, vector<80x32xf32> -> vector<80x32xf32>
    %216 = arith.addf %210, %215 : vector<80x32xf32>
    %c12_244 = arith.constant 12 : index
    %c0_245 = arith.constant 0 : index
    %217 = vector.load %arg14[%c12_244, %c0_245] : memref<110x32xf32, #tpu.memory_space<vmem>>, vector<80x32xf32>
    %218 = arith.truncf %217 : vector<80x32xf32> to vector<80x32xbf16>
    %c5_246 = arith.constant 5 : index
    %c0_247 = arith.constant 0 : index
    %c0_248 = arith.constant 0 : index
    %219 = vector.load %arg6[%c5_246, %c0_247, %c0_248] : memref<9x32x32xbf16, #tpu.memory_space<vmem>>, vector<1x32x32xbf16>
    %220 = vector.shape_cast %219 : vector<1x32x32xbf16> to vector<32x32xbf16>
    %cst_249 = arith.constant dense<0.000000e+00> : vector<80x32xf32>
    %221 = tpu.matmul %218, %220, %cst_249 {dimension_numbers = #tpu.dot_dimension_numbers<[1], [0], [0], [1], [0, 0, 1, 1], [], []>} : vector<80x32xbf16>, vector<32x32xbf16>, vector<80x32xf32> -> vector<80x32xf32>
    %222 = arith.addf %216, %221 : vector<80x32xf32>
    %c20_250 = arith.constant 20 : index
    %c0_251 = arith.constant 0 : index
    %223 = vector.load %arg14[%c20_250, %c0_251] : memref<110x32xf32, #tpu.memory_space<vmem>>, vector<80x32xf32>
    %224 = arith.truncf %223 : vector<80x32xf32> to vector<80x32xbf16>
    %c6_252 = arith.constant 6 : index
    %c0_253 = arith.constant 0 : index
    %c0_254 = arith.constant 0 : index
    %225 = vector.load %arg6[%c6_252, %c0_253, %c0_254] : memref<9x32x32xbf16, #tpu.memory_space<vmem>>, vector<1x32x32xbf16>
    %226 = vector.shape_cast %225 : vector<1x32x32xbf16> to vector<32x32xbf16>
    %cst_255 = arith.constant dense<0.000000e+00> : vector<80x32xf32>
    %227 = tpu.matmul %224, %226, %cst_255 {dimension_numbers = #tpu.dot_dimension_numbers<[1], [0], [0], [1], [0, 0, 1, 1], [], []>} : vector<80x32xbf16>, vector<32x32xbf16>, vector<80x32xf32> -> vector<80x32xf32>
    %228 = arith.addf %222, %227 : vector<80x32xf32>
    %c21_256 = arith.constant 21 : index
    %c0_257 = arith.constant 0 : index
    %229 = vector.load %arg14[%c21_256, %c0_257] : memref<110x32xf32, #tpu.memory_space<vmem>>, vector<80x32xf32>
    %230 = arith.truncf %229 : vector<80x32xf32> to vector<80x32xbf16>
    %c7_258 = arith.constant 7 : index
    %c0_259 = arith.constant 0 : index
    %c0_260 = arith.constant 0 : index
    %231 = vector.load %arg6[%c7_258, %c0_259, %c0_260] : memref<9x32x32xbf16, #tpu.memory_space<vmem>>, vector<1x32x32xbf16>
    %232 = vector.shape_cast %231 : vector<1x32x32xbf16> to vector<32x32xbf16>
    %cst_261 = arith.constant dense<0.000000e+00> : vector<80x32xf32>
    %233 = tpu.matmul %230, %232, %cst_261 {dimension_numbers = #tpu.dot_dimension_numbers<[1], [0], [0], [1], [0, 0, 1, 1], [], []>} : vector<80x32xbf16>, vector<32x32xbf16>, vector<80x32xf32> -> vector<80x32xf32>
    %234 = arith.addf %228, %233 : vector<80x32xf32>
    %c22_262 = arith.constant 22 : index
    %c0_263 = arith.constant 0 : index
    %235 = vector.load %arg14[%c22_262, %c0_263] : memref<110x32xf32, #tpu.memory_space<vmem>>, vector<80x32xf32>
    %236 = arith.truncf %235 : vector<80x32xf32> to vector<80x32xbf16>
    %c8_264 = arith.constant 8 : index
    %c0_265 = arith.constant 0 : index
    %c0_266 = arith.constant 0 : index
    %237 = vector.load %arg6[%c8_264, %c0_265, %c0_266] : memref<9x32x32xbf16, #tpu.memory_space<vmem>>, vector<1x32x32xbf16>
    %238 = vector.shape_cast %237 : vector<1x32x32xbf16> to vector<32x32xbf16>
    %cst_267 = arith.constant dense<0.000000e+00> : vector<80x32xf32>
    %239 = tpu.matmul %236, %238, %cst_267 {dimension_numbers = #tpu.dot_dimension_numbers<[1], [0], [0], [1], [0, 0, 1, 1], [], []>} : vector<80x32xbf16>, vector<32x32xbf16>, vector<80x32xf32> -> vector<80x32xf32>
    %240 = arith.addf %234, %239 : vector<80x32xf32>
    %cst_268 = arith.constant 0.000000e+00 : f32
    %241 = vector.broadcast %cst_268 : f32 to vector<80x32xf32>
    %242 = arith.maximumf %240, %241 : vector<80x32xf32>
    %243 = arith.truncf %242 : vector<80x32xf32> to vector<80x32xbf16>
    %c0_269 = arith.constant 0 : index
    %c0_270 = arith.constant 0 : index
    %244 = vector.load %arg8[%c0_269, %c0_270] : memref<32x32xbf16, #tpu.memory_space<vmem>>, vector<32x32xbf16>
    %cst_271 = arith.constant dense<0.000000e+00> : vector<80x32xf32>
    %245 = tpu.matmul %243, %244, %cst_271 {dimension_numbers = #tpu.dot_dimension_numbers<[1], [0], [0], [1], [0, 0, 1, 1], [], []>} : vector<80x32xbf16>, vector<32x32xbf16>, vector<80x32xf32> -> vector<80x32xf32>
    %c0_272 = arith.constant 0 : index
    %c0_273 = arith.constant 0 : index
    %246 = vector.load %arg9[%c0_272, %c0_273] : memref<1x32xf32, #tpu.memory_space<vmem>>, vector<1x32xf32>
    %247 = vector.shape_cast %246 : vector<1x32xf32> to vector<1x32xf32>
    %248 = vector.broadcast %247 : vector<1x32xf32> to vector<80x32xf32>
    %249 = arith.addf %245, %248 : vector<80x32xf32>
    %c0_274 = arith.constant 0 : index
    %c0_275 = arith.constant 0 : index
    %c0_276 = arith.constant 0 : index
    %250 = vector.load %arg10[%c0_274, %c0_275, %c0_276] : memref<1x80x32xf32, #tpu.memory_space<vmem>>, vector<1x80x32xf32>
    %251 = vector.shape_cast %250 : vector<1x80x32xf32> to vector<80x32xf32>
    %252 = vector.shape_cast %242 : vector<80x32xf32> to vector<1x80x32xf32>
    tpu.vector_store %arg10[%c0_274, %c0_275, %c0_276], %252 {strides = array<i32>} : memref<1x80x32xf32, #tpu.memory_space<vmem>>, vector<1x80x32xf32>,
    %c0_277 = arith.constant 0 : index
    %c0_278 = arith.constant 0 : index
    %c0_279 = arith.constant 0 : index
    %253 = vector.load %arg11[%c0_277, %c0_278, %c0_279] : memref<1x80x32xf32, #tpu.memory_space<vmem>>, vector<1x80x32xf32>
    %254 = vector.shape_cast %253 : vector<1x80x32xf32> to vector<80x32xf32>
    %255 = vector.shape_cast %249 : vector<80x32xf32> to vector<1x80x32xf32>
    tpu.vector_store %arg11[%c0_277, %c0_278, %c0_279], %255 {strides = array<i32>} : memref<1x80x32xf32, #tpu.memory_space<vmem>>, vector<1x80x32xf32>,
    return
  }
  func.func @transform_0(%arg0: i32) -> (i32, i32, i32, i32) {
    %c0_i32 = arith.constant 0 : i32
    %c0_i32_0 = arith.constant 0 : i32
    %c0_i32_1 = arith.constant 0 : i32
    %c0_i32_2 = arith.constant 0 : i32
    return %arg0, %c0_i32, %c0_i32_0, %c0_i32_1 : i32, i32, i32, i32
  }
  func.func @transform_1(%arg0: i32) -> (i32, i32, i32, i32) {
    %c0_i32 = arith.constant 0 : i32
    %c0_i32_0 = arith.constant 0 : i32
    %c0_i32_1 = arith.constant 0 : i32
    %c0_i32_2 = arith.constant 0 : i32
    return %arg0, %c0_i32, %c0_i32_0, %c0_i32_1 : i32, i32, i32, i32
  }
  func.func @transform_2(%arg0: i32) -> (i32, i32, i32) {
    %c0_i32 = arith.constant 0 : i32
    %c0_i32_0 = arith.constant 0 : i32
    %c0_i32_1 = arith.constant 0 : i32
    %c0_i32_2 = arith.constant 0 : i32
    return %c0_i32, %c0_i32_0, %c0_i32_1 : i32, i32, i32
  }
  func.func @transform_3(%arg0: i32) -> (i32, i32, i32) {
    %c0_i32 = arith.constant 0 : i32
    %c0_i32_0 = arith.constant 0 : i32
    %c0_i32_1 = arith.constant 0 : i32
    %c0_i32_2 = arith.constant 0 : i32
    return %c0_i32, %c0_i32_0, %c0_i32_1 : i32, i32, i32
  }
  func.func @transform_4(%arg0: i32) -> (i32, i32) {
    %c0_i32 = arith.constant 0 : i32
    %c0_i32_0 = arith.constant 0 : i32
    %c0_i32_1 = arith.constant 0 : i32
    return %c0_i32, %c0_i32_0 : i32, i32
  }
  func.func @transform_5(%arg0: i32) -> (i32, i32, i32) {
    %c0_i32 = arith.constant 0 : i32
    %c0_i32_0 = arith.constant 0 : i32
    %c0_i32_1 = arith.constant 0 : i32
    %c0_i32_2 = arith.constant 0 : i32
    return %c0_i32, %c0_i32_0, %c0_i32_1 : i32, i32, i32
  }
  func.func @transform_6(%arg0: i32) -> (i32, i32) {
    %c0_i32 = arith.constant 0 : i32
    %c0_i32_0 = arith.constant 0 : i32
    %c0_i32_1 = arith.constant 0 : i32
    return %c0_i32, %c0_i32_0 : i32, i32
  }
  func.func @transform_7(%arg0: i32) -> (i32, i32) {
    %c0_i32 = arith.constant 0 : i32
    %c0_i32_0 = arith.constant 0 : i32
    %c0_i32_1 = arith.constant 0 : i32
    return %c0_i32, %c0_i32_0 : i32, i32
  }
  func.func @transform_8(%arg0: i32) -> (i32, i32) {
    %c0_i32 = arith.constant 0 : i32
    %c0_i32_0 = arith.constant 0 : i32
    %c0_i32_1 = arith.constant 0 : i32
    return %c0_i32, %c0_i32_0 : i32, i32
  }
  func.func @transform_9(%arg0: i32) -> (i32, i32, i32) {
    %c0_i32 = arith.constant 0 : i32
    %c0_i32_0 = arith.constant 0 : i32
    %c0_i32_1 = arith.constant 0 : i32
    return %arg0, %c0_i32, %c0_i32_0 : i32, i32, i32
  }
  func.func @transform_10(%arg0: i32) -> (i32, i32, i32) {
    %c0_i32 = arith.constant 0 : i32
    %c0_i32_0 = arith.constant 0 : i32
    %c0_i32_1 = arith.constant 0 : i32
    return %arg0, %c0_i32, %c0_i32_0 : i32, i32, i32
  }
}

</mosaic_0001>

<bundles_post_ra>
// kernel: frru_forward.1
= control target key start
LH: loop header
LB: loop body
LE: loop exit
PB: predicated region body
PF: predicated region fallthrough
CT: control target
= control target key end

     0   :  { %s3670_s13 = smov 0   ;;  %s4466_s0 = inlined_call_operand.vmem [shape: f32[2,8,8,16], index: 0, kind: input, shape index: {}]   ;;  %s4467_s1 = inlined_call_operand.vmem [shape: f32[2,8,8,32], index: 1, kind: input, shape index: {}]   ;;  %s4468_s2 = inlined_call_operand.vmem [shape: bf16[9,16,32], index: 2, kind: input, shape index: {}]   ;;  %s4469_s3 = inlined_call_operand.vmem [shape: bf16[9,32,32], index: 3, kind: input, shape index: {}]   ;;  %s4470_s4 = inlined_call_operand.vmem [shape: f32[1,32], index: 4, kind: input, shape index: {}]   ;;  %s4471_s5 = inlined_call_operand.vmem [shape: bf16[9,32,32], index: 5, kind: input, shape index: {}]   ;;  %s4472_s6 = inlined_call_operand.vmem [shape: f32[1,32], index: 6, kind: input, shape index: {}]   ;;  %s4473_s7 = inlined_call_operand.vmem [shape: bf16[32,32], index: 7, kind: input, shape index: {}]   ;;  %s4474_s8 = inlined_call_operand.vmem [shape: f32[1,32], index: 8, kind: input, shape index: {}]   ;;  %s4475_s9 = inlined_call_operand.vmem [shape: f32[2,80,32], index: 9, kind: output, shape index: {0}]   ;;  %s4476_s10 = inlined_call_operand.vmem [shape: f32[2,80,32], index: 10, kind: output, shape index: {1}]  }
   0x1 LB: > { %s3109_s14 = sadd.s32 4294967295, %s3612_s13   ;;  %p3113_p0 = scmp.ge.s32.totalorder %s3612_s13, 1  ;;  %s3612_s13 = sphi %s3670_s13, %s21_s13  }
   0x2   : > { %p325_p1 = scmp.lt.s32.totalorder %s3612_s13, 3 }
   0x4   : > { %p326_p2 = pnand %p3113_p0, %p325_p1 }
   0x5   : > { %p373_p3 = scmp.lt.s32.totalorder (!%p326_p2), %s3109_s14, 1 }
   0x6   : > { %329 = sbr.rel (%p326_p2) target bundleno = 1022 (0x3fe), region = 56 }
   0xb   : > { %v3548_v0 = vld [vmem:[%s4469_s3 + $0x8] sm:$0xff]  ;;  %v3551_v1 = vld [vmem:[%s4469_s3 + $0x18] sm:$0xff]  ;;  %v3546_v2 = vld [vmem:[%s4468_s2] sm:$0xff]  ;;  %vm394_vm0 = vcmask 130048   ;;  %s4478_s14 = smov (!%p373_p3, %s3109_s14), 1  ;;  %v3614_v6 = vmov 0.0  }
   0xc   : > { %v3549_v3 = vld [vmem:[%s4468_s2 + $0x8] sm:$0xff]  ;;  %v3547_v4 = vld [vmem:[%s4469_s3] sm:$0xff]  ;;  %610 = vmatpush.bf16.msra.mxu1 %v3548_v0  ;;  %784 = vmatpush.bf16.msra.mxu3 %v3551_v1  ;;  %v3550_v5 = vld [vmem:[%s4469_s3 + $0x10] sm:$0xff]  ;;  %395 = vst.msk [vmem:[#allocation2] sm:$0xff] %vm394_vm0, %v3614_v6  ;;  %s3544_s29 = sshll.u32 %s4478_s14, 6  ;;  %vm410_vm1 = vcmask 261120  }
   0xd   : > { %v3554_v7 = vld [vmem:[%s4469_s3 + $0x28] sm:$0xff]  ;;  %521 = vmatpush.bf16.msra.mxu0 %v3546_v2  ;;  %694 = vmatpush.bf16.msra.mxu2 %v3549_v3  ;;  %396 = vst.msk [vmem:[#allocation2 + $0x8] sm:$0xff] %vm394_vm0, %v3614_v6  ;;  %s3711_s12 = scalar_lea.vmem %s4466_s0, %s3544_s29  ;;  %v3552_v11 = vld [vmem:[%s4468_s2 + $0x10] sm:$0xff]  ;;  %s3739_s19 = scalar_lea.vmem %s4467_s1, %s3544_s29  ;;  %v3553_v24 = vld [vmem:[%s4469_s3 + $0x20] sm:$0xff]  ;;  %vm2074_vm2 = vcmask 254976  }
   0xe   : > { %397 = vst.msk [vmem:[#allocation2 + $0x10] sm:$0xff] %vm394_vm0, %v3614_v6  ;;  %v426_v8 = vld [vmem:[%s3711_s12] sm:$0xff]  ;;  %v3120_v23 = vld [vmem:[%s3711_s12 + $0x8] sm:$0xff]  ;;  %v3122_v25 = vld [vmem:[%s3711_s12 + $0x10] sm:$0xff]  ;;  %s3593_s30 = smul.u32 80, %s4478_s14 }
   0xf   : > { %427 = vst.msk [vmem:[#allocation2 + $0xb] sm:$0xff] %vm394_vm0, %v426_v8  ;;  %v428_v16 = vld [vmem:[%s3739_s19] sm:$0xff]  ;;  %v3121_v26 = vld [vmem:[%s3739_s19 + $0x8] sm:$0xff]  ;;  %v3123_v27 = vld [vmem:[%s3739_s19 + $0x10] sm:$0xff] }
  0x10   : > { %611 = vmatpush.bf16.msra.mxu1 %v3547_v4  ;;  %785 = vmatpush.bf16.msra.mxu3 %v3550_v5  ;;  %398 = vst.msk [vmem:[#allocation2 + $0x18] sm:$0xff] %vm394_vm0, %v3614_v6  ;;  %v3124_v28 = vld [vmem:[%s3711_s12 + $0x18] sm:$0xff]  ;;  %v3126_v30 = vld [vmem:[%s3711_s12 + $0x20] sm:$0xff]  ;;  %v3128_v31 = vld [vmem:[%s3711_s12 + $0x28] sm:$0xff]  ;;  %s4413_s16 = scalar_lea.vmem %s4475_s9, %s3593_s30  ;;  %s392_s20 = scalar_lea.vmem %s4476_s10, %s3593_s30 }
  0x11   : > { %958 = vmatpush.bf16.msrb.mxu2 %v3554_v7  ;;  %399 = vst.msk [vmem:[#allocation2 + $0x20] sm:$0xff] %vm394_vm0, %v3614_v6  ;;  %868 = vmatpush.bf16.msrb.mxu0 %v3552_v11  ;;  %v3125_v29 = vld [vmem:[%s3739_s19 + $0x18] sm:$0xff]  ;;  %v3127_v32 = vld [vmem:[%s3739_s19 + $0x20] sm:$0xff]  ;;  %v3129_v33 = vld [vmem:[%s3739_s19 + $0x28] sm:$0xff] }
  0x12   : > { %400 = vst.msk [vmem:[#allocation2 + $0x28] sm:$0xff] %vm394_vm0, %v3614_v6  ;;  %v3130_v46 = vld [vmem:[%s3711_s12 + $0x30] sm:$0xff]  ;;  %v3557_v60 = vld [vmem:[%s4469_s3 + $0x38] sm:$0xff] }
  0x13   : > { %401 = vst.msk [vmem:[#allocation2 + $0x30] sm:$0xff] %vm394_vm0, %v3614_v6  ;;  %v476_v9 = vld [vmem:[#allocation2] sm:$0xff]  ;;  %v3131_v47 = vld [vmem:[%s3739_s19 + $0x30] sm:$0xff]  ;;  %v3555_v11 = vld [vmem:[%s4468_s2 + $0x18] sm:$0xff] }
  0x14   : > { %402 = vst.msk [vmem:[#allocation2 + $0x38] sm:$0xff] %vm394_vm0, %v3614_v6  ;;  %v648_v10 = vld [vmem:[#allocation2 + $0x1] sm:$0xff]  ;;  %1132 = vmatpush.bf16.msrb.mxu3 %v3557_v60  ;;  %1042 = vmatpush.bf16.msrb.mxu1 %v3555_v11 }
  0x15   : > { %403 = vst.msk [vmem:[#allocation2 + $0x40] sm:$0xff] %vm394_vm0, %v3614_v6  ;;  %959 = vmatpush.bf16.msrb.mxu2 %v3553_v24  ;;  %v3561_v11 = vld [vmem:[%s4468_s2 + $0x28] sm:$0xff] }
  0x16   : > { %v477_v12 = vld [vmem:[#allocation2 + $0x8] sm:$0xff]  ;;  %404 = vst.msk [vmem:[#allocation2 + $0x48] sm:$0xff] %vm394_vm0, %v3614_v6 }
  0x17   : > { %v649_v13 = vld [vmem:[#allocation2 + $0x9] sm:$0xff]  ;;  %v486_v14 = vpack.c.bf16 %v477_v12, %v476_v9  ;;  %405 = vst.msk [vmem:[#allocation2 + $0x50] sm:$0xff] %vm394_vm0, %v3614_v6 }
  0x18   : > { %v658_v15 = vpack.c.bf16 %v649_v13, %v648_v10  ;;  %406 = vst.msk [vmem:[#allocation2 + $0x58] sm:$0xff] %vm394_vm0, %v3614_v6  ;;  %v3556_v10 = vld [vmem:[%s4469_s3 + $0x30] sm:$0xff]  ;;  %v3560_v12 = vld [vmem:[%s4469_s3 + $0x48] sm:$0xff]  ;;  %v3558_v13 = vld [vmem:[%s4468_s2 + $0x20] sm:$0xff] }
  0x19   : > { %3138 = vmatmul.msk.bf16.vlgmr.msra.gmra.mxu0 %vm394_vm0, %v486_v14  ;;  %407 = vst.msk [vmem:[#allocation2 + $0x60] sm:$0xff] %vm394_vm0, %v3614_v6  ;;  %1133 = vmatpush.bf16.msrb.mxu3 %v3556_v10  ;;  %v3562_v10 = vld [vmem:[%s4469_s3 + $0x50] sm:$0xff] }
  0x1a   : > { %3162 = vmatmul.msk.bf16.vlgmr.msra.gmra.mxu2 %vm394_vm0, %v658_v15  ;;  %411 = vst.msk [vmem:[#allocation3] sm:$0xff] %vm410_vm1, %v3614_v6  ;;  %1216 = vmatpush.bf16.msra.mxu0 %v3558_v13 }
  0x1b   : > { %412 = vst.msk [vmem:[#allocation3 + $0x8] sm:$0xff] %vm410_vm1, %v3614_v6  ;;  %1306 = vmatpush.bf16.msra.mxu2 %v3560_v12  ;;  %v3566_v12 = vld [vmem:[%s4469_s3 + $0x68] sm:$0xff] }
  0x1c   : > { %413 = vst.msk [vmem:[#allocation3 + $0x10] sm:$0xff] %vm410_vm1, %v3614_v6 }
  0x1d   : > { %429 = vst.msk [vmem:[#allocation3 + $0xb] sm:$0xff] %vm410_vm1, %v428_v16 }
  0x1e   : > { %414 = vst.msk [vmem:[#allocation3 + $0x18] sm:$0xff] %vm410_vm1, %v3614_v6 }
  0x1f   : > { %415 = vst.msk [vmem:[#allocation3 + $0x20] sm:$0xff] %vm410_vm1, %v3614_v6 }
  0x20   : > { %416 = vst.msk [vmem:[#allocation3 + $0x28] sm:$0xff] %vm410_vm1, %v3614_v6 }
  0x21   : > { %417 = vst.msk [vmem:[#allocation3 + $0x30] sm:$0xff] %vm410_vm1, %v3614_v6  ;;  %v558_v17 = vld [vmem:[#allocation3] sm:$0xff] }
  0x22   : > { %418 = vst.msk [vmem:[#allocation3 + $0x38] sm:$0xff] %vm410_vm1, %v3614_v6  ;;  %v731_v18 = vld [vmem:[#allocation3 + $0x1] sm:$0xff] }
  0x23   : > { %419 = vst.msk [vmem:[#allocation3 + $0x40] sm:$0xff] %vm410_vm1, %v3614_v6 }
  0x24   : > { %v559_v19 = vld [vmem:[#allocation3 + $0x8] sm:$0xff]  ;;  %420 = vst.msk [vmem:[#allocation3 + $0x48] sm:$0xff] %vm410_vm1, %v3614_v6 }
  0x25   : > { %v732_v20 = vld [vmem:[#allocation3 + $0x9] sm:$0xff]  ;;  %v568_v21 = vpack.c.bf16 %v559_v19, %v558_v17  ;;  %421 = vst.msk [vmem:[#allocation3 + $0x50] sm:$0xff] %vm410_vm1, %v3614_v6 }
  0x26   : > { %v741_v22 = vpack.c.bf16 %v732_v20, %v731_v18  ;;  %422 = vst.msk [vmem:[#allocation3 + $0x58] sm:$0xff] %vm410_vm1, %v3614_v6 }
  0x27   : > { %3151 = vmatmul.msk.bf16.vlgmr.msra.gmra.mxu1 %vm410_vm1, %v568_v21  ;;  %423 = vst.msk [vmem:[#allocation3 + $0x60] sm:$0xff] %vm410_vm1, %v3614_v6 }
  0x28   : > { %3179 = vmatmul.msk.bf16.vlgmr.msra.gmra.mxu3 %vm410_vm1, %v741_v22  ;;  %2050 = vst.msk [vmem:[#allocation4] sm:$0xff] %vm410_vm1, %v3614_v6  ;;  %1390 = vmatpush.bf16.msra.mxu1 %v3561_v11 }
  0x29   : > { %2051 = vst.msk [vmem:[#allocation4 + $0x8] sm:$0xff] %vm410_vm1, %v3614_v6 }
  0x2a   : > { %2052 = vst.msk [vmem:[#allocation4 + $0x10] sm:$0xff] %vm410_vm1, %v3614_v6 }
  0x2b   : > { %2053 = vst.msk [vmem:[#allocation4 + $0x18] sm:$0xff] %vm410_vm1, %v3614_v6 }
  0x2c   : > { %2054 = vst.msk [vmem:[#allocation4 + $0x20] sm:$0xff] %vm410_vm1, %v3614_v6 }
  0x2d   : > { %2055 = vst.msk [vmem:[#allocation4 + $0x28] sm:$0xff] %vm410_vm1, %v3614_v6 }
  0x2e   : > { %2056 = vst.msk [vmem:[#allocation4 + $0x30] sm:$0xff] %vm410_vm1, %v3614_v6 }
  0x2f   : > { %2057 = vst.msk [vmem:[#allocation4 + $0x38] sm:$0xff] %vm410_vm1, %v3614_v6 }
  0x30   : > { %2058 = vst.msk [vmem:[#allocation4 + $0x40] sm:$0xff] %vm410_vm1, %v3614_v6 }
  0x31   : > { %2059 = vst.msk [vmem:[#allocation4 + $0x48] sm:$0xff] %vm410_vm1, %v3614_v6 }
  0x32   : > { %2060 = vst.msk [vmem:[#allocation4 + $0x50] sm:$0xff] %vm410_vm1, %v3614_v6 }
  0x33   : > { %2061 = vst.msk [vmem:[#allocation4 + $0x58] sm:$0xff] %vm410_vm1, %v3614_v6 }
  0x34   : > { %2062 = vst.msk [vmem:[#allocation4 + $0x60] sm:$0xff] %vm410_vm1, %v3614_v6 }
  0x35   : > { %432 = vst.msk [vmem:[#allocation2 + $0x15] sm:$0xff] %vm394_vm0, %v3120_v23 }
  0x36   : > { %438 = vst.msk [vmem:[#allocation2 + $0x1f] sm:$0xff] %vm394_vm0, %v3122_v25 }
  0x37   : > { %435 = vst.msk [vmem:[#allocation3 + $0x15] sm:$0xff] %vm410_vm1, %v3121_v26  ;;  %v822_v26 = vld [vmem:[#allocation2 + $0x2] sm:$0xff] }
  0x38   : > { %441 = vst.msk [vmem:[#allocation3 + $0x1f] sm:$0xff] %vm410_vm1, %v3123_v27  ;;  %v823_v27 = vld [vmem:[#allocation2 + $0xa] sm:$0xff] }
  0x39   : > { %444 = vst.msk [vmem:[#allocation2 + $0x29] sm:$0xff] %vm394_vm0, %v3124_v28  ;;  %v905_v28 = vld [vmem:[#allocation3 + $0x2] sm:$0xff] }
  0x3a   : > { %447 = vst.msk [vmem:[#allocation3 + $0x29] sm:$0xff] %vm410_vm1, %v3125_v29  ;;  %v906_v29 = vld [vmem:[#allocation3 + $0xa] sm:$0xff] }
  0x3b   : > { %450 = vst.msk [vmem:[#allocation2 + $0x33] sm:$0xff] %vm394_vm0, %v3126_v30 }
  0x3c   : > { %v478_v34 = vld [vmem:[#allocation2 + $0x10] sm:$0xff]  ;;  %456 = vst.msk [vmem:[#allocation2 + $0x3d] sm:$0xff] %vm394_vm0, %v3128_v31 }
  0x3d   : > { %v650_v35 = vld [vmem:[#allocation2 + $0x11] sm:$0xff]  ;;  %v651_v37 = vld [vmem:[#allocation2 + $0x19] sm:$0xff]  ;;  %453 = vst.msk [vmem:[#allocation3 + $0x33] sm:$0xff] %vm410_vm1, %v3127_v32  ;;  %v652_v50 = vld [vmem:[#allocation2 + $0x21] sm:$0xff]  ;;  %v832_v32 = vpack.c.bf16 %v823_v27, %v822_v26 }
  0x3e   : > { %v479_v36 = vld [vmem:[#allocation2 + $0x18] sm:$0xff]  ;;  %v659_v39 = vpack.c.bf16 %v651_v37, %v650_v35  ;;  %v560_v40 = vld [vmem:[#allocation3 + $0x10] sm:$0xff]  ;;  %459 = vst.msk [vmem:[#allocation3 + $0x3d] sm:$0xff] %vm410_vm1, %v3129_v33  ;;  %v915_v33 = vpack.c.bf16 %v906_v29, %v905_v28 }
  0x3f   : > { %v487_v38 = vpack.c.bf16 %v479_v36, %v478_v34  ;;  %v733_v41 = vld [vmem:[#allocation3 + $0x11] sm:$0xff]  ;;  %v734_v43 = vld [vmem:[#allocation3 + $0x19] sm:$0xff]  ;;  %462 = vst.msk [vmem:[#allocation2 + $0x47] sm:$0xff] %vm394_vm0, %v3130_v46  ;;  %v735_v54 = vld [vmem:[#allocation3 + $0x21] sm:$0xff] }
  0x40   : > { %v561_v42 = vld [vmem:[#allocation3 + $0x18] sm:$0xff]  ;;  %3163 = vmatmul.msk.bf16.gmra.mxu2 %vm394_vm0, %v659_v39  ;;  %v742_v45 = vpack.c.bf16 %v734_v43, %v733_v41  ;;  %v480_v48 = vld [vmem:[#allocation2 + $0x20] sm:$0xff]  ;;  %465 = vst.msk [vmem:[#allocation3 + $0x47] sm:$0xff] %vm410_vm1, %v3131_v47  ;;  %v562_v52 = vld [vmem:[#allocation3 + $0x20] sm:$0xff] }
  0x41   : > { %3139 = vmatmul.msk.bf16.gmra.mxu0 %vm394_vm0, %v487_v38  ;;  %v569_v44 = vpack.c.bf16 %v561_v42, %v560_v40  ;;  %v481_v49 = vld [vmem:[#allocation2 + $0x28] sm:$0xff]  ;;  %v563_v53 = vld [vmem:[#allocation3 + $0x28] sm:$0xff]  ;;  %v3559_v36 = vld [vmem:[%s4469_s3 + $0x40] sm:$0xff] }
  0x42   : > { %3180 = vmatmul.msk.bf16.gmra.mxu3 %vm410_vm1, %v742_v45  ;;  %v653_v51 = vld [vmem:[#allocation2 + $0x29] sm:$0xff]  ;;  %v736_v55 = vld [vmem:[#allocation3 + $0x29] sm:$0xff]  ;;  %v488_v56 = vpack.c.bf16 %v481_v49, %v480_v48  ;;  %v570_v58 = vpack.c.bf16 %v563_v53, %v562_v52  ;;  %v654_v63 = vld [vmem:[#allocation2 + $0x31] sm:$0xff]  ;;  %1307 = vmatpush.bf16.msra.mxu2 %v3559_v36 }
  0x43   : > { %3152 = vmatmul.msk.bf16.gmra.mxu1 %vm410_vm1, %v569_v44  ;;  %v660_v57 = vpack.c.bf16 %v653_v51, %v652_v50  ;;  %v743_v59 = vpack.c.bf16 %v736_v55, %v735_v54  ;;  %v482_v61 = vld [vmem:[#allocation2 + $0x30] sm:$0xff]  ;;  %v483_v62 = vld [vmem:[#allocation2 + $0x38] sm:$0xff]  ;;  %v1080_v30 = vld [vmem:[#allocation3 + $0x12] sm:$0xff] }
  0x44   : > { %v655_v0 = vld [vmem:[#allocation2 + $0x39] sm:$0xff]  ;;  %v737_v3 = vld [vmem:[#allocation3 + $0x31] sm:$0xff]  ;;  %v489_v5 = vpack.c.bf16 %v483_v62, %v482_v61  ;;  %v1089_v34 = vpack.c.bf16 %v1080_v30, %v906_v29  ;;  %v908_v38 = vld [vmem:[#allocation3 + $0x1a] sm:$0xff] }
  0x45   : > { %v564_v1 = vld [vmem:[#allocation3 + $0x30] sm:$0xff]  ;;  %v565_v2 = vld [vmem:[#allocation3 + $0x38] sm:$0xff]  ;;  %v661_v7 = vpack.c.bf16 %v655_v0, %v654_v63  ;;  %v997_v31 = vld [vmem:[#allocation2 + $0x12] sm:$0xff]  ;;  %v916_v42 = vpack.c.bf16 %v908_v38, %v1080_v30 }
  0x46   : > { %v738_v4 = vld [vmem:[#allocation3 + $0x39] sm:$0xff]  ;;  %v571_v8 = vpack.c.bf16 %v565_v2, %v564_v1  ;;  %v484_v14 = vld [vmem:[#allocation2 + $0x40] sm:$0xff]  ;;  %v1006_v35 = vpack.c.bf16 %v997_v31, %v823_v27  ;;  %v1082_v39 = vld [vmem:[#allocation3 + $0x22] sm:$0xff] }
  0x47   : > { %v744_v9 = vpack.c.bf16 %v738_v4, %v737_v3  ;;  %v485_v15 = vld [vmem:[#allocation2 + $0x48] sm:$0xff]  ;;  %v566_v18 = vld [vmem:[#allocation3 + $0x40] sm:$0xff]  ;;  %v567_v19 = vld [vmem:[#allocation3 + $0x48] sm:$0xff]  ;;  %v1090_v43 = vpack.c.bf16 %v1082_v39, %v908_v38 }
  0x48   : > { %v656_v16 = vld [vmem:[#allocation2 + $0x41] sm:$0xff]  ;;  %v657_v17 = vld [vmem:[#allocation2 + $0x49] sm:$0xff]  ;;  %v739_v20 = vld [vmem:[#allocation3 + $0x41] sm:$0xff]  ;;  %v490_v22 = vpack.c.bf16 %v485_v15, %v484_v14  ;;  %v572_v24 = vpack.c.bf16 %v567_v19, %v566_v18 }
  0x49   : > { %v740_v21 = vld [vmem:[#allocation3 + $0x49] sm:$0xff]  ;;  %v662_v23 = vpack.c.bf16 %v657_v17, %v656_v16  ;;  %v999_v40 = vld [vmem:[#allocation2 + $0x22] sm:$0xff]  ;;  %v827_v47 = vld [vmem:[#allocation2 + $0x2a] sm:$0xff] }
  0x4a   : > { %v745_v25 = vpack.c.bf16 %v740_v21, %v739_v20  ;;  %v825_v37 = vld [vmem:[#allocation2 + $0x1a] sm:$0xff]  ;;  %v1084_v49 = vld [vmem:[#allocation3 + $0x32] sm:$0xff]  ;;  %v1001_v50 = vld [vmem:[#allocation2 + $0x32] sm:$0xff]  ;;  %v834_v51 = vpack.c.bf16 %v827_v47, %v999_v40 }
  0x4b   : > { %v833_v41 = vpack.c.bf16 %v825_v37, %v997_v31  ;;  %v1007_v44 = vpack.c.bf16 %v999_v40, %v825_v37  ;;  %v3132_v45 = vld [vmem:[%s3711_s12 + $0x38] sm:$0xff]  ;;  %v3877_v53 = vld [vmem:[%s4470_s4] ss:$0 sm:$0xff]  ;;  %v1008_v55 = vpack.c.bf16 %v1001_v50, %v827_v47  ;;  %v912_v63 = vld [vmem:[#allocation3 + $0x3a] sm:$0xff] }
  0x4c   : > { %v3133_v46 = vld [vmem:[%s3739_s19 + $0x38] sm:$0xff]  ;;  %468 = vst.msk [vmem:[#allocation2 + $0x51] sm:$0xff] %vm394_vm0, %v3132_v45  ;;  %v1003_v3 = vld [vmem:[#allocation2 + $0x42] sm:$0xff]  ;;  %v3564_v14 = vld [vmem:[%s4468_s2 + $0x30] sm:$0xff] }
  0x4d   : > { %471 = vst.msk [vmem:[#allocation3 + $0x51] sm:$0xff] %vm410_vm1, %v3133_v46  ;;  %v910_v48 = vld [vmem:[#allocation3 + $0x2a] sm:$0xff]  ;;  %v1086_v1 = vld [vmem:[#allocation3 + $0x42] sm:$0xff] }
  0x4e   : > { %v917_v52 = vpack.c.bf16 %v910_v48, %v1082_v39  ;;  %v1091_v54 = vpack.c.bf16 %v1084_v49, %v910_v48  ;;  %v829_v62 = vld [vmem:[#allocation2 + $0x3a] sm:$0xff]  ;;  %v1170_v38 = vld [vmem:[#allocation2 + $0xb] sm:$0xff] }
  0x4f   : > { %v3563_v4 = vld [vmem:[%s4469_s3 + $0x58] sm:$0xff]  ;;  %v1344_v45 = vld [vmem:[#allocation2 + $0xc] sm:$0xff] }
  0x50   : > { %3164 = vmatmul.msk.bf16.gmra.mxu2 %vm394_vm0, %v660_v57  ;;  %1480 = vmatpush.bf16.msra.mxu3 %v3563_v4  ;;  %v1171_v39 = vld [vmem:[#allocation2 + $0x13] sm:$0xff]  ;;  %v1253_v40 = vld [vmem:[#allocation3 + $0xb] sm:$0xff] }
  0x51   : > { %3140 = vmatmul.msk.bf16.gmra.mxu0 %vm394_vm0, %v488_v56  ;;  %v3923_v46 = vld [vmem:[#allocation2 + $0x14] sm:$0xff]  ;;  %v1180_v48 = vpack.c.bf16 %v1171_v39, %v1170_v38  ;;  %v1174_v39 = vld [vmem:[#allocation2 + $0x2b] sm:$0xff] }
  0x52   : > { %3181 = vmatmul.msk.bf16.gmra.mxu3 %vm410_vm1, %v743_v59  ;;  %v1172_v4 = vld [vmem:[#allocation2 + $0x1b] sm:$0xff] }
  0x53   : > { %3153 = vmatmul.msk.bf16.gmra.mxu1 %vm410_vm1, %v570_v58  ;;  %v831_v17 = vld [vmem:[#allocation2 + $0x4a] sm:$0xff]  ;;  %v1005_v21 = vld [vmem:[#allocation2 + $0x52] sm:$0xff] }
  0x54   : > { %1481 = vmatpush.bf16.msra.mxu3 %v3562_v10  ;;  %v914_v18 = vld [vmem:[#allocation3 + $0x4a] sm:$0xff]  ;;  %v1088_v20 = vld [vmem:[#allocation3 + $0x52] sm:$0xff]  ;;  %v1010_v27 = vpack.c.bf16 %v1005_v21, %v831_v17  ;;  %v3940_v10 = vld [vmem:[#allocation3 + $0x1c] sm:$0xff] }
  0x55   : > { %v1093_v26 = vpack.c.bf16 %v1088_v20, %v914_v18 }
  0x60   : > { %3165 = vmatmul.msk.bf16.gmra.mxu2 %vm394_vm0, %v661_v7  ;;  %v918_v7 = vpack.c.bf16 %v912_v63, %v1084_v49 }
  0x61   : > { %3141 = vmatmul.msk.bf16.gmra.mxu0 %vm394_vm0, %v489_v5  ;;  %v835_v5 = vpack.c.bf16 %v829_v62, %v1001_v50 }
  0x62   : > { %3182 = vmatmul.msk.bf16.gmra.mxu3 %vm410_vm1, %v744_v9  ;;  %v1009_v9 = vpack.c.bf16 %v1003_v3, %v829_v62 }
  0x63   : > { %3154 = vmatmul.msk.bf16.gmra.mxu1 %vm410_vm1, %v571_v8  ;;  %v1092_v8 = vpack.c.bf16 %v1086_v1, %v912_v63 }
  0x70   : > { %3166 = vmatmul.msk.bf16.gmra.mxu2 %vm394_vm0, %v662_v23  ;;  %v919_v23 = vpack.c.bf16 %v914_v18, %v1086_v1 }
  0x71   : > { %3142 = vmatmul.msk.bf16.gmra.mxu0 %vm394_vm0, %v490_v22  ;;  %v836_v22 = vpack.c.bf16 %v831_v17, %v1003_v3  ;;  %v3946_v17 = vld [vmem:[#allocation2 + $0x24] sm:$0xff] }
  0x72   : > { %3183 = vmatmul.msk.bf16.gmra.mxu3 %vm410_vm1, %v745_v25 }
  0x73   : > { %3155 = vmatmul.msk.bf16.gmra.mxu1 %vm410_vm1, %v572_v24 }
  0x80   : > { %3207 = vmatmul.msk.bf16.vlgmr.msrb.gmra.mxu2 %vm410_vm1, %v915_v33 }
  0x81   : > { %3190 = vmatmul.msk.bf16.vlgmr.msrb.gmra.mxu0 %vm394_vm0, %v832_v32  ;;  %1654 = vmatpush.bf16.msrb.mxu2 %v3566_v12  ;;  %v3942_v12 = vld [vmem:[#allocation3 + $0x24] sm:$0xff] }
  0x82   : > { %3235 = vmatmul.msk.bf16.vlgmr.msrb.gmra.mxu3 %vm410_vm1, %v1089_v34  ;;  %1564 = vmatpush.bf16.msrb.mxu0 %v3564_v14  ;;  %v3944_v14 = vld [vmem:[#allocation2 + $0x1c] sm:$0xff] }
  0x83   : > { %3218 = vmatmul.msk.bf16.vlgmr.msrb.gmra.mxu1 %vm394_vm0, %v1006_v35 }
  0x90   : > { %3208 = vmatmul.msk.bf16.gmra.mxu2 %vm410_vm1, %v916_v42  ;;  %v1427_v42 = vld [vmem:[#allocation3 + $0xc] sm:$0xff] }
  0x91   : > { %3191 = vmatmul.msk.bf16.gmra.mxu0 %vm394_vm0, %v833_v41  ;;  %v1254_v41 = vld [vmem:[#allocation3 + $0x13] sm:$0xff] }
  0x92   : > { %3236 = vmatmul.msk.bf16.gmra.mxu3 %vm410_vm1, %v1090_v43  ;;  %v1263_v49 = vpack.c.bf16 %v1254_v41, %v1253_v40  ;;  %v1175_v40 = vld [vmem:[#allocation2 + $0x33] sm:$0xff]  ;;  %v1257_v41 = vld [vmem:[#allocation3 + $0x2b] sm:$0xff] }
  0x93   : > { %3219 = vmatmul.msk.bf16.gmra.mxu1 %vm394_vm0, %v1007_v44  ;;  %v3921_v44 = vld [vmem:[#allocation3 + $0x14] sm:$0xff] }
  0x96   : > { %v523_v56 = vpop.f32.mrf.mxu0 }
  0x97   : > { %v548_v57 = vadd.f32 %v3877_v53, %v523_v56  ;;  %v1354_v56 = vpack.c.bf16 %v3923_v46, %v1344_v45 }
  0x9d   : > { %v696_v59 = vpop.f32.mrf.mxu2 }
  0x9e   : > { %v3902_v13 = vpop.f32.mrf.mxu0 }
  0xa0   : > { %3209 = vmatmul.msk.bf16.gmra.mxu2 %vm410_vm1, %v917_v52 }
  0xa1   : > { %3192 = vmatmul.msk.bf16.gmra.mxu0 %vm394_vm0, %v834_v51 }
  0xa2   : > { %3237 = vmatmul.msk.bf16.gmra.mxu3 %vm410_vm1, %v1091_v54 }
  0xa3   : > { %3220 = vmatmul.msk.bf16.gmra.mxu1 %vm394_vm0, %v1008_v55  ;;  %v1437_v55 = vpack.c.bf16 %v3921_v44, %v1427_v42  ;;  %v1258_v42 = vld [vmem:[#allocation3 + $0x33] sm:$0xff] }
  0xa4   : > { %v613_v58 = vpop.f32.mrf.mxu1 }
  0xa5   : > { %v638_v60 = vadd.f32 %v613_v58, %v548_v57  ;;  %v3909_v16 = vpop.f32.mrf.mxu2 }
  0xa7   : > { %v721_v61 = vadd.f32 %v696_v59, %v638_v60 }
  0xab   : > { %v787_v0 = vpop.f32.mrf.mxu3 }
  0xac   : > { %v3884_v2 = vadd.f32 %v787_v0, %v721_v61  ;;  %v3907_v15 = vpop.f32.mrf.mxu1 }
  0xb0   : > { %3210 = vmatmul.msk.bf16.gmra.mxu2 %vm410_vm1, %v918_v7  ;;  %v1173_v7 = vld [vmem:[#allocation2 + $0x23] sm:$0xff] }
  0xb1   : > { %3193 = vmatmul.msk.bf16.gmra.mxu0 %vm394_vm0, %v835_v5  ;;  %v3565_v5 = vld [vmem:[%s4469_s3 + $0x60] sm:$0xff]  ;;  %v1181_v20 = vpack.c.bf16 %v1173_v7, %v1172_v4 }
  0xb2   : > { %3238 = vmatmul.msk.bf16.gmra.mxu3 %vm410_vm1, %v1092_v8  ;;  %v1255_v8 = vld [vmem:[#allocation3 + $0x1b] sm:$0xff]  ;;  %1655 = vmatpush.bf16.msrb.mxu2 %v3565_v5 }
  0xb3   : > { %3221 = vmatmul.msk.bf16.gmra.mxu1 %vm394_vm0, %v1009_v9  ;;  %v3911_v19 = vpop.f32.mrf.mxu3  ;;  %v1256_v9 = vld [vmem:[#allocation3 + $0x23] sm:$0xff] }
  0xb4   : > { %v1264_v21 = vpack.c.bf16 %v1256_v9, %v1255_v8 }
  0xbe   : > { %v528_v24 = vpop.f32.mrf.mxu0 }
  0xbf   : > { %v550_v25 = vadd.f32 %v3877_v53, %v528_v24 }
  0xc0   : > { %v618_v28 = vpop.f32.mrf.mxu1  ;;  %3211 = vmatmul.msk.bf16.gmra.mxu2 %vm410_vm1, %v919_v23 }
  0xc1   : > { %v640_v29 = vadd.f32 %v618_v28, %v550_v25  ;;  %3194 = vmatmul.msk.bf16.gmra.mxu0 %vm394_vm0, %v836_v22 }
  0xc2   : > { %3239 = vmatmul.msk.bf16.gmra.mxu3 %vm410_vm1, %v1093_v26  ;;  %v1438_v26 = vpack.c.bf16 %v3942_v12, %v3940_v10 }
  0xc3   : > { %3222 = vmatmul.msk.bf16.gmra.mxu1 %vm394_vm0, %v1010_v27  ;;  %v701_v30 = vpop.f32.mrf.mxu2  ;;  %v1355_v27 = vpack.c.bf16 %v3946_v17, %v3944_v14 }
  0xc4   : > { %v723_v31 = vadd.f32 %v701_v30, %v640_v29 }
  0xc5   : > { %v792_v33 = vpop.f32.mrf.mxu3 }
  0xc6   : > { %v530_v32 = vpop.f32.mrf.mxu0  ;;  %v3919_v35 = vadd.f32 %v792_v33, %v723_v31 }
  0xc7   : > { %v551_v34 = vadd.f32 %v3877_v53, %v530_v32 }
  0xc8   : > { %v620_v36 = vpop.f32.mrf.mxu1 }
  0xc9   : > { %v641_v37 = vadd.f32 %v620_v36, %v551_v34 }
  0xcb   : > { %v703_v43 = vpop.f32.mrf.mxu2 }
  0xcc   : > { %v724_v47 = vadd.f32 %v703_v43, %v641_v37  ;;  %v3962_v43 = vld [vmem:[#allocation3 + $0x2c] sm:$0xff] }
  0xcd   : > { %v794_v51 = vpop.f32.mrf.mxu3 }
  0xce   : > { %v533_v50 = vpop.f32.mrf.mxu0  ;;  %v3926_v54 = vadd.f32 %v794_v51, %v724_v47  ;;  %v3964_v47 = vld [vmem:[#allocation3 + $0x34] sm:$0xff]  ;;  %v1182_v51 = vpack.c.bf16 %v1175_v40, %v1174_v39 }
  0xcf   : > { %v552_v52 = vadd.f32 %v3877_v53, %v533_v50 }
  0xd0   : > { %v623_v57 = vpop.f32.mrf.mxu1  ;;  %3263 = vmatmul.msk.bf16.vlgmr.msra.gmra.mxu2 %vm410_vm1, %v1263_v49  ;;  %v3968_v49 = vld [vmem:[#allocation2 + $0x34] sm:$0xff] }
  0xd1   : > { %v642_v58 = vadd.f32 %v623_v57, %v552_v52  ;;  %3246 = vmatmul.msk.bf16.vlgmr.msra.gmra.mxu0 %vm394_vm0, %v1180_v48  ;;  %v3966_v48 = vld [vmem:[#allocation2 + $0x2c] sm:$0xff]  ;;  %v1265_v52 = vpack.c.bf16 %v1258_v42, %v1257_v41 }
  0xd2   : > { %3291 = vmatmul.msk.bf16.vlgmr.msra.gmra.mxu3 %vm410_vm1, %v1437_v55  ;;  %v3568_v41 = vld [vmem:[%s4469_s3 + $0x70] sm:$0xff]  ;;  %v3572_v42 = vld [vmem:[%s4469_s3 + $0x88] sm:$0xff] }
  0xd3   : > { %3274 = vmatmul.msk.bf16.vlgmr.msra.gmra.mxu1 %vm394_vm0, %v1354_v56  ;;  %v706_v59 = vpop.f32.mrf.mxu2  ;;  %2002 = vmatpush.bf16.msra.mxu2 %v3572_v42  ;;  %v1692_v42 = vld [vmem:[#allocation2 + $0x15] sm:$0xff] }
  0xd4   : > { %v725_v60 = vadd.f32 %v706_v59, %v642_v58  ;;  %v1439_v59 = vpack.c.bf16 %v3964_v47, %v3962_v43 }
  0xd5   : > { %v797_v62 = vpop.f32.mrf.mxu3 }
  0xd6   : > { %v535_v61 = vpop.f32.mrf.mxu0  ;;  %v3935_v0 = vadd.f32 %v797_v62, %v725_v60  ;;  %v1356_v60 = vpack.c.bf16 %v3968_v49, %v3966_v48 }
  0xd7   : > { %v553_v63 = vadd.f32 %v3877_v53, %v535_v61 }
  0xd8   : > { %v625_v1 = vpop.f32.mrf.mxu1 }
  0xd9   : > { %v643_v3 = vadd.f32 %v625_v1, %v553_v63 }
  0xdb   : > { %v708_v11 = vpop.f32.mrf.mxu2 }
  0xdc   : > { %v726_v18 = vadd.f32 %v708_v11, %v643_v3  ;;  %v1176_v11 = vld [vmem:[#allocation2 + $0x3b] sm:$0xff] }
  0xdd   : > { %v799_v23 = vpop.f32.mrf.mxu3 }
  0xde   : > { %v538_v22 = vpop.f32.mrf.mxu0  ;;  %v3949_v25 = vadd.f32 %v799_v23, %v726_v18  ;;  %v549_v18 = vadd.f32 %v3877_v53, %v3902_v13  ;;  %v3986_v23 = vld [vmem:[#allocation3 + $0x3c] sm:$0xff] }
  0xdf   : > { %v554_v24 = vadd.f32 %v3877_v53, %v538_v22  ;;  %v1260_v22 = vld [vmem:[#allocation3 + $0x43] sm:$0xff] }
  0xe0   : > { %v628_v28 = vpop.f32.mrf.mxu1  ;;  %3264 = vmatmul.msk.bf16.gmra.mxu2 %vm410_vm1, %v1264_v21  ;;  %v1259_v21 = vld [vmem:[#allocation3 + $0x3b] sm:$0xff] }
  0xe1   : > { %v644_v29 = vadd.f32 %v628_v28, %v554_v24  ;;  %3247 = vmatmul.msk.bf16.gmra.mxu0 %vm394_vm0, %v1181_v20  ;;  %v1177_v20 = vld [vmem:[#allocation2 + $0x43] sm:$0xff]  ;;  %v3988_v24 = vld [vmem:[#allocation3 + $0x44] sm:$0xff] }
  0xe2   : > { %3292 = vmatmul.msk.bf16.gmra.mxu3 %vm410_vm1, %v1438_v26  ;;  %v3992_v28 = vld [vmem:[#allocation2 + $0x44] sm:$0xff] }
  0xe3   : > { %3275 = vmatmul.msk.bf16.gmra.mxu1 %vm394_vm0, %v1355_v27  ;;  %v711_v30 = vpop.f32.mrf.mxu2  ;;  %v3990_v27 = vld [vmem:[#allocation2 + $0x3c] sm:$0xff] }
  0xe4   : > { %v727_v31 = vadd.f32 %v711_v30, %v644_v29  ;;  %v3569_v29 = vld [vmem:[%s4469_s3 + $0x78] sm:$0xff]  ;;  %v1357_v39 = vpack.c.bf16 %v3992_v28, %v3990_v27 }
  0xe5   : > { %v802_v33 = vpop.f32.mrf.mxu3  ;;  %1828 = vmatpush.bf16.msrb.mxu3 %v3569_v29 }
  0xe6   : > { %v540_v32 = vpop.f32.mrf.mxu0  ;;  %v3960_v36 = vadd.f32 %v802_v33, %v727_v31  ;;  %v1183_v31 = vpack.c.bf16 %v1177_v20, %v1176_v11 }
  0xe7   : > { %v555_v34 = vadd.f32 %v3877_v53, %v540_v32  ;;  %v1266_v32 = vpack.c.bf16 %v1260_v22, %v1259_v21 }
  0xe8   : > { %v630_v37 = vpop.f32.mrf.mxu1 }
  0xe9   : > { %v645_v38 = vadd.f32 %v630_v37, %v555_v34  ;;  %1829 = vmatpush.bf16.msrb.mxu3 %v3568_v41  ;;  %v1775_v41 = vld [vmem:[#allocation3 + $0x15] sm:$0xff] }
  0xeb   : > { %v713_v45 = vpop.f32.mrf.mxu2 }
  0xec   : > { %v728_v50 = vadd.f32 %v713_v45, %v645_v38  ;;  %v1440_v38 = vpack.c.bf16 %v3988_v24, %v3986_v23 }
  0xed   : > { %v804_v56 = vpop.f32.mrf.mxu3 }
  0xee   : > { %v543_v55 = vpop.f32.mrf.mxu0  ;;  %v3971_v58 = vadd.f32 %v804_v56, %v728_v50 }
  0xef   : > { %v556_v57 = vadd.f32 %v3877_v53, %v543_v55 }
  0xf0   : > { %v633_v61 = vpop.f32.mrf.mxu1  ;;  %3265 = vmatmul.msk.bf16.gmra.mxu2 %vm410_vm1, %v1265_v52 }
  0xf1   : > { %v646_v62 = vadd.f32 %v633_v61, %v556_v57  ;;  %3248 = vmatmul.msk.bf16.gmra.mxu0 %vm394_vm0, %v1182_v51  ;;  %v3570_v51 = vld [vmem:[%s4468_s2 + $0x40] sm:$0xff]  ;;  %v1178_v61 = vld [vmem:[#allocation2 + $0x4b] sm:$0xff] }
  0xf2   : > { %3293 = vmatmul.msk.bf16.gmra.mxu3 %vm410_vm1, %v1439_v59  ;;  %1912 = vmatpush.bf16.msra.mxu0 %v3570_v51  ;;  %v1611_v51 = vpack.c.bf16 %v3940_v10, %v3921_v44 }
  0xf3   : > { %3276 = vmatmul.msk.bf16.gmra.mxu1 %vm394_vm0, %v1356_v60  ;;  %v716_v63 = vpop.f32.mrf.mxu2 }
  0xf4   : > { %v729_v1 = vadd.f32 %v716_v63, %v646_v62  ;;  %v1179_v62 = vld [vmem:[#allocation2 + $0x53] sm:$0xff]  ;;  %v1261_v63 = vld [vmem:[#allocation3 + $0x4b] sm:$0xff] }
  0xf5   : > { %v807_v4 = vpop.f32.mrf.mxu3  ;;  %v1184_v11 = vpack.c.bf16 %v1179_v62, %v1178_v61 }
  0xf6   : > { %v545_v3 = vpop.f32.mrf.mxu0  ;;  %v3982_v7 = vadd.f32 %v807_v4, %v729_v1  ;;  %v1262_v1 = vld [vmem:[#allocation3 + $0x53] sm:$0xff] }
  0xf7   : > { %v557_v5 = vadd.f32 %v3877_v53, %v545_v3  ;;  %v639_v53 = vadd.f32 %v3907_v15, %v549_v18  ;;  %v4025_v3 = vld [vmem:[#allocation3 + $0x4c] sm:$0xff]  ;;  %v4027_v4 = vld [vmem:[#allocation3 + $0x54] sm:$0xff]  ;;  %v1267_v18 = vpack.c.bf16 %v1262_v1, %v1261_v63 }
  0xf8   : > { %v635_v8 = vpop.f32.mrf.mxu1  ;;  %v1441_v29 = vpack.c.bf16 %v4027_v4, %v4025_v3 }
  0xf9   : > { %v647_v9 = vadd.f32 %v635_v8, %v557_v5  ;;  %v722_v15 = vadd.f32 %v3909_v16, %v639_v53  ;;  %v4029_v5 = vld [vmem:[#allocation2 + $0x4c] sm:$0xff]  ;;  %v4031_v8 = vld [vmem:[#allocation2 + $0x54] sm:$0xff] }
  0xfb   : > { %v718_v26 = vpop.f32.mrf.mxu2  ;;  %v813_v16 = vadd.f32 %v3911_v19, %v722_v15 }
  0xfc   : > { %v730_v30 = vadd.f32 %v718_v26, %v647_v9 }
  0xfd   : > { %v809_v13 = vpop.f32.mrf.mxu3 }
  0xfe   : > { %v870_v33 = vpop.f32.mrf.mxu0  ;;  %v3998_v34 = vadd.f32 %v809_v13, %v730_v30  ;;  %v1358_v30 = vpack.c.bf16 %v4031_v8, %v4029_v5 }
  0xff   : > { %v895_v37 = vadd.f32 %v870_v33, %v3884_v2  ;;  %v3567_v2 = vld [vmem:[%s4468_s2 + $0x38] sm:$0xff] }
 0x100   : > { %v1044_v40 = vpop.f32.mrf.mxu1  ;;  %3266 = vmatmul.msk.bf16.gmra.mxu2 %vm410_vm1, %v1266_v32  ;;  %1738 = vmatpush.bf16.msrb.mxu1 %v3567_v2  ;;  %v1776_v2 = vld [vmem:[#allocation3 + $0x1d] sm:$0xff] }
 0x101   : > { %3249 = vmatmul.msk.bf16.gmra.mxu0 %vm394_vm0, %v1183_v31 }
 0x102   : > { %3294 = vmatmul.msk.bf16.gmra.mxu3 %vm410_vm1, %v1440_v38 }
 0x103   : > { %3277 = vmatmul.msk.bf16.gmra.mxu1 %vm394_vm0, %v1357_v39  ;;  %v961_v45 = vpop.f32.mrf.mxu2 }
 0x104   : > { %v986_v50 = vadd.f32 %v961_v45, %v895_v37  ;;  %v1693_v45 = vld [vmem:[#allocation2 + $0x1d] sm:$0xff] }
 0x105   : > { %v1135_v55 = vpop.f32.mrf.mxu3 }
 0x106   : > { %v872_v52 = vpop.f32.mrf.mxu0  ;;  %v1069_v57 = vadd.f32 %v1044_v40, %v986_v50  ;;  %v1528_v50 = vpack.c.bf16 %v3944_v14, %v3923_v46 }
 0x107   : > { %v896_v56 = vadd.f32 %v872_v52, %v813_v16 }
 0x108   : > { %v1046_v59 = vpop.f32.mrf.mxu1  ;;  %v4023_v60 = vadd.f32 %v1135_v55, %v1069_v57  ;;  %v1785_v57 = vpack.c.bf16 %v1776_v2, %v1775_v41  ;;  %v1779_v2 = vld [vmem:[#allocation3 + $0x35] sm:$0xff] }
 0x10b   : > { %v963_v19 = vpop.f32.mrf.mxu2 }
 0x10c   : > { %v987_v9 = vadd.f32 %v963_v19, %v896_v56 }
 0x10d   : > { %v1137_v21 = vpop.f32.mrf.mxu3 }
 0x10e   : > { %v875_v20 = vpop.f32.mrf.mxu0  ;;  %v1070_v26 = vadd.f32 %v1046_v59, %v987_v9  ;;  %v1702_v59 = vpack.c.bf16 %v1693_v45, %v1692_v42  ;;  %v3571_v9 = vld [vmem:[%s4469_s3 + $0x80] sm:$0xff]  ;;  %v1780_v45 = vld [vmem:[#allocation3 + $0x3d] sm:$0xff] }
 0x10f   : > { %v897_v22 = vadd.f32 %v875_v20, %v3919_v35  ;;  %2003 = vmatpush.bf16.msra.mxu2 %v3571_v9  ;;  %v1778_v20 = vld [vmem:[#allocation3 + $0x2d] sm:$0xff]  ;;  %v1699_v9 = vld [vmem:[#allocation2 + $0x4d] sm:$0xff] }
 0x110   : > { %v1049_v31 = vpop.f32.mrf.mxu1  ;;  %v4038_v32 = vadd.f32 %v1137_v21, %v1070_v26  ;;  %3267 = vmatmul.msk.bf16.gmra.mxu2 %vm410_vm1, %v1267_v18  ;;  %v1694_v21 = vld [vmem:[#allocation2 + $0x25] sm:$0xff] }
 0x111   : > { %3250 = vmatmul.msk.bf16.gmra.mxu0 %vm394_vm0, %v1184_v11  ;;  %v1777_v11 = vld [vmem:[#allocation3 + $0x25] sm:$0xff] }
 0x112   : > { %3295 = vmatmul.msk.bf16.gmra.mxu3 %vm410_vm1, %v1441_v29  ;;  %v1529_v29 = vpack.c.bf16 %v3966_v48, %v3946_v17 }
 0x113   : > { %3278 = vmatmul.msk.bf16.gmra.mxu1 %vm394_vm0, %v1358_v30  ;;  %v966_v53 = vpop.f32.mrf.mxu2 }
 0x114   : > { %v988_v35 = vadd.f32 %v966_v53, %v897_v22  ;;  %v1695_v22 = vld [vmem:[#allocation2 + $0x2d] sm:$0xff] }
 0x115   : > { %v1140_v33 = vpop.f32.mrf.mxu3 }
 0x116   : > { %v877_v13 = vpop.f32.mrf.mxu0  ;;  %v1071_v38 = vadd.f32 %v1049_v31, %v988_v35 }
 0x117   : > { %v898_v37 = vadd.f32 %v877_v13, %v3926_v54  ;;  %v1786_v13 = vpack.c.bf16 %v1778_v20, %v1777_v11  ;;  %v1614_v20 = vpack.c.bf16 %v4025_v3, %v3988_v24 }
 0x118   : > { %v1051_v39 = vpop.f32.mrf.mxu1  ;;  %v4045_v40 = vadd.f32 %v1140_v33, %v1071_v38  ;;  %v1703_v33 = vpack.c.bf16 %v1695_v22, %v1694_v21 }
 0x11b   : > { %v968_v15 = vpop.f32.mrf.mxu2 }
 0x11c   : > { %v989_v16 = vadd.f32 %v968_v15, %v898_v37 }
 0x11d   : > { %v1142_v55 = vpop.f32.mrf.mxu3 }
 0x11e   : > { %v880_v52 = vpop.f32.mrf.mxu0  ;;  %v1072_v56 = vadd.f32 %v1051_v39, %v989_v16  ;;  %v1696_v16 = vld [vmem:[#allocation2 + $0x35] sm:$0xff] }
 0x11f   : > { %v899_v54 = vadd.f32 %v880_v52, %v3935_v0  ;;  %v1530_v52 = vpack.c.bf16 %v3990_v27, %v3968_v49 }
 0x120   : > { %v1054_v61 = vpop.f32.mrf.mxu1  ;;  %v4052_v62 = vadd.f32 %v1142_v55, %v1072_v56  ;;  %3319 = vmatmul.msk.bf16.vlgmr.msrb.gmra.mxu2 %vm410_vm1, %v1611_v51  ;;  %v1613_v55 = vpack.c.bf16 %v3986_v23, %v3964_v47 }
 0x121   : > { %3302 = vmatmul.msk.bf16.vlgmr.msrb.gmra.mxu0 %vm394_vm0, %v1528_v50  ;;  %v1697_v50 = vld [vmem:[#allocation2 + $0x3d] sm:$0xff] }
 0x122   : > { %3347 = vmatmul.msk.bf16.vlgmr.msrb.gmra.mxu3 %vm410_vm1, %v1785_v57  ;;  %v1787_v57 = vpack.c.bf16 %v1780_v45, %v1779_v2 }
 0x123   : > { %3330 = vmatmul.msk.bf16.vlgmr.msrb.gmra.mxu1 %vm394_vm0, %v1702_v59  ;;  %v971_v46 = vpop.f32.mrf.mxu2  ;;  %v1704_v59 = vpack.c.bf16 %v1697_v50, %v1696_v16 }
 0x124   : > { %v990_v44 = vadd.f32 %v971_v46, %v899_v54 }
 0x125   : > { %v1145_v14 = vpop.f32.mrf.mxu3 }
 0x126   : > { %v882_v10 = vpop.f32.mrf.mxu0  ;;  %v1073_v63 = vadd.f32 %v1054_v61, %v990_v44 }
 0x127   : > { %v900_v0 = vadd.f32 %v882_v10, %v3949_v25  ;;  %v1612_v25 = vpack.c.bf16 %v3962_v43, %v3942_v12 }
 0x128   : > { %v1056_v1 = vpop.f32.mrf.mxu1  ;;  %v4059_v19 = vadd.f32 %v1145_v14, %v1073_v63  ;;  %v1781_v14 = vld [vmem:[#allocation3 + $0x45] sm:$0xff]  ;;  %v1782_v63 = vld [vmem:[#allocation3 + $0x4d] sm:$0xff] }
 0x12b   : > { %v973_v18 = vpop.f32.mrf.mxu2 }
 0x12c   : > { %v991_v26 = vadd.f32 %v973_v18, %v900_v0  ;;  %v1531_v18 = vpack.c.bf16 %v4029_v5, %v3992_v28 }
 0x12d   : > { %v1147_v31 = vpop.f32.mrf.mxu3 }
 0x12e   : > { %v885_v30 = vpop.f32.mrf.mxu0  ;;  %v1074_v35 = vadd.f32 %v1056_v1, %v991_v26  ;;  %v1698_v1 = vld [vmem:[#allocation2 + $0x45] sm:$0xff]  ;;  %v1788_v26 = vpack.c.bf16 %v1782_v63, %v1781_v14 }
 0x12f   : > { %v901_v53 = vadd.f32 %v885_v30, %v3960_v36 }
 0x130   : > { %v1059_v37 = vpop.f32.mrf.mxu1  ;;  %v4069_v38 = vadd.f32 %v1147_v31, %v1074_v35  ;;  %3320 = vmatmul.msk.bf16.gmra.mxu2 %vm410_vm1, %v1612_v25  ;;  %v1527_v35 = vld [vmem:[#allocation2 + $0x5c] sm:$0xff] }
 0x131   : > { %3303 = vmatmul.msk.bf16.gmra.mxu0 %vm394_vm0, %v1529_v29  ;;  %v1705_v29 = vpack.c.bf16 %v1699_v9, %v1698_v1 }
 0x132   : > { %3348 = vmatmul.msk.bf16.gmra.mxu3 %vm410_vm1, %v1786_v13  ;;  %v1610_v13 = vld [vmem:[#allocation3 + $0x5c] sm:$0xff] }
 0x133   : > { %3331 = vmatmul.msk.bf16.gmra.mxu1 %vm394_vm0, %v1703_v33  ;;  %v976_v17 = vpop.f32.mrf.mxu2  ;;  %v1783_v33 = vld [vmem:[#allocation3 + $0x55] sm:$0xff] }
 0x134   : > { %v992_v12 = vadd.f32 %v976_v17, %v901_v53  ;;  %v1784_v17 = vld [vmem:[#allocation3 + $0x5d] sm:$0xff] }
 0x135   : > { %v1150_v48 = vpop.f32.mrf.mxu3  ;;  %v1789_v45 = vpack.c.bf16 %v1784_v17, %v1783_v33 }
 0x136   : > { %v887_v43 = vpop.f32.mrf.mxu0  ;;  %v1075_v39 = vadd.f32 %v1059_v37, %v992_v12  ;;  %v1700_v12 = vld [vmem:[#allocation2 + $0x55] sm:$0xff] }
 0x137   : > { %v902_v36 = vadd.f32 %v887_v43, %v3971_v58  ;;  %v1701_v43 = vld [vmem:[#allocation2 + $0x5d] sm:$0xff] }
 0x138   : > { %v4076_v41 = vpop.f32.mrf.mxu1  ;;  %v4078_v15 = vadd.f32 %v1150_v48, %v1075_v39  ;;  %v1615_v39 = vpack.c.bf16 %v1610_v13, %v4027_v4  ;;  %v1706_v16 = vpack.c.bf16 %v1701_v43, %v1700_v12 }
 0x13b   : > { %v978_v42 = vpop.f32.mrf.mxu2 }
 0x13c   : > { %v4080_v51 = vadd.f32 %v978_v42, %v902_v36  ;;  %v1532_v36 = vpack.c.bf16 %v1527_v35, %v4031_v8 }
 0x13d   : > { %v4086_v58 = vpop.f32.mrf.mxu3 }
 0x13e   : > { %v890_v54 = vpop.f32.mrf.mxu0 }
 0x13f   : > { %v903_v56 = vadd.f32 %v890_v54, %v3982_v7 }
 0x140   : > { %v1064_v61 = vpop.f32.mrf.mxu1  ;;  %3321 = vmatmul.msk.bf16.gmra.mxu2 %vm410_vm1, %v1613_v55 }
 0x141   : > { %3304 = vmatmul.msk.bf16.gmra.mxu0 %vm394_vm0, %v1530_v52 }
 0x142   : > { %3349 = vmatmul.msk.bf16.gmra.mxu3 %vm410_vm1, %v1787_v57 }
 0x143   : > { %3332 = vmatmul.msk.bf16.gmra.mxu1 %vm394_vm0, %v1704_v59  ;;  %v981_v49 = vpop.f32.mrf.mxu2  ;;  %v1866_v59 = vld [vmem:[#allocation2 + $0x16] sm:$0xff] }
 0x144   : > { %v994_v27 = vadd.f32 %v981_v49, %v903_v56  ;;  %v1949_v49 = vld [vmem:[#allocation3 + $0x16] sm:$0xff] }
 0x145   : > { %v1155_v47 = vpop.f32.mrf.mxu3 }
 0x146   : > { %v892_v46 = vpop.f32.mrf.mxu0  ;;  %v1077_v44 = vadd.f32 %v1064_v61, %v994_v27  ;;  %v1867_v61 = vld [vmem:[#allocation2 + $0x1e] sm:$0xff]  ;;  %v1950_v27 = vld [vmem:[#allocation3 + $0x1e] sm:$0xff] }
 0x147   : > { %v904_v23 = vadd.f32 %v892_v46, %v3998_v34 }
 0x148   : > { %v4094_v10 = vpop.f32.mrf.mxu1  ;;  %v4096_v7 = vadd.f32 %v1155_v47, %v1077_v44  ;;  %v1959_v44 = vpack.c.bf16 %v1950_v27, %v1949_v49  ;;  %v3574_v49 = vld [vmem:[%s4471_s5 + $0x8] sm:$0xff] }
 0x149   : > { %2139 = vmatpush.bf16.msra.mxu1 %v3574_v49 }
 0x14b   : > { %v983_v0 = vpop.f32.mrf.mxu2 }
 0x14c   : > { %v4098_v11 = vadd.f32 %v983_v0, %v904_v23  ;;  %v1876_v23 = vpack.c.bf16 %v1867_v61, %v1866_v59 }
 0x14d   : > { %v4104_v34 = vpop.f32.mrf.mxu3 }
 0x14e   : > { %v1218_v21 = vpop.f32.mrf.mxu0 }
 0x14f   : > { %v1243_v22 = vadd.f32 %v1218_v21, %v4023_v60 }
 0x150   : > { %v1392_v25 = vpop.f32.mrf.mxu1  ;;  %3322 = vmatmul.msk.bf16.gmra.mxu2 %vm410_vm1, %v1614_v20 }
 0x151   : > { %3305 = vmatmul.msk.bf16.gmra.mxu0 %vm394_vm0, %v1531_v18 }
 0x152   : > { %3350 = vmatmul.msk.bf16.gmra.mxu3 %vm410_vm1, %v1788_v26 }
 0x153   : > { %3333 = vmatmul.msk.bf16.gmra.mxu1 %vm394_vm0, %v1705_v29  ;;  %v1309_v28 = vpop.f32.mrf.mxu2 }
 0x154   : > { %v1334_v5 = vadd.f32 %v1309_v28, %v1243_v22  ;;  %v1869_v28 = vld [vmem:[#allocation2 + $0x2e] sm:$0xff] }
 0x155   : > { %v1483_v24 = vpop.f32.mrf.mxu3 }
 0x156   : > { %v1220_v30 = vpop.f32.mrf.mxu0  ;;  %v1417_v31 = vadd.f32 %v1392_v25, %v1334_v5  ;;  %v1868_v25 = vld [vmem:[#allocation2 + $0x26] sm:$0xff]  ;;  %v1951_v5 = vld [vmem:[#allocation3 + $0x26] sm:$0xff] }
 0x157   : > { %v1244_v3 = vadd.f32 %v1220_v30, %v4038_v32 }
 0x158   : > { %v4112_v53 = vpop.f32.mrf.mxu1  ;;  %v4114_v60 = vadd.f32 %v1483_v24, %v1417_v31 }
 0x15b   : > { %v1311_v37 = vpop.f32.mrf.mxu2 }
 0x15c   : > { %v4116_v48 = vadd.f32 %v1311_v37, %v1244_v3  ;;  %v1877_v3 = vpack.c.bf16 %v1869_v28, %v1868_v25 }
 0x15d   : > { %v4120_v32 = vpop.f32.mrf.mxu3 }
 0x15e   : > { %v1223_v2 = vpop.f32.mrf.mxu0 }
 0x15f   : > { %v1245_v42 = vadd.f32 %v1223_v2, %v4045_v40  ;;  %v1870_v2 = vld [vmem:[#allocation2 + $0x36] sm:$0xff] }
 0x160   : > { %v1397_v50 = vpop.f32.mrf.mxu1  ;;  %3323 = vmatmul.msk.bf16.gmra.mxu2 %vm410_vm1, %v1615_v39 }
 0x161   : > { %3306 = vmatmul.msk.bf16.gmra.mxu0 %vm394_vm0, %v1532_v36 }
 0x162   : > { %3351 = vmatmul.msk.bf16.gmra.mxu3 %vm410_vm1, %v1789_v45  ;;  %v1871_v45 = vld [vmem:[#allocation2 + $0x3e] sm:$0xff] }
 0x163   : > { %3334 = vmatmul.msk.bf16.gmra.mxu1 %vm394_vm0, %v1706_v16  ;;  %v1314_v52 = vpop.f32.mrf.mxu2  ;;  %v1953_v16 = vld [vmem:[#allocation3 + $0x36] sm:$0xff] }
 0x164   : > { %v1336_v8 = vadd.f32 %v1314_v52, %v1245_v42 }
 0x165   : > { %v1488_v4 = vpop.f32.mrf.mxu3 }
 0x166   : > { %v1225_v55 = vpop.f32.mrf.mxu0  ;;  %v1419_v56 = vadd.f32 %v1397_v50, %v1336_v8  ;;  %v1954_v50 = vld [vmem:[#allocation3 + $0x3e] sm:$0xff] }
 0x167   : > { %v1246_v54 = vadd.f32 %v1225_v55, %v4052_v62  ;;  %v1961_v8 = vpack.c.bf16 %v1954_v50, %v1953_v16 }
 0x168   : > { %v4128_v57 = vpop.f32.mrf.mxu1  ;;  %v4130_v40 = vadd.f32 %v1488_v4, %v1419_v56 }
 0x16b   : > { %v1316_v46 = vpop.f32.mrf.mxu2 }
 0x16c   : > { %v4132_v47 = vadd.f32 %v1316_v46, %v1246_v54 }
 0x16d   : > { %v4134_v0 = vpop.f32.mrf.mxu3 }
 0x16e   : > { %v1228_v14 = vpop.f32.mrf.mxu0 }
 0x16f   : > { %v1247_v63 = vadd.f32 %v1228_v14, %v4059_v19  ;;  %v1952_v19 = vld [vmem:[#allocation3 + $0x2e] sm:$0xff]  ;;  %v1872_v14 = vld [vmem:[#allocation2 + $0x46] sm:$0xff] }
 0x170   : > { %v1402_v62 = vpop.f32.mrf.mxu1  ;;  %3375 = vmatmul.msk.bf16.vlgmr.msra.gmra.mxu2 %vm410_vm1, %v1959_v44  ;;  %v1960_v31 = vpack.c.bf16 %v1952_v19, %v1951_v5  ;;  %v1874_v5 = vld [vmem:[#allocation2 + $0x56] sm:$0xff]  ;;  %v1875_v19 = vld [vmem:[#allocation2 + $0x5e] sm:$0xff] }
 0x171   : > { %3358 = vmatmul.msk.bf16.vlgmr.msra.gmra.mxu0 %vm394_vm0, %v1876_v23 }
 0x173   : > { %v1319_v1 = vpop.f32.mrf.mxu2 }
 0x174   : > { %v1338_v9 = vadd.f32 %v1319_v1, %v1247_v63  ;;  %v1873_v63 = vld [vmem:[#allocation2 + $0x4e] sm:$0xff] }
 0x175   : > { %v1493_v20 = vpop.f32.mrf.mxu3 }
 0x176   : > { %v1230_v18 = vpop.f32.mrf.mxu0  ;;  %v1421_v22 = vadd.f32 %v1402_v62, %v1338_v9  ;;  %v1956_v62 = vld [vmem:[#allocation3 + $0x4e] sm:$0xff]  ;;  %v1879_v9 = vpack.c.bf16 %v1873_v63, %v1872_v14  ;;  %v3578_v14 = vld [vmem:[%s4471_s5 + $0x28] sm:$0xff] }
 0x177   : > { %v1248_v21 = vadd.f32 %v1230_v18, %v4069_v38  ;;  %2321 = vmatpush.bf16.msrb.mxu0 %v3578_v14 }
 0x178   : > { %v4140_v26 = vpop.f32.mrf.mxu1  ;;  %v4142_v29 = vadd.f32 %v1493_v20, %v1421_v22 }
 0x17b   : > { %v1321_v30 = vpop.f32.mrf.mxu2 }
 0x17c   : > { %v4144_v24 = vadd.f32 %v1321_v30, %v1248_v21  ;;  %v1957_v30 = vld [vmem:[#allocation3 + $0x56] sm:$0xff] }
 0x17d   : > { %v4146_v13 = vpop.f32.mrf.mxu3 }
 0x17e   : > { %v1233_v35 = vpop.f32.mrf.mxu0 }
 0x17f   : > { %v1249_v33 = vadd.f32 %v1233_v35, %v4078_v15  ;;  %v1878_v15 = vpack.c.bf16 %v1871_v45, %v1870_v2  ;;  %v1880_v35 = vpack.c.bf16 %v1875_v19, %v1874_v5  ;;  %v3573_v2 = vld [vmem:[%s4471_s5] sm:$0xff] }
 0x180   : > { %v1407_v38 = vpop.f32.mrf.mxu1  ;;  %3376 = vmatmul.msk.bf16.gmra.mxu2 %vm410_vm1, %v1960_v31  ;;  %2140 = vmatpush.bf16.msra.mxu1 %v3573_v2 }
 0x181   : > { %3359 = vmatmul.msk.bf16.gmra.mxu0 %vm394_vm0, %v1877_v3  ;;  %v1958_v3 = vld [vmem:[#allocation3 + $0x5e] sm:$0xff] }
 0x183   : > { %v1324_v37 = vpop.f32.mrf.mxu2 }
 0x184   : > { %v1340_v17 = vadd.f32 %v1324_v37, %v1249_v33  ;;  %v1963_v33 = vpack.c.bf16 %v1958_v3, %v1957_v30  ;;  %v3579_v3 = vld [vmem:[%s4471_s5 + $0x30] sm:$0xff] }
 0x185   : > { %v1498_v43 = vpop.f32.mrf.mxu3 }
 0x186   : > { %v4151_v12 = vpop.f32.mrf.mxu0  ;;  %v1423_v36 = vadd.f32 %v1407_v38, %v1340_v17 }
 0x188   : > { %v1514_v39 = vadd.f32 %v1498_v43, %v1423_v36  ;;  %v4153_v42 = vpop.f32.mrf.mxu1 }
 0x18b   : > { %v4155_v52 = vpop.f32.mrf.mxu2 }
 0x18d   : > { %v4157_v4 = vpop.f32.mrf.mxu3 }
 0x18e   : > { %v1238_v55 = vpop.f32.mrf.mxu0 }
 0x18f   : > { %v1251_v54 = vadd.f32 %v1238_v55, %v4096_v7  ;;  %v1955_v7 = vld [vmem:[#allocation3 + $0x46] sm:$0xff] }
 0x190   : > { %3377 = vmatmul.msk.bf16.gmra.mxu2 %vm410_vm1, %v1961_v8  ;;  %v1412_v59 = vpop.f32.mrf.mxu1  ;;  %v1962_v18 = vpack.c.bf16 %v1956_v62, %v1955_v7  ;;  %v3575_v62 = vld [vmem:[%s4471_s5 + $0x10] sm:$0xff] }
 0x191   : > { %3360 = vmatmul.msk.bf16.gmra.mxu0 %vm394_vm0, %v1878_v15 }
 0x193   : > { %v1329_v56 = vpop.f32.mrf.mxu2 }
 0x194   : > { %v1342_v61 = vadd.f32 %v1329_v56, %v1251_v54 }
 0x195   : > { %v1503_v46 = vpop.f32.mrf.mxu3 }
 0x196   : > { %v4165_v27 = vpop.f32.mrf.mxu0  ;;  %v1425_v23 = vadd.f32 %v1412_v59, %v1342_v61 }
 0x198   : > { %v1516_v44 = vadd.f32 %v1503_v46, %v1425_v23  ;;  %v4191_v55 = vpop.f32.mrf.mxu1  ;;  %v3576_v23 = vld [vmem:[%s4471_s5 + $0x18] sm:$0xff] }
 0x199   : > { %2230 = vmatpush.bf16.msra.mxu3 %v3576_v23 }
 0x19b   : > { %v4167_v1 = vpop.f32.mrf.mxu2 }
 0x19d   : > { %v4193_v59 = vpop.f32.mrf.mxu3  ;;  %2231 = vmatpush.bf16.msra.mxu3 %v3575_v62  ;;  %v1420_v62 = vadd.f32 %v4128_v57, %v4132_v47 }
 0x19e   : > { %v1566_v20 = vpop.f32.mrf.mxu0 }
 0x19f   : > { %v1591_v21 = vadd.f32 %v1566_v20, %v4114_v60  ;;  %v3580_v20 = vld [vmem:[%s4471_s5 + $0x38] sm:$0xff] }
 0x1a0   : > { %3378 = vmatmul.msk.bf16.gmra.mxu2 %vm410_vm1, %v1962_v18 }
 0x1a1   : > { %3361 = vmatmul.msk.bf16.gmra.mxu0 %vm394_vm0, %v1879_v9  ;;  %v3577_v9 = vld [vmem:[%s4471_s5 + $0x20] sm:$0xff]  ;;  %2412 = vmatpush.bf16.msrb.mxu2 %v3580_v20 }
 0x1a2   : > { %2322 = vmatpush.bf16.msrb.mxu0 %v3577_v9  ;;  %v2087_v20 = vld [vmem:[#allocation4] sm:$0xff] }
 0x1a3   : > { %v1657_v22 = vpop.f32.mrf.mxu2 }
 0x1a4   : > { %v1682_v25 = vadd.f32 %v1657_v22, %v1591_v21 }
 0x1a5   : > { %v1831_v63 = vpop.f32.mrf.mxu3  ;;  %2413 = vmatpush.bf16.msrb.mxu2 %v3579_v3 }
 0x1a6   : > { %v1568_v28 = vpop.f32.mrf.mxu0 }
 0x1ab   : > { %v1659_v31 = vpop.f32.mrf.mxu2 }
 0x1ad   : > { %v1833_v19 = vpop.f32.mrf.mxu3 }
 0x1ae   : > { %v1571_v38 = vpop.f32.mrf.mxu0 }
 0x1af   : > { %v1593_v37 = vadd.f32 %v1571_v38, %v4130_v40 }
 0x1b0   : > { %3379 = vmatmul.msk.bf16.gmra.mxu2 %vm410_vm1, %v1963_v33 }
 0x1b1   : > { %3362 = vmatmul.msk.bf16.gmra.mxu0 %vm394_vm0, %v1880_v35  ;;  %v3582_v35 = vld [vmem:[%s4471_s5 + $0x48] sm:$0xff] }
 0x1b2   : > { %2503 = vmatpush.bf16.msrb.mxu1 %v3582_v35 }
 0x1b3   : > { %v1662_v60 = vpop.f32.mrf.mxu2 }
 0x1b4   : > { %v4175_v17 = vadd.f32 %v1662_v60, %v1593_v37 }
 0x1b6   : > { %v4177_v43 = vpop.f32.mrf.mxu0 }
 0x1bb   : > { %v4179_v36 = vpop.f32.mrf.mxu2 }
 0x1be   : > { %v1576_v45 = vpop.f32.mrf.mxu0 }
 0x1bf   : > { %v1595_v16 = vadd.f32 %v1576_v45, %v4142_v29  ;;  %v1740_v29 = vpop.f32.mrf.mxu1 }
 0x1c0   : > { %v1765_v60 = vadd.f32 %v1740_v29, %v1682_v25 }
 0x1c3   : > { %v1667_v40 = vpop.f32.mrf.mxu2 }
 0x1c4   : > { %v4185_v50 = vadd.f32 %v1667_v40, %v1595_v16  ;;  %v1836_v16 = vpop.f32.mrf.mxu3  ;;  %v1856_v40 = vadd.f32 %v1831_v63, %v1765_v60 }
 0x1c6   : > { %v4187_v15 = vpop.f32.mrf.mxu0 }
 0x1c7   : > { %v1742_v21 = vpop.f32.mrf.mxu1 }
 0x1cb   : > { %v4189_v8 = vpop.f32.mrf.mxu2 }
 0x1ce   : > { %v1581_v54 = vpop.f32.mrf.mxu0 }
 0x1cf   : > { %v1597_v56 = vadd.f32 %v1581_v54, %v1514_v39  ;;  %v1745_v33 = vpop.f32.mrf.mxu1 }
 0x1d3   : > { %v1672_v61 = vpop.f32.mrf.mxu2 }
 0x1d4   : > { %v4195_v49 = vadd.f32 %v1672_v61, %v1597_v56 }
 0x1d6   : > { %v4197_v46 = vpop.f32.mrf.mxu0 }
 0x1d7   : > { %v1747_v23 = vpop.f32.mrf.mxu1 }
 0x1db   : > { %v4205_v7 = vpop.f32.mrf.mxu2 }
 0x1de   : > { %v1586_v39 = vpop.f32.mrf.mxu0 }
 0x1df   : > { %v1599_v18 = vadd.f32 %v1586_v39, %v1516_v44  ;;  %v1418_v44 = vadd.f32 %v4112_v53, %v4116_v48  ;;  %v1750_v47 = vpop.f32.mrf.mxu1 }
 0x1e1   : > { %v1509_v37 = vadd.f32 %v4120_v32, %v1418_v44  ;;  %v1838_v32 = vpop.f32.mrf.mxu3 }
 0x1e3   : > { %v1677_v22 = vpop.f32.mrf.mxu2  ;;  %v1592_v45 = vadd.f32 %v1568_v28, %v1509_v37  ;;  %v1767_v28 = vadd.f32 %v1745_v33, %v4175_v17 }
 0x1e4   : > { %v4216_v5 = vadd.f32 %v1677_v22, %v1599_v18  ;;  %v2268_v22 = vld [vmem:[#allocation4 + $0x2] sm:$0xff] }
 0x1e5   : > { %v1683_v54 = vadd.f32 %v1659_v31, %v1592_v45  ;;  %v1511_v31 = vadd.f32 %v4134_v0, %v1420_v62  ;;  %v1858_v57 = vadd.f32 %v1836_v16, %v1767_v28 }
 0x1e6   : > { %v4218_v30 = vpop.f32.mrf.mxu0 }
 0x1e7   : > { %v1766_v53 = vadd.f32 %v1742_v21, %v1683_v54  ;;  %v2177_v21 = vld [vmem:[#allocation4 + $0x1] sm:$0xff]  ;;  %v1594_v3 = vadd.f32 %v4177_v43, %v1511_v31 }
 0x1e9   : > { %v1857_v9 = vadd.f32 %v1833_v19, %v1766_v53  ;;  %v1685_v60 = vadd.f32 %v4179_v36, %v1594_v3  ;;  %v1841_v43 = vpop.f32.mrf.mxu3 }
 0x1eb   : > { %v4228_v38 = vpop.f32.mrf.mxu2  ;;  %v1768_v16 = vadd.f32 %v1747_v23, %v1685_v60  ;;  %v1076_v23 = vadd.f32 %v4076_v41, %v4080_v51 }
 0x1ee   : > { %v1914_v2 = vpop.f32.mrf.mxu0 }
 0x1ef   : > { %v1939_v56 = vadd.f32 %v1914_v2, %v1856_v40 }
 0x1f3   : > { %v2005_v61 = vpop.f32.mrf.mxu2 }
 0x1f4   : > { %v2030_v48 = vadd.f32 %v2005_v61, %v1939_v56  ;;  %v1422_v56 = vadd.f32 %v4140_v26, %v4144_v24  ;;  %v1859_v61 = vadd.f32 %v1838_v32, %v1768_v16  ;;  %v1769_v26 = vadd.f32 %v1750_v47, %v4185_v50  ;;  %v1843_v32 = vpop.f32.mrf.mxu3 }
 0x1f6   : > { %v1916_v14 = vpop.f32.mrf.mxu0  ;;  %v2040_v39 = vmax.f32 %v2030_v48, 0.0  ;;  %v1752_v48 = vpop.f32.mrf.mxu1 }
 0x1f7   : > { %v1940_v25 = vadd.f32 %v1916_v14, %v1857_v9  ;;  %v1513_v9 = vadd.f32 %v4146_v13, %v1422_v56 }
 0x1f8   : > { %2064 = vst.msk [vmem:[#allocation4 + $0xb] sm:$0xff] %vm410_vm1, %v2040_v39 }
 0x1f9   : > { %v1596_v28 = vadd.f32 %v4187_v15, %v1513_v9  ;;  %v3581_v15 = vld [vmem:[%s4471_s5 + $0x40] sm:$0xff] }
 0x1fa   : > { %2504 = vmatpush.bf16.msrb.mxu1 %v3581_v15 }
 0x1fb   : > { %v2007_v29 = vpop.f32.mrf.mxu2 }
 0x1fc   : > { %v2031_v63 = vadd.f32 %v2007_v29, %v1940_v25 }
 0x1fe   : > { %v1919_v18 = vpop.f32.mrf.mxu0  ;;  %v2041_v44 = vmax.f32 %v2031_v63, 0.0 }
 0x1ff   : > { %v2088_v19 = vld [vmem:[#allocation4 + $0x8] sm:$0xff]  ;;  %v1941_v2 = vadd.f32 %v1919_v18, %v1858_v57  ;;  %v1167_v18 = vadd.f32 %v4086_v58, %v1076_v23  ;;  %v1755_v57 = vpop.f32.mrf.mxu1 }
 0x200   : > { %v2178_v35 = vld [vmem:[#allocation4 + $0x9] sm:$0xff]  ;;  %2065 = vst.msk [vmem:[#allocation4 + $0x13] sm:$0xff] %vm410_vm1, %v2041_v44  ;;  %v2097_v17 = vpack.c.bf16 %v2088_v19, %v2087_v20  ;;  %v1860_v20 = vadd.f32 %v1841_v43, %v1769_v26 }
 0x201   : > { %v2269_v37 = vld [vmem:[#allocation4 + $0xa] sm:$0xff]  ;;  %v2187_v0 = vpack.c.bf16 %v2178_v35, %v2177_v21  ;;  %2075 = vst.msk [vmem:[#allocation4 + $0x13] sm:$0x3] %vm2074_vm2, %v3614_v6  ;;  %v1687_v21 = vadd.f32 %v4189_v8, %v1596_v28  ;;  %v1250_v58 = vadd.f32 %v4151_v12, %v1167_v18 }
 0x202   : > { %v2278_v33 = vpack.c.bf16 %v2269_v37, %v2268_v22  ;;  %3388 = vmatmul.msk.bf16.vlgmr.msra.gmra.mxu1 %vm410_vm1, %v2097_v17  ;;  %v1846_v17 = vpop.f32.mrf.mxu3 }
 0x203   : > { %3405 = vmatmul.msk.bf16.vlgmr.msra.gmra.mxu3 %vm410_vm1, %v2187_v0  ;;  %v2010_v45 = vpop.f32.mrf.mxu2  ;;  %v1341_v47 = vadd.f32 %v4155_v52, %v1250_v58  ;;  %v1770_v19 = vadd.f32 %v1752_v48, %v1687_v21  ;;  %v1078_v52 = vadd.f32 %v4094_v10, %v4098_v11 }
 0x204   : > { %3422 = vmatmul.msk.bf16.vlgmr.msrb.gmra.mxu0 %vm410_vm1, %v2278_v33  ;;  %v2032_v40 = vadd.f32 %v2010_v45, %v1941_v2 }
 0x205   : > { %v1424_v0 = vadd.f32 %v4153_v42, %v1341_v47  ;;  %v1861_v12 = vadd.f32 %v1843_v32, %v1770_v19  ;;  %v1169_v48 = vadd.f32 %v4104_v34, %v1078_v52  ;;  %v3590_v52 = vld [vmem:[%s4471_s5 + $0x88] sm:$0xff] }
 0x206   : > { %v1921_v36 = vpop.f32.mrf.mxu0  ;;  %v2042_v54 = vmax.f32 %v2032_v40, 0.0  ;;  %v1771_v40 = vadd.f32 %v1755_v57, %v4195_v49  ;;  %2867 = vmatpush.bf16.msra.mxu1 %v3590_v52 }
 0x207   : > { %v1942_v39 = vadd.f32 %v1921_v36, %v1859_v61  ;;  %v1515_v16 = vadd.f32 %v4157_v4, %v1424_v0  ;;  %v1757_v36 = vpop.f32.mrf.mxu1 }
 0x208   : > { %2066 = vst.msk [vmem:[#allocation4 + $0x1b] sm:$0xff] %vm410_vm1, %v2042_v54  ;;  %v2360_v53 = vld [vmem:[#allocation4 + $0x12] sm:$0xff]  ;;  %v1862_v10 = vadd.f32 %v1846_v17, %v1771_v40 }
 0x209   : > { %v2369_v14 = vpack.c.bf16 %v2360_v53, %v2269_v37  ;;  %2076 = vst.msk [vmem:[#allocation4 + $0x1d] sm:$0x3] %vm2074_vm2, %v3614_v6  ;;  %v2089_v31 = vld [vmem:[#allocation4 + $0x10] sm:$0xff]  ;;  %v1598_v56 = vadd.f32 %v4197_v46, %v1515_v16 }
 0x20a   : > { %v2179_v63 = vld [vmem:[#allocation4 + $0x11] sm:$0xff]  ;;  %v1848_v9 = vpop.f32.mrf.mxu3 }
 0x20b   : > { %v2012_v62 = vpop.f32.mrf.mxu2  ;;  %3439 = vmatmul.msk.bf16.vlgmr.msrb.gmra.mxu2 %vm410_vm1, %v2369_v14  ;;  %v1689_v11 = vadd.f32 %v4205_v7, %v1598_v56  ;;  %v3584_v7 = vld [vmem:[%s4471_s5 + $0x58] sm:$0xff] }
 0x20c   : > { %v2033_v24 = vadd.f32 %v2012_v62, %v1942_v39  ;;  %2594 = vmatpush.bf16.msrb.mxu3 %v3584_v7 }
 0x20e   : > { %v1924_v25 = vpop.f32.mrf.mxu0  ;;  %v2043_v29 = vmax.f32 %v2033_v24, 0.0  ;;  %v1252_v24 = vadd.f32 %v4165_v27, %v1169_v48 }
 0x20f   : > { %v1943_v44 = vadd.f32 %v1924_v25, %v1860_v20  ;;  %v1772_v25 = vadd.f32 %v1757_v36, %v1689_v11  ;;  %v1760_v27 = vpop.f32.mrf.mxu1 }
 0x210   : > { %2067 = vst.msk [vmem:[#allocation4 + $0x23] sm:$0xff] %vm410_vm1, %v2043_v29  ;;  %v2090_v41 = vld [vmem:[#allocation4 + $0x18] sm:$0xff]  ;;  %v1343_v34 = vadd.f32 %v4167_v1, %v1252_v24 }
 0x211   : > { %v2180_v51 = vld [vmem:[#allocation4 + $0x19] sm:$0xff]  ;;  %2077 = vst.msk [vmem:[#allocation4 + $0x27] sm:$0x3] %vm2074_vm2, %v3614_v6  ;;  %v2098_v50 = vpack.c.bf16 %v2090_v41, %v2089_v31  ;;  %v1863_v20 = vadd.f32 %v1848_v9, %v1772_v25  ;;  %v2450_v25 = vld [vmem:[#allocation4 + $0xb] sm:$0xff] }
 0x212   : > { %v2271_v13 = vld [vmem:[#allocation4 + $0x1a] sm:$0xff]  ;;  %v2188_v22 = vpack.c.bf16 %v2180_v51, %v2179_v63  ;;  %v1426_v18 = vadd.f32 %v4191_v55, %v1343_v34  ;;  %v1851_v41 = vpop.f32.mrf.mxu3  ;;  %v3586_v55 = vld [vmem:[%s4471_s5 + $0x68] sm:$0xff] }
 0x213   : > { %v2279_v3 = vpack.c.bf16 %v2271_v13, %v2360_v53  ;;  %v2015_v8 = vpop.f32.mrf.mxu2  ;;  %3389 = vmatmul.msk.bf16.gmra.mxu1 %vm410_vm1, %v2098_v50  ;;  %v3583_v50 = vld [vmem:[%s4471_s5 + $0x50] sm:$0xff]  ;;  %2685 = vmatpush.bf16.msra.mxu0 %v3586_v55 }
 0x214   : > { %3406 = vmatmul.msk.bf16.gmra.mxu3 %vm410_vm1, %v2188_v22  ;;  %v2034_v35 = vadd.f32 %v2015_v8, %v1943_v44  ;;  %v1517_v22 = vadd.f32 %v4193_v59, %v1426_v18  ;;  %v3585_v44 = vld [vmem:[%s4471_s5 + $0x60] sm:$0xff] }
 0x215   : > { %3423 = vmatmul.msk.bf16.gmra.mxu0 %vm410_vm1, %v2279_v3  ;;  %v1773_v3 = vadd.f32 %v1760_v27, %v4216_v5  ;;  %2595 = vmatpush.bf16.msrb.mxu3 %v3583_v50  ;;  %v2723_v27 = vld [vmem:[#allocation4 + $0x15] sm:$0xff]  ;;  %v3589_v18 = vld [vmem:[%s4471_s5 + $0x80] sm:$0xff] }
 0x216   : > { %v1926_v37 = vpop.f32.mrf.mxu0  ;;  %v2044_v60 = vmax.f32 %v2034_v35, 0.0  ;;  %v1600_v57 = vadd.f32 %v4218_v30, %v1517_v22  ;;  %2868 = vmatpush.bf16.msra.mxu1 %v3589_v18 }
 0x217   : > { %v1944_v43 = vadd.f32 %v1926_v37, %v1861_v12  ;;  %v1864_v35 = vadd.f32 %v1851_v41, %v1773_v3  ;;  %v1762_v17 = vpop.f32.mrf.mxu1  ;;  %2686 = vmatpush.bf16.msra.mxu0 %v3585_v44  ;;  %v2633_v34 = vld [vmem:[#allocation4 + $0x1c] sm:$0xff] }
 0x218   : > { %2068 = vst.msk [vmem:[#allocation4 + $0x2b] sm:$0xff] %vm410_vm1, %v2044_v60  ;;  %v2362_v33 = vld [vmem:[#allocation4 + $0x22] sm:$0xff]  ;;  %v1691_v37 = vadd.f32 %v4228_v38, %v1600_v57 }
 0x219   : > { %2078 = vst.msk [vmem:[#allocation4 + $0x31] sm:$0x3] %vm2074_vm2, %v3614_v6  ;;  %v2370_v2 = vpack.c.bf16 %v2362_v33, %v2271_v13  ;;  %v2091_v53 = vld [vmem:[#allocation4 + $0x20] sm:$0xff]  ;;  %v3588_v13 = vld [vmem:[%s4471_s5 + $0x78] sm:$0xff] }
 0x21a   : > { %v2181_v39 = vld [vmem:[#allocation4 + $0x21] sm:$0xff]  ;;  %2776 = vmatpush.bf16.msra.mxu2 %v3588_v13  ;;  %v1774_v38 = vadd.f32 %v1762_v17, %v1691_v37  ;;  %v1853_v16 = vpop.f32.mrf.mxu3 }
 0x21b   : > { %v2017_v45 = vpop.f32.mrf.mxu2  ;;  %3440 = vmatmul.msk.bf16.gmra.mxu2 %vm410_vm1, %v2370_v2  ;;  %v2452_v41 = vld [vmem:[#allocation4 + $0x1b] sm:$0xff] }
 0x21c   : > { %v2035_v42 = vadd.f32 %v2017_v45, %v1944_v43  ;;  %v3587_v45 = vld [vmem:[%s4471_s5 + $0x70] sm:$0xff]  ;;  %v1865_v36 = vadd.f32 %v1853_v16, %v1774_v38 }
 0x21e   : > { %v1929_v54 = vpop.f32.mrf.mxu0  ;;  %v2045_v61 = vmax.f32 %v2035_v42, 0.0  ;;  %2777 = vmatpush.bf16.msra.mxu2 %v3587_v45 }
 0x21f   : > { %v2092_v14 = vld [vmem:[#allocation4 + $0x28] sm:$0xff]  ;;  %v1945_v46 = vadd.f32 %v1929_v54, %v1862_v10 }
 0x220   : > { %v2182_v62 = vld [vmem:[#allocation4 + $0x29] sm:$0xff]  ;;  %2069 = vst.msk [vmem:[#allocation4 + $0x33] sm:$0xff] %vm410_vm1, %v2045_v61  ;;  %v2099_v4 = vpack.c.bf16 %v2092_v14, %v2091_v53 }
 0x221   : > { %v2189_v23 = vpack.c.bf16 %v2182_v62, %v2181_v39  ;;  %v2273_v49 = vld [vmem:[#allocation4 + $0x2a] sm:$0xff] }
 0x222   : > { %v2280_v26 = vpack.c.bf16 %v2273_v49, %v2362_v33  ;;  %v2725_v22 = vld [vmem:[#allocation4 + $0x25] sm:$0xff] }
 0x223   : > { %v2020_v32 = vpop.f32.mrf.mxu2  ;;  %3390 = vmatmul.msk.bf16.gmra.mxu1 %vm410_vm1, %v2099_v4  ;;  %v2454_v57 = vld [vmem:[#allocation4 + $0x2b] sm:$0xff] }
 0x224   : > { %3407 = vmatmul.msk.bf16.gmra.mxu3 %vm410_vm1, %v2189_v23  ;;  %v2036_v28 = vadd.f32 %v2020_v32, %v1945_v46  ;;  %v2451_v46 = vld [vmem:[#allocation4 + $0x13] sm:$0xff] }
 0x225   : > { %3424 = vmatmul.msk.bf16.gmra.mxu0 %vm410_vm1, %v2280_v26  ;;  %v2542_v32 = vld [vmem:[#allocation4 + $0x14] sm:$0xff]  ;;  %v2460_v7 = vpack.c.bf16 %v2451_v46, %v2450_v25 }
 0x226   : > { %v1931_v29 = vpop.f32.mrf.mxu0  ;;  %v2046_v31 = vmax.f32 %v2036_v28, 0.0  ;;  %v2541_v28 = vld [vmem:[#allocation4 + $0xc] sm:$0xff] }
 0x227   : > { %v2364_v63 = vld [vmem:[#allocation4 + $0x32] sm:$0xff]  ;;  %v1946_v1 = vadd.f32 %v1931_v29, %v1863_v20  ;;  %v2642_v29 = vpack.c.bf16 %v2633_v34, %v2542_v32  ;;  %v2453_v20 = vld [vmem:[#allocation4 + $0x23] sm:$0xff] }
 0x228   : > { %2070 = vst.msk [vmem:[#allocation4 + $0x3b] sm:$0xff] %vm410_vm1, %v2046_v31  ;;  %v2371_v21 = vpack.c.bf16 %v2364_v63, %v2273_v49  ;;  %v2093_v47 = vld [vmem:[#allocation4 + $0x30] sm:$0xff]  ;;  %v2724_v31 = vld [vmem:[#allocation4 + $0x1d] sm:$0xff] }
 0x229   : > { %2079 = vst.msk [vmem:[#allocation4 + $0x3b] sm:$0x3] %vm2074_vm2, %v3614_v6  ;;  %v2183_v19 = vld [vmem:[#allocation4 + $0x31] sm:$0xff] }
 0x22a   : > { %v2726_v50 = vld [vmem:[#allocation4 + $0x2d] sm:$0xff] }
 0x22b   : > { %v2022_v51 = vpop.f32.mrf.mxu2  ;;  %3441 = vmatmul.msk.bf16.gmra.mxu2 %vm410_vm1, %v2371_v21  ;;  %v2544_v21 = vld [vmem:[#allocation4 + $0x24] sm:$0xff]  ;;  %v2734_v3 = vpack.c.bf16 %v2726_v50, %v2725_v22  ;;  %v2814_v22 = vld [vmem:[#allocation4 + $0x16] sm:$0xff] }
 0x22c   : > { %v2037_v15 = vadd.f32 %v2022_v51, %v1946_v1  ;;  %v2635_v1 = vld [vmem:[#allocation4 + $0x2c] sm:$0xff]  ;;  %v2461_v51 = vpack.c.bf16 %v2453_v20, %v2452_v41  ;;  %v2552_v13 = vpack.c.bf16 %v2544_v21, %v2633_v34 }
 0x22d   : > { %v2643_v55 = vpack.c.bf16 %v2635_v1, %v2544_v21 }
 0x22e   : > { %v1934_v58 = vpop.f32.mrf.mxu0  ;;  %v2047_v8 = vmax.f32 %v2037_v15, 0.0  ;;  %v2455_v15 = vld [vmem:[#allocation4 + $0x33] sm:$0xff] }
 0x22f   : > { %v1947_v30 = vadd.f32 %v1934_v58, %v1864_v35 }
 0x230   : > { %2071 = vst.msk [vmem:[#allocation4 + $0x43] sm:$0xff] %vm410_vm1, %v2047_v8  ;;  %v2094_v59 = vld [vmem:[#allocation4 + $0x38] sm:$0xff]  ;;  %v2462_v8 = vpack.c.bf16 %v2455_v15, %v2454_v57 }
 0x231   : > { %v2184_v5 = vld [vmem:[#allocation4 + $0x39] sm:$0xff]  ;;  %2080 = vst.msk [vmem:[#allocation4 + $0x45] sm:$0x3] %vm2074_vm2, %v3614_v6  ;;  %v2100_v0 = vpack.c.bf16 %v2094_v59, %v2093_v47 }
 0x232   : > { %v2275_v60 = vld [vmem:[#allocation4 + $0x3a] sm:$0xff]  ;;  %v2190_v12 = vpack.c.bf16 %v2184_v5, %v2183_v19 }
 0x233   : > { %v2281_v33 = vpack.c.bf16 %v2275_v60, %v2364_v63  ;;  %v2025_v2 = vpop.f32.mrf.mxu2  ;;  %3391 = vmatmul.msk.bf16.gmra.mxu1 %vm410_vm1, %v2100_v0  ;;  %v2733_v63 = vpack.c.bf16 %v2724_v31, %v2723_v27  ;;  %v2546_v58 = vld [vmem:[#allocation4 + $0x34] sm:$0xff] }
 0x234   : > { %3408 = vmatmul.msk.bf16.gmra.mxu3 %vm410_vm1, %v2190_v12  ;;  %v2038_v43 = vadd.f32 %v2025_v2, %v1947_v30  ;;  %v2553_v47 = vpack.c.bf16 %v2546_v58, %v2635_v1  ;;  %v2727_v37 = vld [vmem:[#allocation4 + $0x35] sm:$0xff]  ;;  %v4351_v12 = vld [vmem:[%s4472_s6] ss:$0 sm:$0xff] }
 0x235   : > { %3425 = vmatmul.msk.bf16.gmra.mxu0 %vm410_vm1, %v2281_v33  ;;  %v2456_v30 = vld [vmem:[#allocation4 + $0x3b] sm:$0xff] }
 0x236   : > { %v2048_v40 = vmax.f32 %v2038_v43, 0.0  ;;  %v1936_v42 = vpop.f32.mrf.mxu0 }
 0x237   : > { %v1948_v61 = vadd.f32 %v1936_v42, %v1865_v36  ;;  %v2637_v44 = vld [vmem:[#allocation4 + $0x3c] sm:$0xff] }
 0x238   : > { %2072 = vst.msk [vmem:[#allocation4 + $0x4b] sm:$0xff] %vm410_vm1, %v2048_v40  ;;  %v2366_v54 = vld [vmem:[#allocation4 + $0x42] sm:$0xff]  ;;  %v2644_v19 = vpack.c.bf16 %v2637_v44, %v2546_v58 }
 0x239   : > { %2081 = vst.msk [vmem:[#allocation4 + $0x4f] sm:$0x3] %vm2074_vm2, %v3614_v6  ;;  %v2372_v56 = vpack.c.bf16 %v2366_v54, %v2275_v60  ;;  %v2095_v39 = vld [vmem:[#allocation4 + $0x40] sm:$0xff] }
 0x23a   : > { %v2185_v62 = vld [vmem:[#allocation4 + $0x41] sm:$0xff] }
 0x23b   : > { %v2027_v53 = vpop.f32.mrf.mxu2  ;;  %3442 = vmatmul.msk.bf16.gmra.mxu2 %vm410_vm1, %v2372_v56  ;;  %v2728_v35 = vld [vmem:[#allocation4 + $0x3d] sm:$0xff] }
 0x23c   : > { %v2039_v48 = vadd.f32 %v2027_v53, %v1948_v61  ;;  %v2735_v59 = vpack.c.bf16 %v2728_v35, %v2727_v37  ;;  %v2457_v5 = vld [vmem:[#allocation4 + $0x43] sm:$0xff] }
 0x23d   : > { %v2463_v2 = vpack.c.bf16 %v2457_v5, %v2456_v30 }
 0x23e   : > { %v2049_v14 = vmax.f32 %v2039_v48, 0.0 }
 0x23f   : > { %v2548_v60 = vld [vmem:[#allocation4 + $0x44] sm:$0xff] }
 0x240   : > { %2073 = vst.msk [vmem:[#allocation4 + $0x53] sm:$0xff] %vm410_vm1, %v2049_v14  ;;  %v2096_v10 = vld [vmem:[#allocation4 + $0x48] sm:$0xff]  ;;  %v2554_v38 = vpack.c.bf16 %v2548_v60, %v2637_v44 }
 0x241   : > { %v2186_v11 = vld [vmem:[#allocation4 + $0x49] sm:$0xff]  ;;  %2082 = vst.msk [vmem:[#allocation4 + $0x59] sm:$0x3] %vm2074_vm2, %v3614_v6  ;;  %v2101_v23 = vpack.c.bf16 %v2096_v10, %v2095_v39  ;;  %v2551_v6 = vpack.c.bf16 %v2542_v32, %v2541_v28 }
 0x242   : > { %v2277_v4 = vld [vmem:[#allocation4 + $0x4a] sm:$0xff]  ;;  %v2191_v49 = vpack.c.bf16 %v2186_v11, %v2185_v62 }
 0x243   : > { %v2282_v9 = vpack.c.bf16 %v2277_v4, %v2366_v54  ;;  %3392 = vmatmul.msk.bf16.gmra.mxu1 %vm410_vm1, %v2101_v23  ;;  %v2729_v54 = vld [vmem:[#allocation4 + $0x45] sm:$0xff] }
 0x244   : > { %3409 = vmatmul.msk.bf16.gmra.mxu3 %vm410_vm1, %v2191_v49  ;;  %v2458_v49 = vld [vmem:[#allocation4 + $0x4b] sm:$0xff] }
 0x245   : > { %3426 = vmatmul.msk.bf16.gmra.mxu0 %vm410_vm1, %v2282_v9 }
 0x247   : > { %v2639_v0 = vld [vmem:[#allocation4 + $0x4c] sm:$0xff] }
 0x248   : > { %v2368_v26 = vld [vmem:[#allocation4 + $0x52] sm:$0xff]  ;;  %v2645_v43 = vpack.c.bf16 %v2639_v0, %v2548_v60 }
 0x249   : > { %v2373_v24 = vpack.c.bf16 %v2368_v26, %v2277_v4  ;;  %v2730_v40 = vld [vmem:[#allocation4 + $0x4d] sm:$0xff]  ;;  %v2641_v4 = vld [vmem:[#allocation4 + $0x5c] sm:$0xff] }
 0x24a   : > { %v2736_v61 = vpack.c.bf16 %v2730_v40, %v2729_v54  ;;  %v2459_v62 = vld [vmem:[#allocation4 + $0x53] sm:$0xff] }
 0x24b   : > { %3443 = vmatmul.msk.bf16.gmra.mxu2 %vm410_vm1, %v2373_v24  ;;  %v2550_v10 = vld [vmem:[#allocation4 + $0x54] sm:$0xff]  ;;  %v2464_v24 = vpack.c.bf16 %v2459_v62, %v2458_v49  ;;  %v2819_v62 = vld [vmem:[#allocation4 + $0x3e] sm:$0xff] }
 0x24c   : > { %v2555_v46 = vpack.c.bf16 %v2550_v10, %v2639_v0  ;;  %v2646_v32 = vpack.c.bf16 %v2641_v4, %v2550_v10  ;;  %v2817_v0 = vld [vmem:[#allocation4 + $0x2e] sm:$0xff] }
 0x253   : > { %3456 = vmatmul.msk.bf16.vlgmr.msrb.gmra.mxu1 %vm410_vm1, %v2460_v7  ;;  %v2731_v7 = vld [vmem:[#allocation4 + $0x55] sm:$0xff] }
 0x254   : > { %3473 = vmatmul.msk.bf16.vlgmr.msrb.gmra.mxu3 %vm410_vm1, %v2551_v6  ;;  %v2732_v6 = vld [vmem:[#allocation4 + $0x5d] sm:$0xff] }
 0x255   : > { %3490 = vmatmul.msk.bf16.vlgmr.msra.gmra.mxu0 %vm410_vm1, %v2642_v29  ;;  %v2737_v18 = vpack.c.bf16 %v2732_v6, %v2731_v7 }
 0x25b   : > { %3507 = vmatmul.msk.bf16.vlgmr.msra.gmra.mxu2 %vm410_vm1, %v2733_v63 }
 0x263   : > { %3457 = vmatmul.msk.bf16.gmra.mxu1 %vm410_vm1, %v2461_v51  ;;  %v2815_v51 = vld [vmem:[#allocation4 + $0x1e] sm:$0xff] }
 0x264   : > { %3474 = vmatmul.msk.bf16.gmra.mxu3 %vm410_vm1, %v2552_v13  ;;  %v2824_v15 = vpack.c.bf16 %v2815_v51, %v2814_v22 }
 0x265   : > { %3491 = vmatmul.msk.bf16.gmra.mxu0 %vm410_vm1, %v2643_v55 }
 0x26b   : > { %3508 = vmatmul.msk.bf16.gmra.mxu2 %vm410_vm1, %v2734_v3 }
 0x273   : > { %3458 = vmatmul.msk.bf16.gmra.mxu1 %vm410_vm1, %v2462_v8 }
 0x274   : > { %3475 = vmatmul.msk.bf16.gmra.mxu3 %vm410_vm1, %v2553_v47 }
 0x275   : > { %3492 = vmatmul.msk.bf16.gmra.mxu0 %vm410_vm1, %v2644_v19 }
 0x27b   : > { %3509 = vmatmul.msk.bf16.gmra.mxu2 %vm410_vm1, %v2735_v59 }
 0x27f   : > { %v2142_v17 = vpop.f32.mrf.mxu1 }
 0x280   : > { %v2167_v52 = vadd.f32 %v4351_v12, %v2142_v17 }
 0x281   : > { %v2324_v33 = vpop.f32.mrf.mxu0 }
 0x283   : > { %3459 = vmatmul.msk.bf16.gmra.mxu1 %vm410_vm1, %v2463_v2 }
 0x284   : > { %3476 = vmatmul.msk.bf16.gmra.mxu3 %vm410_vm1, %v2554_v38  ;;  %v2816_v38 = vld [vmem:[#allocation4 + $0x26] sm:$0xff] }
 0x285   : > { %3493 = vmatmul.msk.bf16.gmra.mxu0 %vm410_vm1, %v2645_v43 }
 0x286   : > { %v2233_v45 = vpop.f32.mrf.mxu3 }
 0x287   : > { %v2258_v16 = vadd.f32 %v2233_v45, %v2167_v52  ;;  %v2144_v42 = vpop.f32.mrf.mxu1  ;;  %v2825_v52 = vpack.c.bf16 %v2817_v0, %v2816_v38 }
 0x288   : > { %v2168_v53 = vadd.f32 %v4351_v12, %v2144_v42 }
 0x289   : > { %v2326_v36 = vpop.f32.mrf.mxu0  ;;  %v2349_v56 = vadd.f32 %v2324_v33, %v2258_v16 }
 0x28b   : > { %3510 = vmatmul.msk.bf16.gmra.mxu2 %vm410_vm1, %v2736_v61 }
 0x28e   : > { %v2235_v48 = vpop.f32.mrf.mxu3  ;;  %v2415_v39 = vpop.f32.mrf.mxu2 }
 0x28f   : > { %v2259_v14 = vadd.f32 %v2235_v48, %v2168_v53  ;;  %v4359_v11 = vadd.f32 %v2415_v39, %v2349_v56 }
 0x290   : > { %v2147_v23 = vpop.f32.mrf.mxu1 }
 0x291   : > { %v2350_v9 = vadd.f32 %v2326_v36, %v2259_v14  ;;  %v2169_v34 = vadd.f32 %v4351_v12, %v2147_v23  ;;  %v3592_v23 = vld [vmem:[%s4473_s7 + $0x8] sm:$0xff] }
 0x292   : > { %v2329_v26 = vpop.f32.mrf.mxu0  ;;  %2961 = vmatpush.bf16.msra.mxu3 %v3592_v23 }
 0x293   : > { %3460 = vmatmul.msk.bf16.gmra.mxu1 %vm410_vm1, %v2464_v24 }
 0x294   : > { %3477 = vmatmul.msk.bf16.gmra.mxu3 %vm410_vm1, %v2555_v46 }
 0x295   : > { %3494 = vmatmul.msk.bf16.gmra.mxu0 %vm410_vm1, %v2646_v32 }
 0x296   : > { %v2417_v28 = vpop.f32.mrf.mxu2 }
 0x297   : > { %v2238_v25 = vpop.f32.mrf.mxu3  ;;  %v4365_v31 = vadd.f32 %v2417_v28, %v2350_v9  ;;  %v2818_v9 = vld [vmem:[#allocation4 + $0x36] sm:$0xff] }
 0x298   : > { %v2260_v29 = vadd.f32 %v2238_v25, %v2169_v34  ;;  %v2149_v27 = vpop.f32.mrf.mxu1 }
 0x299   : > { %v2170_v21 = vadd.f32 %v4351_v12, %v2149_v27 }
 0x29a   : > { %v2331_v63 = vpop.f32.mrf.mxu0  ;;  %v2351_v20 = vadd.f32 %v2329_v26, %v2260_v29  ;;  %v2826_v26 = vpack.c.bf16 %v2819_v62, %v2818_v9 }
 0x29b   : > { %3511 = vmatmul.msk.bf16.gmra.mxu2 %vm410_vm1, %v2737_v18 }
 0x29e   : > { %v2420_v41 = vpop.f32.mrf.mxu2 }
 0x29f   : > { %v2240_v1 = vpop.f32.mrf.mxu3  ;;  %v4369_v55 = vadd.f32 %v2420_v41, %v2351_v20  ;;  %v2821_v20 = vld [vmem:[#allocation4 + $0x4e] sm:$0xff] }
 0x2a0   : > { %v2261_v13 = vadd.f32 %v2240_v1, %v2170_v21  ;;  %v2152_v50 = vpop.f32.mrf.mxu1 }
 0x2a1   : > { %v2171_v44 = vadd.f32 %v4351_v12, %v2152_v50 }
 0x2a2   : > { %v2334_v3 = vpop.f32.mrf.mxu0  ;;  %v2352_v58 = vadd.f32 %v2331_v63, %v2261_v13  ;;  %v2820_v13 = vld [vmem:[#allocation4 + $0x46] sm:$0xff] }
 0x2a3   : > { %3524 = vmatmul.msk.bf16.vlgmr.msra.gmra.mxu1 %vm410_vm1, %v2824_v15  ;;  %v2827_v22 = vpack.c.bf16 %v2821_v20, %v2820_v13 }
 0x2a6   : > { %v2422_v8 = vpop.f32.mrf.mxu2 }
 0x2a7   : > { %v2243_v57 = vpop.f32.mrf.mxu3  ;;  %v4373_v19 = vadd.f32 %v2422_v8, %v2352_v58  ;;  %v2823_v8 = vld [vmem:[#allocation4 + $0x5e] sm:$0xff] }
 0x2a8   : > { %v2262_v47 = vadd.f32 %v2243_v57, %v2171_v44  ;;  %v2154_v35 = vpop.f32.mrf.mxu1 }
 0x2a9   : > { %v2172_v5 = vadd.f32 %v4351_v12, %v2154_v35 }
 0x2aa   : > { %v2336_v37 = vpop.f32.mrf.mxu0  ;;  %v2353_v59 = vadd.f32 %v2334_v3, %v2262_v47 }
 0x2ae   : > { %v2425_v17 = vpop.f32.mrf.mxu2 }
 0x2af   : > { %v2245_v60 = vpop.f32.mrf.mxu3  ;;  %v4376_v30 = vadd.f32 %v2425_v17, %v2353_v59 }
 0x2b0   : > { %v2263_v33 = vadd.f32 %v2245_v60, %v2172_v5  ;;  %v2157_v2 = vpop.f32.mrf.mxu1 }
 0x2b1   : > { %v2173_v16 = vadd.f32 %v4351_v12, %v2157_v2 }
 0x2b2   : > { %v2339_v43 = vpop.f32.mrf.mxu0  ;;  %v2354_v45 = vadd.f32 %v2336_v37, %v2263_v33 }
 0x2b3   : > { %3525 = vmatmul.msk.bf16.gmra.mxu1 %vm410_vm1, %v2825_v52 }
 0x2b6   : > { %v2427_v42 = vpop.f32.mrf.mxu2 }
 0x2b7   : > { %v2248_v40 = vpop.f32.mrf.mxu3  ;;  %v2445_v54 = vadd.f32 %v2427_v42, %v2354_v45 }
 0x2b8   : > { %v2264_v36 = vadd.f32 %v2248_v40, %v2173_v16  ;;  %v2159_v56 = vpop.f32.mrf.mxu1 }
 0x2b9   : > { %v2174_v48 = vadd.f32 %v4351_v12, %v2159_v56 }
 0x2ba   : > { %v2355_v61 = vadd.f32 %v2339_v43, %v2264_v36  ;;  %v2341_v53 = vpop.f32.mrf.mxu0 }
 0x2be   : > { %v2430_v39 = vpop.f32.mrf.mxu2 }
 0x2bf   : > { %v2250_v14 = vpop.f32.mrf.mxu3  ;;  %v2446_v4 = vadd.f32 %v2430_v39, %v2355_v61 }
 0x2c0   : > { %v2265_v10 = vadd.f32 %v2250_v14, %v2174_v48  ;;  %v2162_v49 = vpop.f32.mrf.mxu1 }
 0x2c1   : > { %v2175_v46 = vadd.f32 %v4351_v12, %v2162_v49 }
 0x2c2   : > { %v2356_v24 = vadd.f32 %v2341_v53, %v2265_v10  ;;  %v2344_v32 = vpop.f32.mrf.mxu0 }
 0x2c3   : > { %3526 = vmatmul.msk.bf16.gmra.mxu1 %vm410_vm1, %v2826_v26 }
 0x2c6   : > { %v2432_v25 = vpop.f32.mrf.mxu2 }
 0x2c7   : > { %v2253_v34 = vpop.f32.mrf.mxu3  ;;  %v2447_v7 = vadd.f32 %v2432_v25, %v2356_v24 }
 0x2c8   : > { %v2266_v28 = vadd.f32 %v2253_v34, %v2175_v46  ;;  %v2164_v6 = vpop.f32.mrf.mxu1 }
 0x2c9   : > { %v2176_v27 = vadd.f32 %v4351_v12, %v2164_v6  ;;  %v2822_v12 = vld [vmem:[#allocation4 + $0x56] sm:$0xff] }
 0x2ca   : > { %v2357_v29 = vadd.f32 %v2344_v32, %v2266_v28  ;;  %v2346_v41 = vpop.f32.mrf.mxu0  ;;  %v2828_v37 = vpack.c.bf16 %v2823_v8, %v2822_v12 }
 0x2ce   : > { %v2435_v18 = vpop.f32.mrf.mxu2 }
 0x2cf   : > { %v2255_v63 = vpop.f32.mrf.mxu3  ;;  %v2448_v1 = vadd.f32 %v2435_v18, %v2357_v29 }
 0x2d0   : > { %v2267_v21 = vadd.f32 %v2255_v63, %v2176_v27  ;;  %v2506_v51 = vpop.f32.mrf.mxu1 }
 0x2d1   : > { %v2531_v50 = vadd.f32 %v2506_v51, %v4359_v11  ;;  %v3591_v11 = vld [vmem:[%s4473_s7] sm:$0xff] }
 0x2d2   : > { %v2358_v3 = vadd.f32 %v2346_v41, %v2267_v21  ;;  %2962 = vmatpush.bf16.msra.mxu3 %v3591_v11  ;;  %v2688_v43 = vpop.f32.mrf.mxu0 }
 0x2d3   : > { %3527 = vmatmul.msk.bf16.gmra.mxu1 %vm410_vm1, %v2827_v22 }
 0x2d6   : > { %v2437_v15 = vpop.f32.mrf.mxu2 }
 0x2d7   : > { %v2449_v58 = vadd.f32 %v2437_v15, %v2358_v3 }
 0x2d8   : > { %v2508_v44 = vpop.f32.mrf.mxu1 }
 0x2d9   : > { %v2532_v57 = vadd.f32 %v2508_v44, %v4365_v31 }
 0x2da   : > { %v2690_v42 = vpop.f32.mrf.mxu0 }
 0x2de   : > { %v2779_v45 = vpop.f32.mrf.mxu2 }
 0x2e0   : > { %v2511_v47 = vpop.f32.mrf.mxu1 }
 0x2e1   : > { %v2533_v35 = vadd.f32 %v2511_v47, %v4369_v55  ;;  %v2597_v55 = vpop.f32.mrf.mxu3 }
 0x2e2   : > { %v2622_v56 = vadd.f32 %v2597_v55, %v2531_v50  ;;  %v2693_v48 = vpop.f32.mrf.mxu0 }
 0x2e3   : > { %3528 = vmatmul.msk.bf16.gmra.mxu1 %vm410_vm1, %v2828_v37 }
 0x2e4   : > { %v2713_v53 = vadd.f32 %v2688_v43, %v2622_v56 }
 0x2e6   : > { %v2804_v39 = vadd.f32 %v2779_v45, %v2713_v53 }
 0x2e8   : > { %v2513_v59 = vpop.f32.mrf.mxu1 }
 0x2e9   : > { %v2534_v5 = vadd.f32 %v2513_v59, %v4373_v19  ;;  %v2599_v16 = vpop.f32.mrf.mxu3 }
 0x2ea   : > { %v2623_v10 = vadd.f32 %v2599_v16, %v2532_v57  ;;  %v2695_v24 = vpop.f32.mrf.mxu0 }
 0x2ec   : > { %v2714_v9 = vadd.f32 %v2690_v42, %v2623_v10 }
 0x2f0   : > { %v2516_v60 = vpop.f32.mrf.mxu1 }
 0x2f1   : > { %v2535_v17 = vadd.f32 %v2516_v60, %v4376_v30  ;;  %v2781_v30 = vpop.f32.mrf.mxu2  ;;  %v2602_v36 = vpop.f32.mrf.mxu3 }
 0x2f2   : > { %v2805_v26 = vadd.f32 %v2781_v30, %v2714_v9  ;;  %v2624_v34 = vadd.f32 %v2602_v36, %v2533_v35  ;;  %v2698_v20 = vpop.f32.mrf.mxu0 }
 0x2f4   : > { %v2715_v6 = vadd.f32 %v2693_v48, %v2624_v34 }
 0x2f8   : > { %v2518_v31 = vpop.f32.mrf.mxu1 }
 0x2f9   : > { %v4397_v0 = vadd.f32 %v2518_v31, %v2445_v54  ;;  %v2784_v14 = vpop.f32.mrf.mxu2  ;;  %v2604_v23 = vpop.f32.mrf.mxu3 }
 0x2fa   : > { %v2806_v27 = vadd.f32 %v2784_v14, %v2715_v6  ;;  %v2625_v18 = vadd.f32 %v2604_v23, %v2534_v5 }
 0x2fc   : > { %v2716_v51 = vadd.f32 %v2695_v24, %v2625_v18 }
 0x300   : > { %v2521_v33 = vpop.f32.mrf.mxu1 }
 0x301   : > { %v4399_v2 = vadd.f32 %v2521_v33, %v2446_v4  ;;  %v2786_v46 = vpop.f32.mrf.mxu2 }
 0x302   : > { %v2807_v50 = vadd.f32 %v2786_v46, %v2716_v51 }
 0x308   : > { %v2523_v38 = vpop.f32.mrf.mxu1 }
 0x309   : > { %v4401_v52 = vadd.f32 %v2523_v38, %v2447_v7  ;;  %v2607_v7 = vpop.f32.mrf.mxu3 }
 0x30a   : > { %v2626_v3 = vadd.f32 %v2607_v7, %v2535_v17 }
 0x30c   : > { %v2717_v12 = vadd.f32 %v2698_v20, %v2626_v3 }
 0x310   : > { %v2526_v40 = vpop.f32.mrf.mxu1 }
 0x311   : > { %v4403_v19 = vadd.f32 %v2526_v40, %v2448_v1  ;;  %v2789_v1 = vpop.f32.mrf.mxu2  ;;  %v2609_v13 = vpop.f32.mrf.mxu3 }
 0x312   : > { %v2808_v47 = vadd.f32 %v2789_v1, %v2717_v12  ;;  %v2627_v11 = vadd.f32 %v2609_v13, %v4397_v0 }
 0x318   : > { %v2528_v54 = vpop.f32.mrf.mxu1 }
 0x319   : > { %v4405_v61 = vadd.f32 %v2528_v54, %v2449_v58  ;;  %v2700_v58 = vpop.f32.mrf.mxu0  ;;  %v2791_v57 = vpop.f32.mrf.mxu2 }
 0x31a   : > { %v2612_v35 = vpop.f32.mrf.mxu3  ;;  %v2718_v17 = vadd.f32 %v2700_v58, %v2627_v11 }
 0x31b   : > { %v2628_v38 = vadd.f32 %v2612_v35, %v4399_v2 }
 0x31c   : > { %v2809_v33 = vadd.f32 %v2791_v57, %v2718_v17 }
 0x320   : > { %v2870_v62 = vpop.f32.mrf.mxu1 }
 0x321   : > { %v2895_v4 = vadd.f32 %v2870_v62, %v2804_v39  ;;  %v2703_v60 = vpop.f32.mrf.mxu0  ;;  %v2794_v31 = vpop.f32.mrf.mxu2 }
 0x322   : > { %v2614_v45 = vpop.f32.mrf.mxu3  ;;  %v2719_v40 = vadd.f32 %v2703_v60, %v2628_v38 }
 0x323   : > { %v2905_v49 = vmax.f32 %v2895_v4, 0.0  ;;  %v2629_v56 = vadd.f32 %v2614_v45, %v4401_v52 }
 0x324   : > { %v2810_v30 = vadd.f32 %v2794_v31, %v2719_v40 }
 0x325   : > { %2989 = vst.msk [vmem:[%s4413_s16] sm:$0xff] %vm410_vm1, %v2905_v49 }
 0x328   : > { %v2872_v32 = vpop.f32.mrf.mxu1 }
 0x329   : > { %v2896_v25 = vadd.f32 %v2872_v32, %v2805_v26  ;;  %v2705_v0 = vpop.f32.mrf.mxu0  ;;  %v2796_v36 = vpop.f32.mrf.mxu2 }
 0x32a   : > { %v2617_v2 = vpop.f32.mrf.mxu3  ;;  %v2720_v14 = vadd.f32 %v2705_v0, %v2629_v56 }
 0x32b   : > { %v2906_v28 = vmax.f32 %v2896_v25, 0.0  ;;  %v2630_v10 = vadd.f32 %v2617_v2, %v4403_v19 }
 0x32c   : > { %v2811_v39 = vadd.f32 %v2796_v36, %v2720_v14 }
 0x32d   : > { %v2915_v29 = vpack.c.bf16 %v2906_v28, %v2905_v49  ;;  %2990 = vst.msk [vmem:[%s4413_s16 + $0x8] sm:$0xff] %vm410_vm1, %v2906_v28 }
 0x32f   : > { %3537 = vmatmul.msk.bf16.vlgmr.msra.gmra.mxu3 %vm410_vm1, %v2915_v29 }
 0x330   : > { %v2875_v63 = vpop.f32.mrf.mxu1 }
 0x331   : > { %v2897_v21 = vadd.f32 %v2875_v63, %v2806_v27  ;;  %v2708_v23 = vpop.f32.mrf.mxu0  ;;  %v2799_v49 = vpop.f32.mrf.mxu2 }
 0x332   : > { %v2721_v26 = vadd.f32 %v2708_v23, %v2630_v10  ;;  %v2619_v52 = vpop.f32.mrf.mxu3 }
 0x333   : > { %v2907_v41 = vmax.f32 %v2897_v21, 0.0  ;;  %v2631_v34 = vadd.f32 %v2619_v52, %v4405_v61  ;;  %v3605_v61 = vld [vmem:[%s4474_s8] ss:$0 sm:$0xff] }
 0x334   : > { %v2812_v46 = vadd.f32 %v2799_v49, %v2721_v26 }
 0x335   : > { %2991 = vst.msk [vmem:[%s4413_s16 + $0x10] sm:$0xff] %vm410_vm1, %v2907_v41 }
 0x338   : > { %v2877_v22 = vpop.f32.mrf.mxu1 }
 0x339   : > { %v2898_v15 = vadd.f32 %v2877_v22, %v2807_v50  ;;  %v2710_v28 = vpop.f32.mrf.mxu0  ;;  %v2801_v7 = vpop.f32.mrf.mxu2 }
 0x33a   : > { %v2722_v6 = vadd.f32 %v2710_v28, %v2631_v34 }
 0x33b   : > { %v2908_v44 = vmax.f32 %v2898_v15, 0.0 }
 0x33c   : > { %v2813_v29 = vadd.f32 %v2801_v7, %v2722_v6 }
 0x33d   : > { %v2916_v8 = vpack.c.bf16 %v2908_v44, %v2907_v41  ;;  %2992 = vst.msk [vmem:[%s4413_s16 + $0x18] sm:$0xff] %vm410_vm1, %v2908_v44 }
 0x33f   : > { %3538 = vmatmul.msk.bf16.gmra.mxu3 %vm410_vm1, %v2916_v8 }
 0x340   : > { %v2880_v37 = vpop.f32.mrf.mxu1 }
 0x341   : > { %v2899_v59 = vadd.f32 %v2880_v37, %v2808_v47 }
 0x343   : > { %v2909_v5 = vmax.f32 %v2899_v59, 0.0 }
 0x345   : > { %2993 = vst.msk [vmem:[%s4413_s16 + $0x20] sm:$0xff] %vm410_vm1, %v2909_v5 }
 0x348   : > { %v2882_v55 = vpop.f32.mrf.mxu1 }
 0x349   : > { %v2900_v43 = vadd.f32 %v2882_v55, %v2809_v33 }
 0x34b   : > { %v2910_v16 = vmax.f32 %v2900_v43, 0.0 }
 0x34d   : > { %v2917_v42 = vpack.c.bf16 %v2910_v16, %v2909_v5  ;;  %2994 = vst.msk [vmem:[%s4413_s16 + $0x28] sm:$0xff] %vm410_vm1, %v2910_v16 }
 0x34f   : > { %3539 = vmatmul.msk.bf16.gmra.mxu3 %vm410_vm1, %v2917_v42 }
 0x350   : > { %v2885_v54 = vpop.f32.mrf.mxu1 }
 0x351   : > { %v2901_v53 = vadd.f32 %v2885_v54, %v2810_v30 }
 0x353   : > { %v2911_v48 = vmax.f32 %v2901_v53, 0.0 }
 0x355   : > { %2995 = vst.msk [vmem:[%s4413_s16 + $0x30] sm:$0xff] %vm410_vm1, %v2911_v48 }
 0x358   : > { %v2887_v62 = vpop.f32.mrf.mxu1 }
 0x359   : > { %v2902_v4 = vadd.f32 %v2887_v62, %v2811_v39 }
 0x35b   : > { %v2912_v9 = vmax.f32 %v2902_v4, 0.0 }
 0x35d   : > { %v2918_v24 = vpack.c.bf16 %v2912_v9, %v2911_v48  ;;  %2996 = vst.msk [vmem:[%s4413_s16 + $0x38] sm:$0xff] %vm410_vm1, %v2912_v9 }
 0x35f   : > { %3540 = vmatmul.msk.bf16.gmra.mxu3 %vm410_vm1, %v2918_v24 }
 0x360   : > { %v2890_v32 = vpop.f32.mrf.mxu1 }
 0x361   : > { %v2903_v25 = vadd.f32 %v2890_v32, %v2812_v46 }
 0x363   : > { %v2913_v19 = vmax.f32 %v2903_v25, 0.0 }
 0x365   : > { %2997 = vst.msk [vmem:[%s4413_s16 + $0x40] sm:$0xff] %vm410_vm1, %v2913_v19 }
 0x368   : > { %v2892_v27 = vpop.f32.mrf.mxu1 }
 0x369   : > { %v2904_v63 = vadd.f32 %v2892_v27, %v2813_v29 }
 0x36b   : > { %v2914_v18 = vmax.f32 %v2904_v63, 0.0 }
 0x36d   : > { %v2919_v20 = vpack.c.bf16 %v2914_v18, %v2913_v19  ;;  %2998 = vst.msk [vmem:[%s4413_s16 + $0x48] sm:$0xff] %vm410_vm1, %v2914_v18 }
 0x36f   : > { %3541 = vmatmul.msk.bf16.gmra.mxu3 %vm410_vm1, %v2919_v20 }
 0x3b2   : > { %v2964_v21 = vpop.f32.mrf.mxu3 }
 0x3b3   : > { %v2965_v1 = vadd.f32 %v3605_v61, %v2964_v21 }
 0x3b5   : > { %2999 = vst.msk [vmem:[%s392_s20] sm:$0xff] %vm410_vm1, %v2965_v1 }
 0x3ba   : > { %v2966_v41 = vpop.f32.mrf.mxu3 }
 0x3bb   : > { %v2967_v51 = vadd.f32 %v3605_v61, %v2966_v41 }
 0x3bd   : > { %3000 = vst.msk [vmem:[%s392_s20 + $0x8] sm:$0xff] %vm410_vm1, %v2967_v51 }
 0x3c2   : > { %v2969_v13 = vpop.f32.mrf.mxu3 }
 0x3c3   : > { %v2970_v50 = vadd.f32 %v3605_v61, %v2969_v13 }
 0x3c5   : > { %3001 = vst.msk [vmem:[%s392_s20 + $0x10] sm:$0xff] %vm410_vm1, %v2970_v50 }
 0x3ca   : > { %v2971_v22 = vpop.f32.mrf.mxu3 }
 0x3cb   : > { %v2972_v3 = vadd.f32 %v3605_v61, %v2971_v22 }
 0x3cd   : > { %3002 = vst.msk [vmem:[%s392_s20 + $0x18] sm:$0xff] %vm410_vm1, %v2972_v3 }
 0x3d2   : > { %v2974_v15 = vpop.f32.mrf.mxu3 }
 0x3d3   : > { %v2975_v58 = vadd.f32 %v3605_v61, %v2974_v15 }
 0x3d5   : > { %3003 = vst.msk [vmem:[%s392_s20 + $0x20] sm:$0xff] %vm410_vm1, %v2975_v58 }
 0x3da   : > { %v2976_v44 = vpop.f32.mrf.mxu3 }
 0x3db   : > { %v2977_v57 = vadd.f32 %v3605_v61, %v2976_v44 }
 0x3dd   : > { %3004 = vst.msk [vmem:[%s392_s20 + $0x28] sm:$0xff] %vm410_vm1, %v2977_v57 }
 0x3e2   : > { %v2979_v12 = vpop.f32.mrf.mxu3 }
 0x3e3   : > { %v2980_v8 = vadd.f32 %v3605_v61, %v2979_v12 }
 0x3e5   : > { %3005 = vst.msk [vmem:[%s392_s20 + $0x30] sm:$0xff] %vm410_vm1, %v2980_v8 }
 0x3ea   : > { %v2981_v47 = vpop.f32.mrf.mxu3 }
 0x3eb   : > { %v2982_v35 = vadd.f32 %v3605_v61, %v2981_v47 }
 0x3ed   : > { %3006 = vst.msk [vmem:[%s392_s20 + $0x38] sm:$0xff] %vm410_vm1, %v2982_v35 }
 0x3f2   : > { %v2984_v37 = vpop.f32.mrf.mxu3 }
 0x3f3   : > { %v2985_v11 = vadd.f32 %v3605_v61, %v2984_v37 }
 0x3f5   : > { %3007 = vst.msk [vmem:[%s392_s20 + $0x40] sm:$0xff] %vm410_vm1, %v2985_v11 }
 0x3fa   : > { %v2986_v59 = vpop.f32.mrf.mxu3 }
 0x3fb   : > { %v2987_v5 = vadd.f32 %v3605_v61, %v2986_v59 }
 0x3fd   : > { %3008 = vst.msk [vmem:[%s392_s20 + $0x48] sm:$0xff] %vm410_vm1, %v2987_v5 }
 0x3fe PF: > { %s21_s13 = sadd.s32 1, %s3612_s13  }
 0x3ff   : > { %p18_p4 = scmp.ge.s32.totalorder %s21_s13, 4  }
 0x401   :  { %20 = sbr.rel (!%p18_p4) target bundleno = 1 (0x1), region = 139 }

</bundles_post_ra>
